<compile_context>
chip_gen: v7x
topology: tpu7x:2x2x1
jax: 0.10.0
libtpu: 0.0.40
codegen_flags: <defaults>
</compile_context>

<pallas_src>
import jax
import jax.numpy as jnp
from jax.experimental import pallas as pl
from jax.experimental.pallas import tpu as pltpu

NUM_FEATURES = 288            # EfficientFormer_width['S2'][-1]
H1, H2 = 1024, 512
GROUPS = [9, 10, 5, 2, 9, 3, 2]
NUM_HEADS = len(GROUPS)       # 7
OUT_TOTAL = sum(GROUPS)       # 40

HEADS_PER_STEP = 2            # pack 2 heads per grid step
NUM_HEADS_PAD = 8             # 7 heads padded with one all-zero head
OUT_PAD = 128                 # per-head output width, padded lane-dense


def head_kernel(x_ref,
                w1_ref, s1_ref, b1_ref,
                w2_ref, s2_ref, b2_ref,
                w3_ref, s3_ref, b3_ref,
                o_ref):
    """One grid step == HEADS_PER_STEP fused MLP heads.

    Weights arrive int8; they are cast to bf16 as MXU operands and the
    per-output-channel scale is applied to the small f32 accumulator
    (dot(x, W*diag(s)) == dot(x, W) * s).  Each head writes its own padded
    (B, OUT_PAD) slab of the output block, so there is no cross-step
    accumulation and the head axis can be megacore-parallel.
    """
    x = x_ref[...]                                                    # (B, 288) bf16
    for i in range(HEADS_PER_STEP):                                   # static unroll
        h1 = (jnp.dot(x, w1_ref[i].astype(jnp.bfloat16),
                      preferred_element_type=jnp.float32)
              * s1_ref[i] + b1_ref[i])                                # (B, 1024) f32
        h1 = jnp.maximum(h1, 0.0).astype(jnp.bfloat16)
        h2 = (jnp.dot(h1, w2_ref[i].astype(jnp.bfloat16),
                      preferred_element_type=jnp.float32)
              * s2_ref[i] + b2_ref[i])                                # (B, 512) f32
        h2 = jnp.maximum(h2, 0.0).astype(jnp.bfloat16)
        o_ref[i] = (jnp.dot(h2, w3_ref[i].astype(jnp.bfloat16),
                            preferred_element_type=jnp.float32)
                    * s3_ref[i] + b3_ref[i])                          # (B, OUT_PAD) f32


def head_forward(x, params):
    """x: (B, 288) f32 -> (B, sum(GROUPS)) f32 (== torch.cat of the 7 heads)."""
    w1q, s1, b1, w2q, s2, b2, w3q, s3, b3 = params
    B = x.shape[0]
    xb = x.astype(jnp.bfloat16)            # cast once, not per grid step

    n_steps = NUM_HEADS_PAD // HEADS_PER_STEP

    flops = 2 * B * NUM_HEADS_PAD * (NUM_FEATURES * H1 + H1 * H2 + H2 * OUT_PAD)
    bytes_accessed = (sum(a.nbytes for a in
                          (xb, w1q, s1, b1, w2q, s2, b2, w3q, s3, b3))
                      + NUM_HEADS_PAD * B * OUT_PAD * 4)

    out_padded = pl.pallas_call(
        head_kernel,
        out_shape=jax.ShapeDtypeStruct((NUM_HEADS_PAD, B, OUT_PAD), jnp.float32),
        grid_spec=pltpu.PrefetchScalarGridSpec(
            num_scalar_prefetch=0,
            grid=(n_steps,),
            in_specs=[
                pl.BlockSpec((B, NUM_FEATURES), lambda p: (0, 0)),                 # x (shared, bf16)
                pl.BlockSpec((HEADS_PER_STEP, NUM_FEATURES, H1), lambda p: (p, 0, 0)),  # W1 int8
                pl.BlockSpec((HEADS_PER_STEP, 1, H1), lambda p: (p, 0, 0)),        # s1 f32
                pl.BlockSpec((HEADS_PER_STEP, 1, H1), lambda p: (p, 0, 0)),        # b1 f32
                pl.BlockSpec((HEADS_PER_STEP, H1, H2), lambda p: (p, 0, 0)),       # W2 int8
                pl.BlockSpec((HEADS_PER_STEP, 1, H2), lambda p: (p, 0, 0)),        # s2 f32
                pl.BlockSpec((HEADS_PER_STEP, 1, H2), lambda p: (p, 0, 0)),        # b2 f32
                pl.BlockSpec((HEADS_PER_STEP, H2, OUT_PAD), lambda p: (p, 0, 0)),  # W3 int8 (padded)
                pl.BlockSpec((HEADS_PER_STEP, 1, OUT_PAD), lambda p: (p, 0, 0)),   # s3 f32
                pl.BlockSpec((HEADS_PER_STEP, 1, OUT_PAD), lambda p: (p, 0, 0)),   # b3 f32
            ],
            # Disjoint output block per step -> no accumulator, head axis parallel.
            out_specs=pl.BlockSpec((HEADS_PER_STEP, B, OUT_PAD), lambda p: (p, 0, 0)),
        ),
        compiler_params=pltpu.CompilerParams(
            dimension_semantics=("parallel",)),
        cost_estimate=pl.CostEstimate(flops=flops, transcendentals=0,
                                      bytes_accessed=bytes_accessed),
    )(xb, w1q, s1, b1, w2q, s2, b2, w3q, s3, b3)

    # Cheap (~32 KiB) un-pad + concat along dim=1 in the wrapper.
    return jnp.concatenate(
        [out_padded[i, :, :g] for i, g in enumerate(GROUPS)], axis=1)


def init_params(key):
    """Deterministic synthetic weights, int8-quantized per output channel.

    Each head's third-layer (512, g) weights/bias are zero-padded to OUT_PAD
    columns; the extra columns are sliced away in the wrapper.  The head axis
    is padded from 7 to 8 with an all-zero head so the grid packs 2 heads per
    step cleanly.
    """
    ks = jax.random.split(key, 6)

    def dense(k, fan_in, shape):
        return jax.random.normal(k, shape, jnp.float32) / jnp.sqrt(fan_in)

    def quantize(w):
        # symmetric per-output-channel int8: scale shape (..., 1, out)
        scale = jnp.max(jnp.abs(w), axis=-2, keepdims=True) / 127.0
        scale = jnp.where(scale == 0.0, 1.0, scale)
        q = jnp.clip(jnp.round(w / scale), -127.0, 127.0).astype(jnp.int8)
        return q, scale.astype(jnp.float32)

    w1 = dense(ks[0], NUM_FEATURES, (NUM_HEADS, NUM_FEATURES, H1))
    b1 = dense(ks[1], NUM_FEATURES, (NUM_HEADS, 1, H1))
    w2 = dense(ks[2], H1, (NUM_HEADS, H1, H2))
    b2 = dense(ks[3], H1, (NUM_HEADS, 1, H2))

    w3 = jnp.zeros((NUM_HEADS, H2, OUT_PAD), jnp.float32)
    b3 = jnp.zeros((NUM_HEADS, 1, OUT_PAD), jnp.float32)
    w3_keys = jax.random.split(ks[4], NUM_HEADS)
    b3_keys = jax.random.split(ks[5], NUM_HEADS)
    for i, g in enumerate(GROUPS):
        w3 = w3.at[i, :, :g].set(dense(w3_keys[i], H2, (H2, g)))
        b3 = b3.at[i, :, :g].set(dense(b3_keys[i], H2, (1, g)))

    w1q, s1 = quantize(w1)
    w2q, s2 = quantize(w2)
    w3q, s3 = quantize(w3)

    def pad_heads(a):
        pad = [(0, NUM_HEADS_PAD - NUM_HEADS)] + [(0, 0)] * (a.ndim - 1)
        return jnp.pad(a, pad)   # zero pad head -> zero output, never read back

    return tuple(pad_heads(a) for a in (w1q, s1, b1, w2q, s2, b2, w3q, s3, b3))


def head_reference(x, params):
    """Plain-JAX reference mirroring the kernel's int8->bf16 / f32-accum math."""
    w1q, s1, b1, w2q, s2, b2, w3q, s3, b3 = params
    xb = x.astype(jnp.bfloat16)
    outs = []
    for i, g in enumerate(GROUPS):
        h = (jnp.dot(xb, w1q[i].astype(jnp.bfloat16),
                     preferred_element_type=jnp.float32) * s1[i] + b1[i])
        h = jnp.maximum(h, 0.0).astype(jnp.bfloat16)
        h = (jnp.dot(h, w2q[i].astype(jnp.bfloat16),
                     preferred_element_type=jnp.float32) * s2[i] + b2[i])
        h = jnp.maximum(h, 0.0).astype(jnp.bfloat16)
        o = (jnp.dot(h, w3q[i].astype(jnp.bfloat16),
                     preferred_element_type=jnp.float32) * s3[i] + b3[i])
        outs.append(o[:, :g])
    return jnp.concatenate(outs, axis=1)


if __name__ == "__main__":
    key = jax.random.PRNGKey(0)
    k_x, k_p = jax.random.split(key)

    B = 8
    x = jax.random.normal(k_x, (B, NUM_FEATURES), jnp.float32)
    params = init_params(k_p)

    out = jax.block_until_ready(head_forward(x, params))
    assert out.shape == (B, OUT_TOTAL), out.shape

    ref = head_reference(x, params)
    max_err = float(jnp.max(jnp.abs(out - ref)))
    assert jnp.allclose(out, ref, atol=2e-2, rtol=2e-2), max_err

    print("KERNEL_OK")
</pallas_src>

<mosaic_0001>
module attributes {stable_mosaic.version = 11 : i64} {
  func.func @head_kernel(%arg0: i32, %arg1: memref<8x288xbf16, #tpu.memory_space<vmem>>, %arg2: memref<2x288x1024xi8, #tpu.memory_space<vmem>>, %arg3: memref<2x1x1024xf32, #tpu.memory_space<vmem>>, %arg4: memref<2x1x1024xf32, #tpu.memory_space<vmem>>, %arg5: memref<2x1024x512xi8, #tpu.memory_space<vmem>>, %arg6: memref<2x1x512xf32, #tpu.memory_space<vmem>>, %arg7: memref<2x1x512xf32, #tpu.memory_space<vmem>>, %arg8: memref<2x512x128xi8, #tpu.memory_space<vmem>>, %arg9: memref<2x1x128xf32, #tpu.memory_space<vmem>>, %arg10: memref<2x1x128xf32, #tpu.memory_space<vmem>>, %arg11: memref<2x8x128xf32, #tpu.memory_space<vmem>>) attributes {dimension_semantics = [#tpu.dimension_semantics<parallel>], iteration_bounds = array<i64: 4>, scalar_prefetch = 0 : i64, scratch_operands = 0 : i64, tpu.core_type = #tpu.core_type<tc>, window_params = [{pipeline_mode = #tpu.pipeline_mode<synchronous>, transform_indices = @transform_0, window_bounds = array<i64: 8, 288>}, {transform_indices = @transform_1, window_bounds = array<i64: 2, 288, 1024>}, {transform_indices = @transform_2, window_bounds = array<i64: 2, 1, 1024>}, {transform_indices = @transform_3, window_bounds = array<i64: 2, 1, 1024>}, {transform_indices = @transform_4, window_bounds = array<i64: 2, 1024, 512>}, {transform_indices = @transform_5, window_bounds = array<i64: 2, 1, 512>}, {transform_indices = @transform_6, window_bounds = array<i64: 2, 1, 512>}, {transform_indices = @transform_7, window_bounds = array<i64: 2, 512, 128>}, {transform_indices = @transform_8, window_bounds = array<i64: 2, 1, 128>}, {transform_indices = @transform_9, window_bounds = array<i64: 2, 1, 128>}, {transform_indices = @transform_10, window_bounds = array<i64: 2, 8, 128>}]} {
    %c0 = arith.constant 0 : index
    %c0_0 = arith.constant 0 : index
    %0 = vector.load %arg1[%c0, %c0_0] : memref<8x288xbf16, #tpu.memory_space<vmem>>, vector<8x288xbf16>
    %c0_1 = arith.constant 0 : index
    %c0_2 = arith.constant 0 : index
    %c0_3 = arith.constant 0 : index
    %1 = vector.load %arg2[%c0_1, %c0_2, %c0_3] : memref<2x288x1024xi8, #tpu.memory_space<vmem>>, vector<1x288x1024xi8>
    %2 = vector.shape_cast %1 : vector<1x288x1024xi8> to vector<288x1024xi8>
    %3 = arith.sitofp %2 : vector<288x1024xi8> to vector<288x1024xbf16>
    %cst = arith.constant dense<0.000000e+00> : vector<8x1024xf32>
    %4 = tpu.matmul %0, %3, %cst {dimension_numbers = #tpu.dot_dimension_numbers<[1], [0], [0], [1], [0, 0, 1, 1], [], []>} : vector<8x288xbf16>, vector<288x1024xbf16>, vector<8x1024xf32> -> vector<8x1024xf32>
    %c0_4 = arith.constant 0 : index
    %c0_5 = arith.constant 0 : index
    %c0_6 = arith.constant 0 : index
    %5 = vector.load %arg3[%c0_4, %c0_5, %c0_6] : memref<2x1x1024xf32, #tpu.memory_space<vmem>>, vector<1x1x1024xf32>
    %6 = vector.shape_cast %5 : vector<1x1x1024xf32> to vector<1x1024xf32>
    %7 = vector.broadcast %6 : vector<1x1024xf32> to vector<8x1024xf32>
    %8 = arith.mulf %4, %7 : vector<8x1024xf32>
    %c0_7 = arith.constant 0 : index
    %c0_8 = arith.constant 0 : index
    %c0_9 = arith.constant 0 : index
    %9 = vector.load %arg4[%c0_7, %c0_8, %c0_9] : memref<2x1x1024xf32, #tpu.memory_space<vmem>>, vector<1x1x1024xf32>
    %10 = vector.shape_cast %9 : vector<1x1x1024xf32> to vector<1x1024xf32>
    %11 = vector.broadcast %10 : vector<1x1024xf32> to vector<8x1024xf32>
    %12 = arith.addf %8, %11 : vector<8x1024xf32>
    %cst_10 = arith.constant 0.000000e+00 : f32
    %13 = vector.broadcast %cst_10 : f32 to vector<8x1024xf32>
    %14 = arith.maximumf %12, %13 : vector<8x1024xf32>
    %15 = arith.truncf %14 : vector<8x1024xf32> to vector<8x1024xbf16>
    %c0_11 = arith.constant 0 : index
    %c0_12 = arith.constant 0 : index
    %c0_13 = arith.constant 0 : index
    %16 = vector.load %arg5[%c0_11, %c0_12, %c0_13] : memref<2x1024x512xi8, #tpu.memory_space<vmem>>, vector<1x1024x512xi8>
    %17 = vector.shape_cast %16 : vector<1x1024x512xi8> to vector<1024x512xi8>
    %18 = arith.sitofp %17 : vector<1024x512xi8> to vector<1024x512xbf16>
    %cst_14 = arith.constant dense<0.000000e+00> : vector<8x512xf32>
    %19 = tpu.matmul %15, %18, %cst_14 {dimension_numbers = #tpu.dot_dimension_numbers<[1], [0], [0], [1], [0, 0, 1, 1], [], []>} : vector<8x1024xbf16>, vector<1024x512xbf16>, vector<8x512xf32> -> vector<8x512xf32>
    %c0_15 = arith.constant 0 : index
    %c0_16 = arith.constant 0 : index
    %c0_17 = arith.constant 0 : index
    %20 = vector.load %arg6[%c0_15, %c0_16, %c0_17] : memref<2x1x512xf32, #tpu.memory_space<vmem>>, vector<1x1x512xf32>
    %21 = vector.shape_cast %20 : vector<1x1x512xf32> to vector<1x512xf32>
    %22 = vector.broadcast %21 : vector<1x512xf32> to vector<8x512xf32>
    %23 = arith.mulf %19, %22 : vector<8x512xf32>
    %c0_18 = arith.constant 0 : index
    %c0_19 = arith.constant 0 : index
    %c0_20 = arith.constant 0 : index
    %24 = vector.load %arg7[%c0_18, %c0_19, %c0_20] : memref<2x1x512xf32, #tpu.memory_space<vmem>>, vector<1x1x512xf32>
    %25 = vector.shape_cast %24 : vector<1x1x512xf32> to vector<1x512xf32>
    %26 = vector.broadcast %25 : vector<1x512xf32> to vector<8x512xf32>
    %27 = arith.addf %23, %26 : vector<8x512xf32>
    %cst_21 = arith.constant 0.000000e+00 : f32
    %28 = vector.broadcast %cst_21 : f32 to vector<8x512xf32>
    %29 = arith.maximumf %27, %28 : vector<8x512xf32>
    %30 = arith.truncf %29 : vector<8x512xf32> to vector<8x512xbf16>
    %c0_22 = arith.constant 0 : index
    %c0_23 = arith.constant 0 : index
    %c0_24 = arith.constant 0 : index
    %31 = vector.load %arg8[%c0_22, %c0_23, %c0_24] : memref<2x512x128xi8, #tpu.memory_space<vmem>>, vector<1x512x128xi8>
    %32 = vector.shape_cast %31 : vector<1x512x128xi8> to vector<512x128xi8>
    %33 = arith.sitofp %32 : vector<512x128xi8> to vector<512x128xbf16>
    %cst_25 = arith.constant dense<0.000000e+00> : vector<8x128xf32>
    %34 = tpu.matmul %30, %33, %cst_25 {dimension_numbers = #tpu.dot_dimension_numbers<[1], [0], [0], [1], [0, 0, 1, 1], [], []>} : vector<8x512xbf16>, vector<512x128xbf16>, vector<8x128xf32> -> vector<8x128xf32>
    %c0_26 = arith.constant 0 : index
    %c0_27 = arith.constant 0 : index
    %c0_28 = arith.constant 0 : index
    %35 = vector.load %arg9[%c0_26, %c0_27, %c0_28] : memref<2x1x128xf32, #tpu.memory_space<vmem>>, vector<1x1x128xf32>
    %36 = vector.shape_cast %35 : vector<1x1x128xf32> to vector<1x128xf32>
    %37 = vector.broadcast %36 : vector<1x128xf32> to vector<8x128xf32>
    %38 = arith.mulf %34, %37 : vector<8x128xf32>
    %c0_29 = arith.constant 0 : index
    %c0_30 = arith.constant 0 : index
    %c0_31 = arith.constant 0 : index
    %39 = vector.load %arg10[%c0_29, %c0_30, %c0_31] : memref<2x1x128xf32, #tpu.memory_space<vmem>>, vector<1x1x128xf32>
    %40 = vector.shape_cast %39 : vector<1x1x128xf32> to vector<1x128xf32>
    %41 = vector.broadcast %40 : vector<1x128xf32> to vector<8x128xf32>
    %42 = arith.addf %38, %41 : vector<8x128xf32>
    %c0_32 = arith.constant 0 : index
    %c0_33 = arith.constant 0 : index
    %c0_34 = arith.constant 0 : index
    %43 = vector.load %arg11[%c0_32, %c0_33, %c0_34] : memref<2x8x128xf32, #tpu.memory_space<vmem>>, vector<1x8x128xf32>
    %44 = vector.shape_cast %43 : vector<1x8x128xf32> to vector<8x128xf32>
    %45 = vector.shape_cast %42 : vector<8x128xf32> to vector<1x8x128xf32>
    tpu.vector_store %arg11[%c0_32, %c0_33, %c0_34], %45 {strides = array<i32>} : memref<2x8x128xf32, #tpu.memory_space<vmem>>, vector<1x8x128xf32>,
    %c1 = arith.constant 1 : index
    %c0_35 = arith.constant 0 : index
    %c0_36 = arith.constant 0 : index
    %46 = vector.load %arg2[%c1, %c0_35, %c0_36] : memref<2x288x1024xi8, #tpu.memory_space<vmem>>, vector<1x288x1024xi8>
    %47 = vector.shape_cast %46 : vector<1x288x1024xi8> to vector<288x1024xi8>
    %48 = arith.sitofp %47 : vector<288x1024xi8> to vector<288x1024xbf16>
    %cst_37 = arith.constant dense<0.000000e+00> : vector<8x1024xf32>
    %49 = tpu.matmul %0, %48, %cst_37 {dimension_numbers = #tpu.dot_dimension_numbers<[1], [0], [0], [1], [0, 0, 1, 1], [], []>} : vector<8x288xbf16>, vector<288x1024xbf16>, vector<8x1024xf32> -> vector<8x1024xf32>
    %c1_38 = arith.constant 1 : index
    %c0_39 = arith.constant 0 : index
    %c0_40 = arith.constant 0 : index
    %50 = vector.load %arg3[%c1_38, %c0_39, %c0_40] : memref<2x1x1024xf32, #tpu.memory_space<vmem>>, vector<1x1x1024xf32>
    %51 = vector.shape_cast %50 : vector<1x1x1024xf32> to vector<1x1024xf32>
    %52 = vector.broadcast %51 : vector<1x1024xf32> to vector<8x1024xf32>
    %53 = arith.mulf %49, %52 : vector<8x1024xf32>
    %c1_41 = arith.constant 1 : index
    %c0_42 = arith.constant 0 : index
    %c0_43 = arith.constant 0 : index
    %54 = vector.load %arg4[%c1_41, %c0_42, %c0_43] : memref<2x1x1024xf32, #tpu.memory_space<vmem>>, vector<1x1x1024xf32>
    %55 = vector.shape_cast %54 : vector<1x1x1024xf32> to vector<1x1024xf32>
    %56 = vector.broadcast %55 : vector<1x1024xf32> to vector<8x1024xf32>
    %57 = arith.addf %53, %56 : vector<8x1024xf32>
    %cst_44 = arith.constant 0.000000e+00 : f32
    %58 = vector.broadcast %cst_44 : f32 to vector<8x1024xf32>
    %59 = arith.maximumf %57, %58 : vector<8x1024xf32>
    %60 = arith.truncf %59 : vector<8x1024xf32> to vector<8x1024xbf16>
    %c1_45 = arith.constant 1 : index
    %c0_46 = arith.constant 0 : index
    %c0_47 = arith.constant 0 : index
    %61 = vector.load %arg5[%c1_45, %c0_46, %c0_47] : memref<2x1024x512xi8, #tpu.memory_space<vmem>>, vector<1x1024x512xi8>
    %62 = vector.shape_cast %61 : vector<1x1024x512xi8> to vector<1024x512xi8>
    %63 = arith.sitofp %62 : vector<1024x512xi8> to vector<1024x512xbf16>
    %cst_48 = arith.constant dense<0.000000e+00> : vector<8x512xf32>
    %64 = tpu.matmul %60, %63, %cst_48 {dimension_numbers = #tpu.dot_dimension_numbers<[1], [0], [0], [1], [0, 0, 1, 1], [], []>} : vector<8x1024xbf16>, vector<1024x512xbf16>, vector<8x512xf32> -> vector<8x512xf32>
    %c1_49 = arith.constant 1 : index
    %c0_50 = arith.constant 0 : index
    %c0_51 = arith.constant 0 : index
    %65 = vector.load %arg6[%c1_49, %c0_50, %c0_51] : memref<2x1x512xf32, #tpu.memory_space<vmem>>, vector<1x1x512xf32>
    %66 = vector.shape_cast %65 : vector<1x1x512xf32> to vector<1x512xf32>
    %67 = vector.broadcast %66 : vector<1x512xf32> to vector<8x512xf32>
    %68 = arith.mulf %64, %67 : vector<8x512xf32>
    %c1_52 = arith.constant 1 : index
    %c0_53 = arith.constant 0 : index
    %c0_54 = arith.constant 0 : index
    %69 = vector.load %arg7[%c1_52, %c0_53, %c0_54] : memref<2x1x512xf32, #tpu.memory_space<vmem>>, vector<1x1x512xf32>
    %70 = vector.shape_cast %69 : vector<1x1x512xf32> to vector<1x512xf32>
    %71 = vector.broadcast %70 : vector<1x512xf32> to vector<8x512xf32>
    %72 = arith.addf %68, %71 : vector<8x512xf32>
    %cst_55 = arith.constant 0.000000e+00 : f32
    %73 = vector.broadcast %cst_55 : f32 to vector<8x512xf32>
    %74 = arith.maximumf %72, %73 : vector<8x512xf32>
    %75 = arith.truncf %74 : vector<8x512xf32> to vector<8x512xbf16>
    %c1_56 = arith.constant 1 : index
    %c0_57 = arith.constant 0 : index
    %c0_58 = arith.constant 0 : index
    %76 = vector.load %arg8[%c1_56, %c0_57, %c0_58] : memref<2x512x128xi8, #tpu.memory_space<vmem>>, vector<1x512x128xi8>
    %77 = vector.shape_cast %76 : vector<1x512x128xi8> to vector<512x128xi8>
    %78 = arith.sitofp %77 : vector<512x128xi8> to vector<512x128xbf16>
    %cst_59 = arith.constant dense<0.000000e+00> : vector<8x128xf32>
    %79 = tpu.matmul %75, %78, %cst_59 {dimension_numbers = #tpu.dot_dimension_numbers<[1], [0], [0], [1], [0, 0, 1, 1], [], []>} : vector<8x512xbf16>, vector<512x128xbf16>, vector<8x128xf32> -> vector<8x128xf32>
    %c1_60 = arith.constant 1 : index
    %c0_61 = arith.constant 0 : index
    %c0_62 = arith.constant 0 : index
    %80 = vector.load %arg9[%c1_60, %c0_61, %c0_62] : memref<2x1x128xf32, #tpu.memory_space<vmem>>, vector<1x1x128xf32>
    %81 = vector.shape_cast %80 : vector<1x1x128xf32> to vector<1x128xf32>
    %82 = vector.broadcast %81 : vector<1x128xf32> to vector<8x128xf32>
    %83 = arith.mulf %79, %82 : vector<8x128xf32>
    %c1_63 = arith.constant 1 : index
    %c0_64 = arith.constant 0 : index
    %c0_65 = arith.constant 0 : index
    %84 = vector.load %arg10[%c1_63, %c0_64, %c0_65] : memref<2x1x128xf32, #tpu.memory_space<vmem>>, vector<1x1x128xf32>
    %85 = vector.shape_cast %84 : vector<1x1x128xf32> to vector<1x128xf32>
    %86 = vector.broadcast %85 : vector<1x128xf32> to vector<8x128xf32>
    %87 = arith.addf %83, %86 : vector<8x128xf32>
    %c1_66 = arith.constant 1 : index
    %c0_67 = arith.constant 0 : index
    %c0_68 = arith.constant 0 : index
    %88 = vector.load %arg11[%c1_66, %c0_67, %c0_68] : memref<2x8x128xf32, #tpu.memory_space<vmem>>, vector<1x8x128xf32>
    %89 = vector.shape_cast %88 : vector<1x8x128xf32> to vector<8x128xf32>
    %90 = vector.shape_cast %87 : vector<8x128xf32> to vector<1x8x128xf32>
    tpu.vector_store %arg11[%c1_66, %c0_67, %c0_68], %90 {strides = array<i32>} : memref<2x8x128xf32, #tpu.memory_space<vmem>>, vector<1x8x128xf32>,
    return
  }
  func.func @transform_0(%arg0: i32) -> (i32, i32) {
    %c0_i32 = arith.constant 0 : i32
    %c0_i32_0 = arith.constant 0 : i32
    %c0_i32_1 = arith.constant 0 : i32
    return %c0_i32, %c0_i32_0 : i32, i32
  }
  func.func @transform_1(%arg0: i32) -> (i32, i32, i32) {
    %c0_i32 = arith.constant 0 : i32
    %c0_i32_0 = arith.constant 0 : i32
    %c0_i32_1 = arith.constant 0 : i32
    return %arg0, %c0_i32, %c0_i32_0 : i32, i32, i32
  }
  func.func @transform_2(%arg0: i32) -> (i32, i32, i32) {
    %c0_i32 = arith.constant 0 : i32
    %c0_i32_0 = arith.constant 0 : i32
    %c0_i32_1 = arith.constant 0 : i32
    return %arg0, %c0_i32, %c0_i32_0 : i32, i32, i32
  }
  func.func @transform_3(%arg0: i32) -> (i32, i32, i32) {
    %c0_i32 = arith.constant 0 : i32
    %c0_i32_0 = arith.constant 0 : i32
    %c0_i32_1 = arith.constant 0 : i32
    return %arg0, %c0_i32, %c0_i32_0 : i32, i32, i32
  }
  func.func @transform_4(%arg0: i32) -> (i32, i32, i32) {
    %c0_i32 = arith.constant 0 : i32
    %c0_i32_0 = arith.constant 0 : i32
    %c0_i32_1 = arith.constant 0 : i32
    return %arg0, %c0_i32, %c0_i32_0 : i32, i32, i32
  }
  func.func @transform_5(%arg0: i32) -> (i32, i32, i32) {
    %c0_i32 = arith.constant 0 : i32
    %c0_i32_0 = arith.constant 0 : i32
    %c0_i32_1 = arith.constant 0 : i32
    return %arg0, %c0_i32, %c0_i32_0 : i32, i32, i32
  }
  func.func @transform_6(%arg0: i32) -> (i32, i32, i32) {
    %c0_i32 = arith.constant 0 : i32
    %c0_i32_0 = arith.constant 0 : i32
    %c0_i32_1 = arith.constant 0 : i32
    return %arg0, %c0_i32, %c0_i32_0 : i32, i32, i32
  }
  func.func @transform_7(%arg0: i32) -> (i32, i32, i32) {
    %c0_i32 = arith.constant 0 : i32
    %c0_i32_0 = arith.constant 0 : i32
    %c0_i32_1 = arith.constant 0 : i32
    return %arg0, %c0_i32, %c0_i32_0 : i32, i32, i32
  }
  func.func @transform_8(%arg0: i32) -> (i32, i32, i32) {
    %c0_i32 = arith.constant 0 : i32
    %c0_i32_0 = arith.constant 0 : i32
    %c0_i32_1 = arith.constant 0 : i32
    return %arg0, %c0_i32, %c0_i32_0 : i32, i32, i32
  }
  func.func @transform_9(%arg0: i32) -> (i32, i32, i32) {
    %c0_i32 = arith.constant 0 : i32
    %c0_i32_0 = arith.constant 0 : i32
    %c0_i32_1 = arith.constant 0 : i32
    return %arg0, %c0_i32, %c0_i32_0 : i32, i32, i32
  }
  func.func @transform_10(%arg0: i32) -> (i32, i32, i32) {
    %c0_i32 = arith.constant 0 : i32
    %c0_i32_0 = arith.constant 0 : i32
    %c0_i32_1 = arith.constant 0 : i32
    return %arg0, %c0_i32, %c0_i32_0 : i32, i32, i32
  }
}

</mosaic_0001>

<bundles_post_ra>
// kernel: tpu_custom_call.1
= control target key start
LH: loop header
LB: loop body
LE: loop exit
PB: predicated region body
PF: predicated region fallthrough
CT: control target
= control target key end

     0   :  { %s6434_s0 = inlined_call_operand.hbm [shape: bf16[8,288], index: 0, kind: input, shape index: {}]   ;;  %s6435_s1 = inlined_call_operand.hbm [shape: s8[8,288,1024], index: 1, kind: input, shape index: {}]   ;;  %s6436_s2 = inlined_call_operand.hbm [shape: f32[8,1,1024], index: 2, kind: input, shape index: {}]   ;;  %s6437_s3 = inlined_call_operand.hbm [shape: f32[8,1,1024], index: 3, kind: input, shape index: {}]   ;;  %s6438_s4 = inlined_call_operand.hbm [shape: s8[8,1024,512], index: 4, kind: input, shape index: {}]   ;;  %s6439_s5 = inlined_call_operand.hbm [shape: f32[8,1,512], index: 5, kind: input, shape index: {}]   ;;  %s6440_s6 = inlined_call_operand.hbm [shape: f32[8,1,512], index: 6, kind: input, shape index: {}]   ;;  %s6441_s7 = inlined_call_operand.hbm [shape: s8[8,512,128], index: 7, kind: input, shape index: {}]   ;;  %s6442_s8 = inlined_call_operand.hbm [shape: f32[8,1,128], index: 8, kind: input, shape index: {}]   ;;  %s6443_s9 = inlined_call_operand.hbm [shape: f32[8,1,128], index: 9, kind: input, shape index: {}]   ;;  %s6444_s10 = inlined_call_operand.hbm [shape: f32[8,8,128], index: 10, kind: output, shape index: {}]  }
   0x1   :  { %6474 = sst [smem:[#allocation31_spill]] %s6434_s0 }
   0x2   :  { %6475 = sst [smem:[#allocation32_spill]] %s6435_s1 }
   0x3   :  { %6476 = sst [smem:[#allocation33_spill]] %s6436_s2 }
   0x4   :  { %6477 = sst [smem:[#allocation34_spill]] %s6437_s3 }
   0x5   :  { %6478 = sst [smem:[#allocation35_spill]] %s6439_s5 }
   0x6   :  { %6479 = sst [smem:[#allocation36_spill]] %s6441_s7 }
   0x7   :  { %6480 = sst [smem:[#allocation37_spill]] %s6442_s8 }
   0x8   :  { %6481 = sst [smem:[#allocation38_spill]] %s6443_s9 }
   0x9   :  { %6482 = sst [smem:[#allocation39_spill]] %s6444_s10 }
   0xa   :  { %15 = vsyncpa [#allocation3], 0 }
   0xb   :  { %16 = vsyncpa [#allocation6], 0 }
   0xc   :  { %18 = vsyncpa [#allocation6 + $0x1], 0 }
   0xd   :  { %19 = vsyncpa [#allocation9], 0 }
   0xe   :  { %21 = vsyncpa [#allocation9 + $0x1], 0 }
   0xf   :  { %22 = vsyncpa [#allocation12], 0 }
  0x10   :  { %24 = vsyncpa [#allocation12 + $0x1], 0 }
  0x11   :  { %25 = vsyncpa [#allocation15], 0 }
  0x12   :  { %27 = vsyncpa [#allocation15 + $0x1], 0 }
  0x13   :  { %28 = vsyncpa [#allocation18], 0 }
  0x14   :  { %30 = vsyncpa [#allocation18 + $0x1], 0 }
  0x15   :  { %31 = vsyncpa [#allocation4], 0 }
  0x16   :  { %33 = vsyncpa [#allocation4 + $0x1], 0  ;;  %s5226_s13 = smov 0   ;;  %s5228_s14 = smov 0  }
  0x17   :  { %s5230_s15 = smov 0   ;;  %s5232_s16 = smov 0  }
  0x18 LB: > { %6483 = sst [smem:[#allocation27_spill]] %s5142_s15  ;;  %s5247_s17 = sadd.s32 1, %s5146_s16   ;;  %s5146_s16 = sphi %s5232_s16, %s6526_s16   ;;  %s5142_s15 = sphi %s5230_s15, %s6528_s15   ;;  %s5138_s14 = sphi %s5228_s14, %s6530_s14   ;;  %s5134_s13 = sphi %s5226_s13, %s6529_s13  }
  0x19   : > { %6484 = sst [smem:[#allocation28_spill]] %s5247_s17  ;;  %s67_s18 = sadd.s32 1, %s5142_s15 }
  0x1a   : > { %s64_s19 = ssub.s32 %s5146_s16, %s5247_s17  ;;  %p6445_p0 = scmp.ne.s32.totalorder %s5142_s15, %s5138_s14 }
  0x1b   : > { %p65_p1 = scmp.eq.s32.totalorder %s64_s19, 0  ;;  %p75_p2 = scmp.eq.s32.totalorder %s5146_s16, 0 }
  0x1c   : > { %p4706_p3 = scmp.lt.s32.totalorder %s5146_s16, 4  ;;  %s5263_s21 = sand.u32 1, %s5146_s16  }
  0x1d   : > { %s5257_s20 = scalar_select %p65_p1, %s5142_s15, %s67_s18  }
  0x1e   : > { %p76_p4 = por %p75_p2, %p6445_p0  ;;  %s5266_s22 = sand.u32 1, %s5142_s15  }
  0x1f   : > { %6485 = sst [smem:[#allocation29_spill]] %s5257_s20  ;;  %s4642_s23 = smul.u32 1152, %s5266_s22 }
  0x20   : > { %p5269_p5 = pnand %p4706_p3, %p76_p4  ;;  %s4643_s25 = smul.u32 18432, %s5146_s16 }
  0x21   : > { %s6487_s1 = sld [smem:[#allocation32_spill]]  ;;  %s353_s29 = scalar_lea.vmem [#allocation5], %s4642_s23 }
  0x22   : > { %s6486_s24 = scalar_select %p5269_p5, 1, 0 }
  0x23   : > { %s361_s30 = sshll.u32 %s353_s29, 4  ;;  %s6450_s11 = scalar_lea.sflag [#allocation6], %s5263_s21  ;;  %s5279_s30 = int_to_ptr.vmem [resolvable:$true] %s361_s30 }
  0x24   : > { %p5286_p7 = pneg %p5269_p5 }
  0x26   : > { %s6488_s18 = scalar_select %p5286_p7, 1, 0 }
  0x27   : > { %s5277_s28 = scalar_lea.hbm %s6487_s1, %s4643_s25  ;;  %s4767_s26 = scalar_lea.hbm %s6487_s1, 73728 }
  0x28   : > { %s4762_s12 = scalar_lea.hbm %s5277_s28, 18432  ;;  %p4768_p10 = scmp.lt.u32.totalorder %s5277_s28, %s6487_s1 }
  0x29   : > { %p4763_p6 = scmp.ne.s32.totalorder %s5277_s28, %s4762_s12  ;;  %p4769_p11 = scmp.lt.u32.totalorder %s4767_s26, %s4762_s12 }
  0x2a   : > { %p4771_p13 = scmp.lt.u32.totalorder %s4762_s12, %s5277_s28 }
  0x2b   : > { %p4765_p8 = pnand %p5286_p7, %p4763_p6  ;;  %p4770_p12 = por %p4769_p11, %p4768_p10 }
  0x2d   : > { %p4766_p9 = pneg %p4765_p8  ;;  %p4772_p1 = por %p4771_p13, %p4770_p12 }
  0x2f   : > { %p4773_p2 = pnand %p4772_p1, %p4766_p9 }
  0x31   : > { %4776 = shalt.err (!%p4773_p2)
}
  0x32   : > { %s4777_s29 = scalar_lea.vmem %s5279_s30, 18432  ;;  %s5148_s19 = smov [#allocation5]  }
  0x33   : > { %p4778_p3 = scmp.ne.s32.totalorder %s5279_s30, %s4777_s29  ;;  %s4782_s25 = sshll.u32 %s5148_s19, 4  ;;  %s4783_s25 = int_to_ptr.vmem [resolvable:$false] %s4782_s25 }
  0x34   : > { %s4784_s23 = scalar_lea.vmem %s4783_s25, 36864  ;;  %p4785_p8 = scmp.lt.s32.totalorder %s5279_s30, %s4783_s25 }
  0x35   : > { %p4780_p4 = pnand %p4778_p3, %p5286_p7  ;;  %p4786_p0 = scmp.lt.s32.totalorder %s4784_s23, %s4777_s29 }
  0x37   : > { %p4781_p6 = pneg %p4780_p4  ;;  %p4787_p10 = por %p4786_p0, %p4785_p8 }
  0x39   : > { %p4788_p11 = pnand %p4787_p10, %p4781_p6 }
  0x3b   : > { %4791 = shalt.err (!%p4788_p11)
}
  0x3c   : > { %s5149_s12 = smov 1024   ;;  %s6451_s26 = smov 64  }
  0x3d   : > { %4676 = dma.hbm_to_vmem [thread:$0]  (!%p5269_p5), %s5277_s28, 18432, %s5279_s30, %s6450_s11, %s5149_s12, %s5149_s12, %s6451_s26  }
  0x3e   : > { %s4175_s27 = sshll.u32 %s5266_s22, 4  ;;  %s4460_s19 = sshll.u32 %s5146_s16, 8 }
  0x3f   : > { %s6489_s2 = sld [smem:[#allocation33_spill]]  ;;  %s375_s1 = scalar_lea.vmem [#allocation7], %s4175_s27 }
  0x40   : > { %s383_s20 = sshll.u32 %s375_s1, 4  ;;  %s6490_s3 = sld [smem:[#allocation34_spill]]  ;;  %s5319_s20 = int_to_ptr.vmem [resolvable:$true] %s383_s20 }
  0x41   : > { %s397_s28 = scalar_lea.vmem [#allocation8], %s4175_s27  ;;  %s6453_s12 = scalar_lea.sflag [#allocation9], %s5263_s21 }
  0x42   : > { %s405_s30 = sshll.u32 %s397_s28, 4  ;;  %s5326_s30 = int_to_ptr.vmem [resolvable:$true] %s405_s30 }
  0x45   : > { %s5317_s23 = scalar_lea.hbm %s6489_s2, %s4460_s19 }
  0x46   : > { %s5324_s9 = scalar_lea.hbm %s6490_s3, %s4460_s19  ;;  %s4797_s10 = scalar_lea.hbm %s6490_s3, 1024 }
  0x47   : > { %s4792_s29 = scalar_lea.hbm %s5324_s9, 256  ;;  %p4798_p13 = scmp.lt.u32.totalorder %s5324_s9, %s6490_s3 }
  0x48   : > { %p4793_p0 = scmp.ne.s32.totalorder %s5324_s9, %s4792_s29  ;;  %p4799_p1 = scmp.lt.u32.totalorder %s4797_s10, %s4792_s29 }
  0x49   : > { %p4801_p3 = scmp.lt.u32.totalorder %s4792_s29, %s5324_s9 }
  0x4a   : > { %p4795_p9 = pnand %p4793_p0, %p5286_p7  ;;  %p4800_p2 = por %p4799_p1, %p4798_p13 }
  0x4c   : > { %p4796_p12 = pneg %p4795_p9  ;;  %p4802_p4 = por %p4801_p3, %p4800_p2 }
  0x4e   : > { %p4803_p6 = pnand %p4802_p4, %p4796_p12 }
  0x50   : > { %4806 = shalt.err (!%p4803_p6)
}
  0x51   : > { %s4807_s27 = scalar_lea.vmem %s5326_s30, 256  ;;  %s5151_s28 = smov [#allocation8]  }
  0x52   : > { %p4808_p8 = scmp.ne.s32.totalorder %s5326_s30, %s4807_s27  ;;  %s4812_s1 = sshll.u32 %s5151_s28, 4  ;;  %s4813_s1 = int_to_ptr.vmem [resolvable:$false] %s4812_s1 }
  0x53   : > { %s4814_s25 = scalar_lea.vmem %s4813_s1, 512  ;;  %p4815_p0 = scmp.lt.s32.totalorder %s5326_s30, %s4813_s1 }
  0x54   : > { %p4810_p10 = pnand %p4808_p8, %p5286_p7  ;;  %p4816_p9 = scmp.lt.s32.totalorder %s4814_s25, %s4807_s27 }
  0x56   : > { %p4811_p11 = pneg %p4810_p10  ;;  %p4817_p13 = por %p4816_p9, %p4815_p0 }
  0x58   : > { %p4818_p1 = pnand %p4817_p13, %p4811_p11 }
  0x5a   : > { %4821 = shalt.err (!%p4818_p1)
}
  0x5b   : > { %s6454_s29 = smov 128   ;;  %s6456_s10 = smov 8  }
  0x5c   : > { %4682 = dma.hbm_to_vmem [thread:$0]  (!%p5269_p5), %s5324_s9, 256, %s5326_s30, %s6453_s12, %s6454_s29, %s6454_s29, %s6456_s10  }
  0x5d   : > { %s4187_s17 = sshll.u32 %s5266_s22, 3  ;;  %s4466_s19 = sshll.u32 %s5146_s16, 7 }
  0x5e   : > { %s6491_s5 = sld [smem:[#allocation35_spill]]  ;;  %s441_s25 = scalar_lea.vmem [#allocation11], %s4187_s17 }
  0x5f   : > { %s449_s11 = sshll.u32 %s441_s25, 4  ;;  %s6461_s26 = scalar_lea.sflag [#allocation12], %s5263_s21  ;;  %s5366_s11 = int_to_ptr.vmem [resolvable:$true] %s449_s11 }
  0x64   : > { %s5362_s1 = scalar_lea.hbm %s6491_s5, %s4466_s19  ;;  %s4827_s27 = scalar_lea.hbm %s6491_s5, 512 }
  0x65   : > { %s4822_s3 = scalar_lea.hbm %s5362_s1, 128  ;;  %p4828_p4 = scmp.lt.u32.totalorder %s5362_s1, %s6491_s5 }
  0x66   : > { %p4823_p12 = scmp.ne.s32.totalorder %s5362_s1, %s4822_s3  ;;  %p4829_p6 = scmp.lt.u32.totalorder %s4827_s27, %s4822_s3 }
  0x67   : > { %p4831_p10 = scmp.lt.u32.totalorder %s4822_s3, %s5362_s1 }
  0x68   : > { %p4825_p2 = pnand %p4823_p12, %p5286_p7  ;;  %p4830_p8 = por %p4829_p6, %p4828_p4 }
  0x6a   : > { %p4826_p3 = pneg %p4825_p2  ;;  %p4832_p11 = por %p4831_p10, %p4830_p8 }
  0x6c   : > { %p4833_p0 = pnand %p4832_p11, %p4826_p3 }
  0x6e   : > { %4836 = shalt.err (!%p4833_p0)
}
  0x6f   : > { %s4837_s25 = scalar_lea.vmem %s5366_s11, 128  ;;  %s5154_s9 = smov [#allocation11]  }
  0x70   : > { %p4838_p9 = scmp.ne.s32.totalorder %s5366_s11, %s4837_s25  ;;  %s4842_s30 = sshll.u32 %s5154_s9, 4  ;;  %s4843_s30 = int_to_ptr.vmem [resolvable:$false] %s4842_s30 }
  0x71   : > { %s4844_s12 = scalar_lea.vmem %s4843_s30, 256  ;;  %p4845_p12 = scmp.lt.s32.totalorder %s5366_s11, %s4843_s30 }
  0x72   : > { %p4840_p13 = pnand %p4838_p9, %p5286_p7  ;;  %p4846_p2 = scmp.lt.s32.totalorder %s4844_s12, %s4837_s25 }
  0x74   : > { %p4841_p1 = pneg %p4840_p13  ;;  %p4847_p4 = por %p4846_p2, %p4845_p12 }
  0x76   : > { %p4848_p6 = pnand %p4847_p4, %p4841_p1 }
  0x78   : > { %4851 = shalt.err (!%p4848_p6)
}
  0x79   : > { %s6462_s3 = smov 4   ;;  %s6492_s27 = smov 64  }
  0x7a   : > { %4688 = dma.hbm_to_vmem [thread:$0]  (!%p5269_p5), %s5362_s1, 128, %s5366_s11, %s6461_s26, %s6492_s27, %s6492_s27, %s6462_s3  }
  0x7b   : > { %s5400_s9 = scalar_lea.hbm %s6440_s6, %s4466_s19  ;;  %s463_s30 = scalar_lea.vmem [#allocation13], %s4187_s17 }
  0x7c   : > { %s471_s12 = sshll.u32 %s463_s30, 4  ;;  %s4195_s29 = sshll.u32 %s5266_s22, 8  ;;  %s5404_s12 = int_to_ptr.vmem [resolvable:$true] %s471_s12 }
  0x7d   : > { %s4470_s10 = sshll.u32 %s5146_s16, 12  ;;  %s6493_s7 = sld [smem:[#allocation36_spill]] }
  0x7e   : > { %s485_s11 = scalar_lea.vmem [#allocation14], %s4195_s29  ;;  %s6460_s19 = scalar_lea.sflag [#allocation15], %s5263_s21 }
  0x7f   : > { %s493_s1 = sshll.u32 %s485_s11, 4  ;;  %s5413_s1 = int_to_ptr.vmem [resolvable:$true] %s493_s1 }
  0x83   : > { %s5411_s0 = scalar_lea.hbm %s6493_s7, %s4470_s10  ;;  %s4857_s5 = scalar_lea.hbm %s6493_s7, 16384 }
  0x84   : > { %s4852_s17 = scalar_lea.hbm %s5411_s0, 4096  ;;  %p4858_p11 = scmp.lt.u32.totalorder %s5411_s0, %s6493_s7 }
  0x85   : > { %p4853_p3 = scmp.ne.s32.totalorder %s5411_s0, %s4852_s17  ;;  %p4859_p0 = scmp.lt.u32.totalorder %s4857_s5, %s4852_s17 }
  0x86   : > { %p4861_p13 = scmp.lt.u32.totalorder %s4852_s17, %s5411_s0 }
  0x87   : > { %p4855_p8 = pnand %p4853_p3, %p5286_p7  ;;  %p4860_p9 = por %p4859_p0, %p4858_p11 }
  0x89   : > { %p4856_p10 = pneg %p4855_p8  ;;  %p4862_p1 = por %p4861_p13, %p4860_p9 }
  0x8b   : > { %p4863_p12 = pnand %p4862_p1, %p4856_p10 }
  0x8d   : > { %4866 = shalt.err (!%p4863_p12)
}
  0x8e   : > { %s4867_s29 = scalar_lea.vmem %s5413_s1, 4096  ;;  %s5156_s30 = smov [#allocation14]  }
  0x8f   : > { %p4868_p2 = scmp.ne.s32.totalorder %s5413_s1, %s4867_s29  ;;  %s4872_s11 = sshll.u32 %s5156_s30, 4  ;;  %s4873_s11 = int_to_ptr.vmem [resolvable:$false] %s4872_s11 }
  0x90   : > { %s4874_s28 = scalar_lea.vmem %s4873_s11, 8192  ;;  %p4875_p3 = scmp.lt.s32.totalorder %s5413_s1, %s4873_s11 }
  0x91   : > { %p4870_p4 = pnand %p4868_p2, %p5286_p7  ;;  %p4876_p8 = scmp.lt.s32.totalorder %s4874_s28, %s4867_s29 }
  0x93   : > { %p4871_p6 = pneg %p4870_p4  ;;  %p4877_p11 = por %p4876_p8, %p4875_p3 }
  0x95   : > { %p4878_p0 = pnand %p4877_p11, %p4871_p6 }
  0x97   : > { %4881 = shalt.err (!%p4878_p0)
}
  0x98   : > { %s6494_s17 = smov 8   ;;  %s6495_s25 = smov 128  }
  0x99   : > { %4694 = dma.hbm_to_vmem [thread:$0]  (!%p5269_p5), %s5411_s0, 4096, %s5413_s1, %s6460_s19, %s6495_s25, %s6495_s25, %s6494_s17  }
  0x9a   : > { %s5443_s5 = sadd.s32 4294967295, %s5146_s16   ;;  %s4168_s8 = sadd.s32 4294967294, %s5146_s16  }
  0x9b   : > { %p80_p10 = scmp.ne.s32.totalorder %s5138_s14, %s5134_s13  ;;  %p6464_p9 = scmp.eq.s32.totalorder %s5443_s5, 0 }
  0x9c   : > { %p312_p13 = scmp.eq.s32.totalorder %s5443_s5, 3  ;;  %p318_p1 = scmp.eq.s32.totalorder %s4168_s8, 3 }
  0x9d   : > { %p5452_p12 = por %p6464_p9, %p80_p10  ;;  %p4169_p2 = scmp.ge.s32.totalorder %s5146_s16, 1 }
  0x9e   : > { %p6497_p4 = scmp.ne.s32.totalorder %s5142_s15, %s5138_s14  ;;  %p5464_p3 = por %p318_p1, %p80_p10 }
  0x9f   : > { %s6496_s10 = scalar_select %p5452_p12, 1, 0 }
  0xa0   : > { %p5460_p6 = por %p312_p13, %p6497_p4  ;;  %p325_p8 = scmp.lt.s32.totalorder %s5146_s16, 5 }
  0xa1   : > { %s6499_s1 = scalar_select %p5464_p3, 1, 0 }
  0xa2   : > { %s6498_s0 = scalar_select %p5460_p6, 1, 0 }
  0xa3   : > { %6500 = sst [smem:[#allocation30_spill]] %s6499_s1  ;;  %p5470_p11 = pnand %p4169_p2, %p325_p8 }
  0xa4   : > { %s5157_s11 = smov [#allocation2]   ;;  %s4464_s8 = sshll.u32 %s5146_s16, 15 }
  0xa5   : > { %s6501_s30 = scalar_select %p5470_p11, 1, 0 }
  0xa6   : > { %s338_s28 = sshll.u32 %s5157_s11, 4  ;;  %s4882_s19 = scalar_lea.hbm %s5317_s23, 256  ;;  %s5474_s28 = int_to_ptr.vmem [resolvable:$true] %s338_s28 }
  0xa7   : > { %p4883_p10 = scmp.ne.s32.totalorder %s5317_s23, %s4882_s19  ;;  %s4887_s29 = scalar_lea.hbm %s6489_s2, 1024 }
  0xa8   : > { %p4888_p2 = scmp.lt.u32.totalorder %s5317_s23, %s6489_s2  ;;  %p4889_p4 = scmp.lt.u32.totalorder %s4887_s29, %s4882_s19 }
  0xa9   : > { %p4885_p13 = pnand %p4883_p10, %p5286_p7  ;;  %p4891_p9 = scmp.lt.u32.totalorder %s4882_s19, %s5317_s23 }
  0xaa   : > { %p4890_p8 = por %p4889_p4, %p4888_p2 }
  0xab   : > { %p4886_p1 = pneg %p4885_p13 }
  0xac   : > { %p4892_p3 = por %p4891_p9, %p4890_p8 }
  0xae   : > { %p4893_p6 = pnand %p4892_p3, %p4886_p1 }
  0xb0   : > { %4896 = shalt.err (!%p4893_p6)
}
  0xb1   : > { %s4897_s11 = scalar_lea.vmem %s5319_s20, 256  ;;  %s5158_s26 = smov [#allocation7]  }
  0xb2   : > { %p4898_p10 = scmp.ne.s32.totalorder %s5319_s20, %s4897_s11  ;;  %s4902_s3 = sshll.u32 %s5158_s26, 4  ;;  %s4903_s3 = int_to_ptr.vmem [resolvable:$false] %s4902_s3 }
  0xb3   : > { %s4904_s7 = scalar_lea.vmem %s4903_s3, 512  ;;  %p4905_p12 = scmp.lt.s32.totalorder %s5319_s20, %s4903_s3 }
  0xb4   : > { %p4900_p13 = pnand %p4898_p10, %p5286_p7  ;;  %p4906_p11 = scmp.lt.s32.totalorder %s4904_s7, %s4897_s11 }
  0xb6   : > { %p4901_p0 = pneg %p4900_p13  ;;  %p4907_p2 = por %p4906_p11, %p4905_p12 }
  0xb8   : > { %p4908_p4 = pnand %p4907_p2, %p4901_p0 }
  0xba   : > { %4911 = shalt.err (!%p4908_p4)
}
  0xbb   : > { %s6502_s15 = scalar_lea.sflag [#allocation6], %s5263_s21  ;;  %p6503_p9 = scmp.eq.s32.totalorder %s5443_s5, 0 }
  0xbc   : > { %4679 = dma.hbm_to_vmem [thread:$0]  (!%p5269_p5), %s5317_s23, 256, %s5319_s20, %s6502_s15, %s6495_s25, %s6495_s25, %s6494_s17  }
  0xbd   : > { %p6504_p6 = scmp.ne.s32.totalorder %s6501_s30, 0  ;;  %s5519_s26 = scalar_lea.hbm %s6438_s4, %s4464_s8 }
  0xbe   : > { %s6507_s3 = sshll.u32 %s5266_s22, 11  ;;  %s6508_s17 = sld [smem:[#allocation31_spill]] }
  0xbf   : > { %p6505_p3 = pneg %p6504_p6  ;;  %s419_s7 = scalar_lea.vmem [#allocation10], %s6507_s3 }
  0xc0   : > { %s427_s2 = sshll.u32 %s419_s7, 4  ;;  %s5523_s2 = int_to_ptr.vmem [resolvable:$true] %s427_s2 }
  0xc1   : > { %p5510_p12 = pnand %p6505_p3, %p6503_p9 }
  0xc3   : > { %p4914_p0 = pneg %p5510_p12 }
  0xc4   : > { %s4912_s25 = scalar_lea.hbm %s6508_s17, 192 }
  0xc5   : > { %p4913_p11 = scmp.ne.s32.totalorder %s6508_s17, %s4912_s25  ;;  %p4919_p10 = scmp.lt.u32.totalorder %s4912_s25, %s6508_s17 }
  0xc7   : > { %p4915_p1 = pnand %p4914_p0, %p4913_p11 }
  0xc9   : > { %p4916_p8 = pneg %p4915_p1 }
  0xcb   : > { %p4921_p13 = pnand %p4919_p10, %p4916_p8 }
  0xcd   : > { %4924 = shalt.err (!%p4921_p13)
}
  0xce   : > { %s4925_s11 = scalar_lea.vmem %s5474_s28, 192  ;;  %p4933_p3 = scmp.lt.s32.totalorder %s5474_s28, %s5474_s28 }
  0xcf   : > { %p4926_p2 = scmp.ne.s32.totalorder %s5474_s28, %s4925_s11  ;;  %p4934_p6 = scmp.lt.s32.totalorder %s4925_s11, %s4925_s11 }
  0xd1   : > { %p4928_p4 = pnand %p4926_p2, %p4914_p0  ;;  %p4935_p5 = por %p4934_p6, %p4933_p3 }
  0xd3   : > { %p4929_p9 = pneg %p4928_p4 }
  0xd5   : > { %p4936_p7 = pnand %p4935_p5, %p4929_p9 }
  0xd7   : > { %4939 = shalt.err (!%p4936_p7)
}
  0xd8   : > { %4672 = dma.hbm_to_vmem [thread:$0]  (!%p5510_p12), %s6508_s17, 192, %s5474_s28, [#allocation3]  }
  0xd9   : > { %s4199_s7 = sshll.u32 %s5266_s22, 1  ;;  %s4940_s20 = scalar_lea.hbm %s5519_s26, 32768 }
  0xda   : > { %p4941_p11 = scmp.ne.s32.totalorder %s5519_s26, %s4940_s20  ;;  %p6509_p0 = scmp.ne.s32.totalorder %s6488_s18, 0 }
  0xdb   : > { %s4945_s19 = scalar_lea.hbm %s6438_s4, 131072  ;;  %p4946_p7 = scmp.lt.u32.totalorder %s5519_s26, %s6438_s4 }
  0xdc   : > { %p4943_p6 = pnand %p4941_p11, %p6509_p0  ;;  %p4947_p1 = scmp.lt.u32.totalorder %s4945_s19, %s4940_s20 }
  0xdd   : > { %p4949_p10 = scmp.lt.u32.totalorder %s4940_s20, %s5519_s26 }
  0xde   : > { %p4944_p5 = pneg %p4943_p6  ;;  %p4948_p8 = por %p4947_p1, %p4946_p7 }
  0xe0   : > { %p4950_p13 = por %p4949_p10, %p4948_p8 }
  0xe2   : > { %p4951_p2 = pnand %p4950_p13, %p4944_p5 }
  0xe4   : > { %4954 = shalt.err (!%p4951_p2)
}
  0xe5   : > { %s4955_s28 = scalar_lea.vmem %s5523_s2, 32768  ;;  %s5159_s8 = smov [#allocation10]  }
  0xe6   : > { %p4956_p12 = scmp.ne.s32.totalorder %s5523_s2, %s4955_s28  ;;  %s4960_s11 = sshll.u32 %s5159_s8, 4  ;;  %s4961_s11 = int_to_ptr.vmem [resolvable:$false] %s4960_s11 }
  0xe7   : > { %s4962_s1 = scalar_lea.vmem %s4961_s11, 65536  ;;  %p4963_p3 = scmp.lt.s32.totalorder %s5523_s2, %s4961_s11 }
  0xe8   : > { %p4958_p4 = pnand %p4956_p12, %p6509_p0  ;;  %p4964_p11 = scmp.lt.s32.totalorder %s4962_s1, %s4955_s28 }
  0xea   : > { %p4959_p9 = pneg %p4958_p4  ;;  %p4965_p6 = por %p4964_p11, %p4963_p3 }
  0xec   : > { %p4966_p7 = pnand %p4965_p6, %p4959_p9 }
  0xee   : > { %4969 = shalt.err (!%p4966_p7)
}
  0xef   : > { %s5160_s3 = smov 512   ;;  %s5161_s20 = smov 32  }
  0xf0   : > { %p6510_p5 = scmp.ne.s32.totalorder %s6486_s24, 0  ;;  %s6511_s23 = scalar_lea.sflag [#allocation9], %s5263_s21 }
  0xf1   : > { %s4970_s25 = scalar_lea.hbm %s5400_s9, 128  ;;  %s4975_s29 = scalar_lea.hbm %s6440_s6, 512 }
  0xf2   : > { %4685 = dma.hbm_to_vmem [thread:$0]  (!%p6510_p5), %s5519_s26, 32768, %s5523_s2, %s6511_s23, %s5160_s3, %s5160_s3, %s5161_s20  }
  0xf3   : > { %p4971_p1 = scmp.ne.s32.totalorder %s5400_s9, %s4970_s25  ;;  %p4976_p13 = scmp.lt.u32.totalorder %s5400_s9, %s6440_s6 }
  0xf4   : > { %p4977_p2 = scmp.lt.u32.totalorder %s4975_s29, %s4970_s25  ;;  %p4979_p4 = scmp.lt.u32.totalorder %s4970_s25, %s5400_s9 }
  0xf5   : > { %p4973_p8 = pnand %p4971_p1, %p6509_p0 }
  0xf6   : > { %p4978_p12 = por %p4977_p2, %p4976_p13 }
  0xf7   : > { %p4974_p10 = pneg %p4973_p8 }
  0xf8   : > { %p4980_p9 = por %p4979_p4, %p4978_p12 }
  0xfa   : > { %p4981_p3 = pnand %p4980_p9, %p4974_p10 }
  0xfc   : > { %4984 = shalt.err (!%p4981_p3)
}
  0xfd   : > { %s4985_s2 = scalar_lea.vmem %s5404_s12, 128  ;;  %s5162_s26 = smov [#allocation13]  }
  0xfe   : > { %p4986_p11 = scmp.ne.s32.totalorder %s5404_s12, %s4985_s2  ;;  %s4990_s11 = sshll.u32 %s5162_s26, 4  ;;  %s4991_s11 = int_to_ptr.vmem [resolvable:$false] %s4990_s11 }
  0xff   : > { %s4992_s1 = scalar_lea.vmem %s4991_s11, 256  ;;  %p4993_p1 = scmp.lt.s32.totalorder %s5404_s12, %s4991_s11 }
 0x100   : > { %p4988_p6 = pnand %p4986_p11, %p6509_p0  ;;  %p4994_p8 = scmp.lt.s32.totalorder %s4992_s1, %s4985_s2 }
 0x102   : > { %p4989_p7 = pneg %p4988_p6  ;;  %p4995_p13 = por %p4994_p8, %p4993_p1 }
 0x104   : > { %p4996_p2 = pnand %p4995_p13, %p4989_p7 }
 0x106   : > { %4999 = shalt.err (!%p4996_p2)
}
 0x107   : > { %s6512_s3 = smov 4   ;;  %s6513_s20 = scalar_lea.sflag [#allocation12], %s5263_s21 }
 0x108   : > { %4691 = dma.hbm_to_vmem [thread:$0]  (!%p6510_p5), %s5400_s9, 128, %s5404_s12, %s6513_s20, %s6492_s27, %s6492_s27, %s6512_s3  }
 0x109   : > { %s4471_s23 = sshll.u32 %s5146_s16, 5  ;;  %s6514_s15 = sld [smem:[#allocation37_spill]] }
 0x10a   : > { %s507_s8 = scalar_lea.vmem [#allocation16], %s4199_s7 }
 0x10b   : > { %s514_s2 = sshll.u32 %s507_s8, 4  ;;  %s5606_s2 = int_to_ptr.vmem [resolvable:$true] %s514_s2 }
 0x10f   : > { %s6515_s29 = smov %s6514_s15  ;;  %s5602_s28 = scalar_lea.hbm %s6514_s15, %s4471_s23 }
 0x110   : > { %s5000_s26 = scalar_lea.hbm %s5602_s28, 32  ;;  %s5005_s12 = scalar_lea.hbm %s6515_s29, 128 }
 0x111   : > { %p5001_p10 = scmp.ne.s32.totalorder %s5602_s28, %s5000_s26  ;;  %p5006_p9 = scmp.lt.u32.totalorder %s5602_s28, %s6515_s29 }
 0x112   : > { %p5007_p3 = scmp.lt.u32.totalorder %s5005_s12, %s5000_s26  ;;  %p5009_p6 = scmp.lt.u32.totalorder %s5000_s26, %s5602_s28 }
 0x113   : > { %p5003_p12 = pnand %p5001_p10, %p6509_p0 }
 0x114   : > { %p5008_p11 = por %p5007_p3, %p5006_p9 }
 0x115   : > { %p5004_p4 = pneg %p5003_p12 }
 0x116   : > { %p5010_p7 = por %p5009_p6, %p5008_p11 }
 0x118   : > { %p5011_p1 = pnand %p5010_p7, %p5004_p4 }
 0x11a   : > { %5014 = shalt.err (!%p5011_p1)
}
 0x11b   : > { %s5015_s3 = scalar_lea.vmem %s5606_s2, 32  ;;  %s5163_s20 = smov [#allocation16]  }
 0x11c   : > { %p5016_p8 = scmp.ne.s32.totalorder %s5606_s2, %s5015_s3  ;;  %s5020_s25 = sshll.u32 %s5163_s20, 4  ;;  %s5021_s25 = int_to_ptr.vmem [resolvable:$false] %s5020_s25 }
 0x11d   : > { %s5022_s19 = scalar_lea.vmem %s5021_s25, 64  ;;  %p5023_p10 = scmp.lt.s32.totalorder %s5606_s2, %s5021_s25 }
 0x11e   : > { %p5018_p13 = pnand %p5016_p8, %p6509_p0  ;;  %p5024_p12 = scmp.lt.s32.totalorder %s5022_s19, %s5015_s3 }
 0x120   : > { %p5019_p2 = pneg %p5018_p13  ;;  %p5025_p9 = por %p5024_p12, %p5023_p10 }
 0x122   : > { %p5026_p3 = pnand %p5025_p9, %p5019_p2 }
 0x124   : > { %5029 = shalt.err (!%p5026_p3)
}
 0x125   : > { %s5164_s15 = smov 16   ;;  %s5165_s8 = smov 1  }
 0x126   : > { %s6516_s26 = scalar_lea.sflag [#allocation15], %s5263_s21  ;;  %s6517_s12 = sld [smem:[#allocation38_spill]] }
 0x127   : > { %4697 = dma.hbm_to_vmem [thread:$0]  (!%p6510_p5), %s5602_s28, 32, %s5606_s2, %s6516_s26, %s5164_s15, %s5164_s15, %s5165_s8  }
 0x128   : > { %s528_s1 = scalar_lea.vmem [#allocation17], %s4199_s7  ;;  %s525_s20 = scalar_lea.sflag [#allocation18], %s5266_s22 }
 0x129   : > { %s535_s3 = sshll.u32 %s528_s1, 4  ;;  %s5643_s3 = int_to_ptr.vmem [resolvable:$true] %s535_s3 }
 0x12c   : > { %s5639_s11 = scalar_lea.hbm %s6517_s12, %s4471_s23  ;;  %s5035_s23 = scalar_lea.hbm %s6517_s12, 128 }
 0x12d   : > { %s5030_s25 = scalar_lea.hbm %s5639_s11, 32  ;;  %p5036_p7 = scmp.lt.u32.totalorder %s5639_s11, %s6517_s12 }
 0x12e   : > { %p5031_p4 = scmp.ne.s32.totalorder %s5639_s11, %s5030_s25  ;;  %p5037_p1 = scmp.lt.u32.totalorder %s5035_s23, %s5030_s25 }
 0x12f   : > { %p5039_p13 = scmp.lt.u32.totalorder %s5030_s25, %s5639_s11 }
 0x130   : > { %p5033_p11 = pnand %p5031_p4, %p6509_p0  ;;  %p5038_p8 = por %p5037_p1, %p5036_p7 }
 0x132   : > { %p5034_p6 = pneg %p5033_p11  ;;  %p5040_p2 = por %p5039_p13, %p5038_p8 }
 0x134   : > { %p5041_p10 = pnand %p5040_p2, %p5034_p6 }
 0x136   : > { %5044 = shalt.err (!%p5041_p10)
}
 0x137   : > { %s5045_s7 = scalar_lea.vmem %s5643_s3, 32  ;;  %s5166_s26 = smov [#allocation17]  }
 0x138   : > { %p5046_p12 = scmp.ne.s32.totalorder %s5643_s3, %s5045_s7  ;;  %s5050_s27 = sshll.u32 %s5166_s26, 4  ;;  %s5051_s27 = int_to_ptr.vmem [resolvable:$false] %s5050_s27 }
 0x139   : > { %s5052_s9 = scalar_lea.vmem %s5051_s27, 64  ;;  %p5053_p4 = scmp.lt.s32.totalorder %s5643_s3, %s5051_s27 }
 0x13a   : > { %p5048_p9 = pnand %p5046_p12, %p6509_p0  ;;  %p5054_p11 = scmp.lt.s32.totalorder %s5052_s9, %s5045_s7 }
 0x13c   : > { %p5049_p3 = pneg %p5048_p9  ;;  %p5055_p7 = por %p5054_p11, %p5053_p4 }
 0x13e   : > { %p5056_p1 = pnand %p5055_p7, %p5049_p3 }
 0x140   : > { %5059 = shalt.err (!%p5056_p1)
}
 0x141   : > { %4700 = dma.hbm_to_vmem [thread:$0]  (!%p6510_p5), %s5639_s11, 32, %s5643_s3, %s525_s20, %s5164_s15, %s5164_s15, %s5165_s8  }
 0x142   : > { %p6518_p0 = scmp.ne.s32.totalorder %s6501_s30, 0 }
 0x143   : > { %p6519_p6 = scmp.eq.s32.totalorder (!%p6518_p0), %s5443_s5, 0 }
 0x144   : > { %547 = sbr.rel (%p6518_p0) target bundleno = 2013 (0x7dd), region = 60 }
 0x14b   : > { %5105 = dma.done.wait (%p6519_p6), [#allocation3], 192   ;;  %p6520_p8 = pmov %p6519_p6 }
 0x14c   : > { %s553_s24 = sand.u32 1, %s5443_s5   ;;  %s5680_s18 = sand.u32 1, %s5138_s14  }
 0x14d   : > { %5107 = vsyncadd (%p6520_p8), [#allocation3], 4294967104  ;;  %s4644_s22 = smul.u32 1152, %s5680_s18  ;;  %s554_s1 = scalar_lea.sflag [#allocation6], %s553_s24 }
 0x14e   : > { %p6521_p5 = scmp.ne.s32.totalorder %s6496_s10, 0 }
 0x14f   : > { %s5683_s25 = scalar_lea.vmem [#allocation5], %s4644_s22 }
 0x150   : > { %5109 = dma.done.wait (%p6521_p5), %s554_s1, 18688  }
 0x151   : > { %5111 = vsyncadd (%p6521_p5), %s554_s1, 4294948608  ;;  %s5690_s30 = sshll.u32 %s5680_s18, 4  ;;  %s572_s8 = scalar_lea.sflag [#allocation9], %s553_s24 }
 0x152   : > { %s5693_s15 = scalar_lea.vmem [#allocation7], %s5690_s30  ;;  %s5696_s11 = scalar_lea.vmem [#allocation8], %s5690_s30 }
 0x153   : > { %5113 = dma.done.wait (%p6521_p5), %s572_s8, 33024  }
 0x154   : > { %5115 = vsyncadd (%p6521_p5), %s572_s8, 4294934272  ;;  %s4209_s3 = sshll.u32 %s5680_s18, 11  ;;  %s4210_s20 = sshll.u32 %s5680_s18, 3 }
 0x155   : > { %s5704_s21 = scalar_lea.vmem [#allocation10], %s4209_s3  ;;  %s590_s28 = scalar_lea.sflag [#allocation12], %s553_s24 }
 0x156   : > { %s5706_s23 = scalar_lea.vmem [#allocation11], %s4210_s20 }
 0x157   : > { %5117 = dma.done.wait (%p6521_p5), %s590_s28, 256  }
 0x158   : > { %5119 = vsyncadd (%p6521_p5), %s590_s28, 4294967040  ;;  %s4212_s2 = sshll.u32 %s5680_s18, 8  ;;  %s5713_s19 = scalar_lea.vmem [#allocation13], %s4210_s20 }
 0x159   : > { %s608_s7 = scalar_lea.sflag [#allocation15], %s553_s24  ;;  %s5715_s26 = scalar_lea.vmem [#allocation14], %s4212_s2 }
 0x15a   : > { %5121 = dma.done.wait (%p6521_p5), %s608_s7, 4128  }
 0x15b   : > { %5123 = vsyncadd (%p6521_p5), %s608_s7, 4294963168  ;;  %s4213_s27 = sshll.u32 %s5680_s18, 1  ;;  %s626_s22 = scalar_lea.sflag [#allocation18], %s5680_s18 }
 0x15c   : > { %s5722_s9 = scalar_lea.vmem [#allocation16], %s4213_s27  ;;  %s5725_s1 = scalar_lea.vmem [#allocation17], %s4213_s27 }
 0x15d   : > { %5125 = dma.done.wait (%p6521_p5), %s626_s22, 32  }
 0x15e   : > { %5127 = vsyncadd (%p6521_p5), %s626_s22, 4294967264  ;;  %v720_v0 = vld [vmem:[%s5683_s25 + $0x8] sm:$0xff]  ;;  %v719_v1 = vld [vmem:[%s5683_s25] sm:$0xff]  ;;  %vm945_vm0 = vcmask 261120   ;;  %s6206_s10 = scalar_lea.vmem [#allocation19], %s5690_s30  ;;  %s6522_s8 = sld [smem:[#allocation39_spill]] }
 0x15f   : > { %v792_v2 = vunpack.c.l.s8.bf16 %v720_v0  ;;  %v800_v3 = vunpack.c.h.s8.bf16 %v720_v0  ;;  %v791_v4 = vunpack.c.l.s8.bf16 %v719_v1  ;;  %v728_v5 = vld [vmem:[%s5683_s25 + $0x48] sm:$0xff]  ;;  %v799_v6 = vunpack.c.h.s8.bf16 %v719_v1  ;;  %v722_v7 = vld [vmem:[%s5683_s25 + $0x18] sm:$0xff]  ;;  %v727_v9 = vld [vmem:[%s5683_s25 + $0x40] sm:$0xff]  ;;  %s3911_s24 = sshll.u32 %s6206_s10, 4  ;;  %s3898_s3 = scalar_lea.sflag [#allocation4], %s5680_s18  ;;  %s6390_s24 = int_to_ptr.vmem [resolvable:$true] %s3911_s24 }
 0x160   : > { %v808_v8 = vunpack.c.l.s8.bf16 %v728_v5  ;;  %v721_v10 = vld [vmem:[%s5683_s25 + $0x10] sm:$0xff]  ;;  %v794_v11 = vunpack.c.l.s8.bf16 %v722_v7  ;;  %v802_v12 = vunpack.c.h.s8.bf16 %v722_v7  ;;  %v807_v13 = vunpack.c.l.s8.bf16 %v727_v9  ;;  %v730_v15 = vld [vmem:[%s5683_s25 + $0x58] sm:$0xff]  ;;  %v736_v18 = vld [vmem:[%s5683_s25 + $0x88] sm:$0xff]  ;;  %s5060_s20 = scalar_lea.vmem %s6390_s24, 256  ;;  %p6523_p2 = scmp.ne.s32.totalorder %s6498_s0, 0 }
 0x161   : > { %949 = vmatprep.subr.bf16.mxu0 %v792_v2  ;;  %v793_v14 = vunpack.c.l.s8.bf16 %v721_v10  ;;  %v5738_v16 = vld [vmem:[#allocation2] sm:$0xff]  ;;  %v816_v17 = vunpack.c.h.s8.bf16 %v728_v5  ;;  %v801_v19 = vunpack.c.h.s8.bf16 %v721_v10  ;;  %v810_v20 = vunpack.c.l.s8.bf16 %v730_v15  ;;  %v735_v25 = vld [vmem:[%s5683_s25 + $0x80] sm:$0xff]  ;;  %v744_v31 = vld [vmem:[%s5683_s25 + $0xc8] sm:$0xff]  ;;  %p5061_p13 = scmp.ne.s32.totalorder %s6390_s24, %s5060_s20 }
 0x162   : > { %950 = vmatpush1.bf16.msra.mxu0 %v791_v4  ;;  %1031 = vmatprep.subr.bf16.mxu1 %v794_v11  ;;  %v729_v21 = vld [vmem:[%s5683_s25 + $0x50] sm:$0xff]  ;;  %v5744_v22 = vcombine.high %v5738_v16, %v5738_v16  ;;  %v815_v23 = vunpack.c.h.s8.bf16 %v727_v9  ;;  %v824_v24 = vunpack.c.l.s8.bf16 %v736_v18  ;;  %v818_v27 = vunpack.c.h.s8.bf16 %v730_v15  ;;  %v738_v29 = vld [vmem:[%s5683_s25 + $0x98] sm:$0xff]  ;;  %v743_v37 = vld [vmem:[%s5683_s25 + $0xc0] sm:$0xff] }
 0x163   : > { %951 = vmatprep.subr.bf16.mxu0 %v800_v3  ;;  %1032 = vmatpush1.bf16.msra.mxu1 %v793_v14  ;;  %v809_v26 = vunpack.c.l.s8.bf16 %v729_v21  ;;  %v823_v28 = vunpack.c.l.s8.bf16 %v735_v25  ;;  %v832_v30 = vunpack.c.h.s8.bf16 %v736_v18  ;;  %v817_v32 = vunpack.c.h.s8.bf16 %v729_v21  ;;  %v737_v34 = vld [vmem:[%s5683_s25 + $0x90] sm:$0xff]  ;;  %v746_v41 = vld [vmem:[%s5683_s25 + $0xd8] sm:$0xff]  ;;  %v752_v43 = vld [vmem:[%s5683_s25 + $0x108] sm:$0xff]  ;;  %p5062_p10 = pnand %p5061_p13, %p6523_p2 }
 0x164   : > { %1033 = vmatprep.subr.bf16.mxu1 %v802_v12  ;;  %981 = vmatprep.mubr.bf16.mxu0 %v5744_v22  ;;  %v826_v33 = vunpack.c.l.s8.bf16 %v738_v29  ;;  %v831_v35 = vunpack.c.h.s8.bf16 %v735_v25  ;;  %v840_v36 = vunpack.c.l.s8.bf16 %v744_v31  ;;  %v825_v38 = vunpack.c.l.s8.bf16 %v737_v34  ;;  %v745_v46 = vld [vmem:[%s5683_s25 + $0xd0] sm:$0xff]  ;;  %v751_v49 = vld [vmem:[%s5683_s25 + $0x100] sm:$0xff]  ;;  %v754_v53 = vld [vmem:[%s5683_s25 + $0x118] sm:$0xff] }
 0x165   : > { %1063 = vmatprep.mubr.bf16.mxu1 %v5744_v22  ;;  %v834_v39 = vunpack.c.h.s8.bf16 %v738_v29  ;;  %v839_v40 = vunpack.c.l.s8.bf16 %v743_v37  ;;  %v848_v42 = vunpack.c.h.s8.bf16 %v744_v31  ;;  %v833_v44 = vunpack.c.h.s8.bf16 %v737_v34  ;;  %v760_v55 = vld [vmem:[%s5683_s25 + $0x148] sm:$0xff]  ;;  %v753_v58 = vld [vmem:[%s5683_s25 + $0x110] sm:$0xff]  ;;  %v759_v61 = vld [vmem:[%s5683_s25 + $0x140] sm:$0xff]  ;;  %p5063_p12 = pneg %p5062_p10 }
 0x166   : > { %952 = vmatpush1.bf16.msra.mxu0 %v799_v6  ;;  %v842_v45 = vunpack.c.l.s8.bf16 %v746_v41  ;;  %v847_v47 = vunpack.c.h.s8.bf16 %v743_v37  ;;  %v856_v48 = vunpack.c.l.s8.bf16 %v752_v43  ;;  %v841_v50 = vunpack.c.l.s8.bf16 %v745_v46  ;;  %v762_v1 = vld [vmem:[%s5683_s25 + $0x158] sm:$0xff]  ;;  %v768_v3 = vld [vmem:[%s5683_s25 + $0x188] sm:$0xff]  ;;  %v761_v6 = vld [vmem:[%s5683_s25 + $0x150] sm:$0xff] }
 0x167   : > { %953 = vmatprep.subr.bf16.mxu0 %v808_v8  ;;  %1034 = vmatpush1.bf16.msra.mxu1 %v801_v19  ;;  %v850_v51 = vunpack.c.h.s8.bf16 %v746_v41  ;;  %v855_v52 = vunpack.c.l.s8.bf16 %v751_v49  ;;  %v864_v54 = vunpack.c.h.s8.bf16 %v752_v43  ;;  %v849_v56 = vunpack.c.h.s8.bf16 %v745_v46  ;;  %v767_v9 = vld [vmem:[%s5683_s25 + $0x180] sm:$0xff]  ;;  %v776_v15 = vld [vmem:[%s5683_s25 + $0x1c8] sm:$0xff]  ;;  %v769_v19 = vld [vmem:[%s5683_s25 + $0x190] sm:$0xff] }
 0x168   : > { %1035 = vmatprep.subr.bf16.mxu1 %v810_v20  ;;  %v858_v57 = vunpack.c.l.s8.bf16 %v754_v53  ;;  %v863_v59 = vunpack.c.h.s8.bf16 %v751_v49  ;;  %v872_v60 = vunpack.c.l.s8.bf16 %v760_v55  ;;  %v857_v62 = vunpack.c.l.s8.bf16 %v753_v58  ;;  %v784_v29 = vld [vmem:[%s5683_s25 + $0x208] sm:$0xff] }
 0x169   : > { %v866_v63 = vunpack.c.h.s8.bf16 %v754_v53  ;;  %v871_v0 = vunpack.c.l.s8.bf16 %v759_v61  ;;  %v880_v2 = vunpack.c.h.s8.bf16 %v760_v55  ;;  %v865_v4 = vunpack.c.h.s8.bf16 %v753_v58  ;;  %v724_v43 = vld [vmem:[%s5683_s25 + $0x28] sm:$0xff]  ;;  %v5786_v53 = vld [vmem:[#allocation2 + $0x8] ss:$0 sps:$4 sm:$0xff]   ;;  %v725_v58 = vld [vmem:[%s5683_s25 + $0x30] sm:$0xff] }
 0x16a   : > { %954 = vmatpush1.bf16.msra.mxu0 %v807_v13  ;;  %v874_v5 = vunpack.c.l.s8.bf16 %v762_v1  ;;  %v879_v7 = vunpack.c.h.s8.bf16 %v759_v61  ;;  %v888_v8 = vunpack.c.l.s8.bf16 %v768_v3  ;;  %v873_v10 = vunpack.c.l.s8.bf16 %v761_v6  ;;  %v770_v13 = vld [vmem:[%s5683_s25 + $0x198] sm:$0xff]  ;;  %v731_v61 = vld [vmem:[%s5683_s25 + $0x60] sm:$0xff] }
 0x16b   : > { %955 = vmatprep.subr.bf16.mxu0 %v816_v17  ;;  %1036 = vmatpush1.bf16.msra.mxu1 %v809_v26  ;;  %v882_v11 = vunpack.c.h.s8.bf16 %v762_v1  ;;  %v887_v12 = vunpack.c.l.s8.bf16 %v767_v9  ;;  %v896_v14 = vunpack.c.h.s8.bf16 %v768_v3  ;;  %v881_v17 = vunpack.c.h.s8.bf16 %v761_v6  ;;  %v734_v1 = vld [vmem:[%s5683_s25 + $0x78] sm:$0xff]  ;;  %v740_v3 = vld [vmem:[%s5683_s25 + $0xa8] sm:$0xff]  ;;  %v733_v6 = vld [vmem:[%s5683_s25 + $0x70] sm:$0xff] }
 0x16c   : > { %1037 = vmatprep.subr.bf16.mxu1 %v818_v27  ;;  %v890_v18 = vunpack.c.l.s8.bf16 %v770_v13  ;;  %v895_v20 = vunpack.c.h.s8.bf16 %v767_v9  ;;  %v904_v21 = vunpack.c.l.s8.bf16 %v776_v15  ;;  %v898_v25 = vunpack.c.h.s8.bf16 %v770_v13  ;;  %v778_v27 = vld [vmem:[%s5683_s25 + $0x1d8] sm:$0xff]  ;;  %v739_v9 = vld [vmem:[%s5683_s25 + $0xa0] sm:$0xff] }
 0x16d   : > { %v906_v31 = vunpack.c.l.s8.bf16 %v778_v27  ;;  %v920_v34 = vunpack.c.l.s8.bf16 %v784_v29  ;;  %v5775_v37 = vcombine.low %v5738_v16, %v5738_v16  ;;  %v928_v41 = vunpack.c.h.s8.bf16 %v784_v29  ;;  %v742_v13 = vld [vmem:[%s5683_s25 + $0xb8] sm:$0xff]  ;;  %v756_v29 = vld [vmem:[%s5683_s25 + $0x128] sm:$0xff] }
 0x16e   : > { %956 = vmatpush1.bf16.msra.mxu0 %v815_v23  ;;  %v775_v23 = vld [vmem:[%s5683_s25 + $0x1c0] sm:$0xff]  ;;  %v5167_v46 = vmov 0  }
 0x16f   : > { %957 = vmatprep.subr.bf16.mxu0 %v824_v24  ;;  %1038 = vmatpush1.bf16.msra.mxu1 %v817_v32  ;;  %v889_v24 = vunpack.c.l.s8.bf16 %v769_v19  ;;  %v903_v26 = vunpack.c.l.s8.bf16 %v775_v23  ;;  %v777_v32 = vld [vmem:[%s5683_s25 + $0x1d0] sm:$0xff] }
 0x170   : > { %1039 = vmatprep.subr.bf16.mxu1 %v826_v33  ;;  %v911_v33 = vunpack.c.h.s8.bf16 %v775_v23  ;;  %v747_v23 = vld [vmem:[%s5683_s25 + $0xe0] sm:$0xff] }
 0x172   : > { %958 = vmatpush1.bf16.msra.mxu0 %v823_v28  ;;  %v912_v28 = vunpack.c.h.s8.bf16 %v776_v15  ;;  %v748_v15 = vld [vmem:[%s5683_s25 + $0xe8] sm:$0xff] }
 0x173   : > { %959 = vmatprep.subr.bf16.mxu0 %v832_v30  ;;  %1040 = vmatpush1.bf16.msra.mxu1 %v825_v38  ;;  %v897_v30 = vunpack.c.h.s8.bf16 %v769_v19  ;;  %v914_v38 = vunpack.c.h.s8.bf16 %v778_v27  ;;  %v741_v19 = vld [vmem:[%s5683_s25 + $0xb0] sm:$0xff]  ;;  %v750_v27 = vld [vmem:[%s5683_s25 + $0xf8] sm:$0xff] }
 0x174   : > { %1041 = vmatprep.subr.bf16.mxu1 %v834_v39 }
 0x176   : > { %960 = vmatpush1.bf16.msra.mxu0 %v831_v35  ;;  %v783_v35 = vld [vmem:[%s5683_s25 + $0x200] sm:$0xff] }
 0x177   : > { %961 = vmatprep.subr.bf16.mxu0 %v840_v36  ;;  %1042 = vmatpush1.bf16.msra.mxu1 %v833_v44  ;;  %v905_v36 = vunpack.c.l.s8.bf16 %v777_v32  ;;  %v919_v39 = vunpack.c.l.s8.bf16 %v783_v35  ;;  %v927_v16 = vunpack.c.h.s8.bf16 %v783_v35  ;;  %v755_v35 = vld [vmem:[%s5683_s25 + $0x120] sm:$0xff] }
 0x178   : > { %1043 = vmatprep.subr.bf16.mxu1 %v842_v45  ;;  %v785_v45 = vld [vmem:[%s5683_s25 + $0x210] sm:$0xff] }
 0x17a   : > { %962 = vmatpush1.bf16.msra.mxu0 %v839_v40  ;;  %v786_v40 = vld [vmem:[%s5683_s25 + $0x218] sm:$0xff] }
 0x17b   : > { %963 = vmatprep.subr.bf16.mxu0 %v848_v42  ;;  %1044 = vmatpush1.bf16.msra.mxu1 %v841_v50  ;;  %v913_v42 = vunpack.c.h.s8.bf16 %v777_v32  ;;  %v922_v44 = vunpack.c.l.s8.bf16 %v786_v40  ;;  %v930_v49 = vunpack.c.h.s8.bf16 %v786_v40  ;;  %v726_v50 = vld [vmem:[%s5683_s25 + $0x38] sm:$0xff]  ;;  %v749_v32 = vld [vmem:[%s5683_s25 + $0xf0] sm:$0xff] }
 0x17c   : > { %1045 = vmatprep.subr.bf16.mxu1 %v850_v51  ;;  %v723_v51 = vld [vmem:[%s5683_s25 + $0x20] sm:$0xff]  ;;  %v758_v40 = vld [vmem:[%s5683_s25 + $0x138] sm:$0xff] }
 0x17d   : > { %v795_v55 = vunpack.c.l.s8.bf16 %v723_v51 }
 0x17e   : > { %964 = vmatpush1.bf16.msra.mxu0 %v847_v47  ;;  %v796_v47 = vunpack.c.l.s8.bf16 %v724_v43 }
 0x17f   : > { %965 = vmatprep.subr.bf16.mxu0 %v856_v48  ;;  %1046 = vmatpush1.bf16.msra.mxu1 %v849_v56  ;;  %v921_v48 = vunpack.c.l.s8.bf16 %v785_v45  ;;  %v804_v56 = vunpack.c.h.s8.bf16 %v724_v43  ;;  %v853_v43 = vunpack.c.h.s8.bf16 %v749_v32 }
 0x180   : > { %1047 = vmatprep.subr.bf16.mxu1 %v858_v57  ;;  %v732_v57 = vld [vmem:[%s5683_s25 + $0x68] sm:$0xff] }
 0x182   : > { %966 = vmatpush1.bf16.msra.mxu0 %v855_v52  ;;  %v929_v52 = vunpack.c.h.s8.bf16 %v785_v45  ;;  %v757_v45 = vld [vmem:[%s5683_s25 + $0x130] sm:$0xff] }
 0x183   : > { %967 = vmatprep.subr.bf16.mxu0 %v864_v54  ;;  %1048 = vmatpush1.bf16.msra.mxu1 %v857_v62  ;;  %v798_v54 = vunpack.c.l.s8.bf16 %v726_v50  ;;  %v797_v62 = vunpack.c.l.s8.bf16 %v725_v58 }
 0x184   : > { %1049 = vmatprep.subr.bf16.mxu1 %v866_v63  ;;  %v806_v63 = vunpack.c.h.s8.bf16 %v726_v50  ;;  %v870_v50 = vunpack.c.h.s8.bf16 %v758_v40 }
 0x186   : > { %968 = vmatpush1.bf16.msra.mxu0 %v863_v59  ;;  %v803_v59 = vunpack.c.h.s8.bf16 %v723_v51 }
 0x187   : > { %969 = vmatprep.subr.bf16.mxu0 %v872_v60  ;;  %1050 = vmatpush1.bf16.msra.mxu1 %v865_v4  ;;  %v812_v60 = vunpack.c.l.s8.bf16 %v732_v57  ;;  %v805_v4 = vunpack.c.h.s8.bf16 %v725_v58  ;;  %v765_v58 = vld [vmem:[%s5683_s25 + $0x170] sm:$0xff] }
 0x188   : > { %1051 = vmatprep.subr.bf16.mxu1 %v874_v5  ;;  %v814_v5 = vunpack.c.l.s8.bf16 %v734_v1 }
 0x18a   : > { %970 = vmatpush1.bf16.msra.mxu0 %v871_v0  ;;  %v811_v0 = vunpack.c.l.s8.bf16 %v731_v61 }
 0x18b   : > { %971 = vmatprep.subr.bf16.mxu0 %v880_v2  ;;  %1052 = vmatpush1.bf16.msra.mxu1 %v873_v10  ;;  %v820_v2 = vunpack.c.h.s8.bf16 %v732_v57  ;;  %v813_v10 = vunpack.c.l.s8.bf16 %v733_v6 }
 0x18c   : > { %1053 = vmatprep.subr.bf16.mxu1 %v882_v11  ;;  %v822_v11 = vunpack.c.h.s8.bf16 %v734_v1  ;;  %v774_v1 = vld [vmem:[%s5683_s25 + $0x1b8] sm:$0xff] }
 0x18e   : > { %972 = vmatpush1.bf16.msra.mxu0 %v879_v7  ;;  %v819_v7 = vunpack.c.h.s8.bf16 %v731_v61  ;;  %v771_v61 = vld [vmem:[%s5683_s25 + $0x1a0] sm:$0xff] }
 0x18f   : > { %973 = vmatprep.subr.bf16.mxu0 %v888_v8  ;;  %1054 = vmatpush1.bf16.msra.mxu1 %v881_v17  ;;  %v828_v8 = vunpack.c.l.s8.bf16 %v740_v3  ;;  %v821_v17 = vunpack.c.h.s8.bf16 %v733_v6  ;;  %v773_v6 = vld [vmem:[%s5683_s25 + $0x1b0] sm:$0xff] }
 0x190   : > { %1055 = vmatprep.subr.bf16.mxu1 %v890_v18  ;;  %v830_v18 = vunpack.c.l.s8.bf16 %v742_v13 }
 0x192   : > { %974 = vmatpush1.bf16.msra.mxu0 %v887_v12  ;;  %v827_v12 = vunpack.c.l.s8.bf16 %v739_v9 }
 0x193   : > { %975 = vmatprep.subr.bf16.mxu0 %v896_v14  ;;  %1056 = vmatpush1.bf16.msra.mxu1 %v889_v24  ;;  %v836_v14 = vunpack.c.h.s8.bf16 %v740_v3  ;;  %v829_v24 = vunpack.c.l.s8.bf16 %v741_v19  ;;  %v780_v3 = vld [vmem:[%s5683_s25 + $0x1e8] sm:$0xff] }
 0x194   : > { %1057 = vmatprep.subr.bf16.mxu1 %v898_v25  ;;  %v838_v25 = vunpack.c.h.s8.bf16 %v742_v13  ;;  %v782_v13 = vld [vmem:[%s5683_s25 + $0x1f8] sm:$0xff] }
 0x196   : > { %976 = vmatpush1.bf16.msra.mxu0 %v895_v20  ;;  %v835_v20 = vunpack.c.h.s8.bf16 %v739_v9  ;;  %v779_v9 = vld [vmem:[%s5683_s25 + $0x1e0] sm:$0xff] }
 0x197   : > { %977 = vmatprep.subr.bf16.mxu0 %v904_v21  ;;  %1058 = vmatpush1.bf16.msra.mxu1 %v897_v30  ;;  %v844_v21 = vunpack.c.l.s8.bf16 %v748_v15  ;;  %v837_v30 = vunpack.c.h.s8.bf16 %v741_v19  ;;  %v781_v19 = vld [vmem:[%s5683_s25 + $0x1f0] sm:$0xff] }
 0x198   : > { %1059 = vmatprep.subr.bf16.mxu1 %v906_v31  ;;  %v846_v31 = vunpack.c.l.s8.bf16 %v750_v27 }
 0x19a   : > { %978 = vmatpush1.bf16.msra.mxu0 %v903_v26  ;;  %v843_v26 = vunpack.c.l.s8.bf16 %v747_v23 }
 0x19b   : > { %979 = vmatprep.subr.bf16.mxu0 %v912_v28  ;;  %1060 = vmatpush1.bf16.msra.mxu1 %v905_v36  ;;  %v852_v28 = vunpack.c.h.s8.bf16 %v748_v15  ;;  %v845_v36 = vunpack.c.l.s8.bf16 %v749_v32  ;;  %v788_v15 = vld [vmem:[%s5683_s25 + $0x228] sm:$0xff]  ;;  %v789_v32 = vld [vmem:[%s5683_s25 + $0x230] sm:$0xff] }
 0x19c   : > { %1061 = vmatprep.subr.bf16.mxu1 %v914_v38  ;;  %v854_v38 = vunpack.c.h.s8.bf16 %v750_v27  ;;  %v790_v27 = vld [vmem:[%s5683_s25 + $0x238] sm:$0xff] }
 0x19e   : > { %980 = vmatpush1.bf16.msra.mxu0 %v911_v33  ;;  %v851_v33 = vunpack.c.h.s8.bf16 %v747_v23  ;;  %v787_v23 = vld [vmem:[%s5683_s25 + $0x220] sm:$0xff] }
 0x19f   : > { %990 = vmatprep.subr.bf16.mxu0 %v920_v34  ;;  %1062 = vmatpush1.bf16.msra.mxu1 %v913_v42  ;;  %v860_v34 = vunpack.c.l.s8.bf16 %v756_v29  ;;  %v764_v42 = vld [vmem:[%s5683_s25 + $0x168] sm:$0xff] }
 0x1a0   : > { %1072 = vmatprep.subr.bf16.mxu1 %v922_v44  ;;  %v862_v44 = vunpack.c.l.s8.bf16 %v758_v40  ;;  %v933_v40 = vunpack.c.h.s8.bf16 %v789_v32 }
 0x1a1   : > { %982 = vmatmul.mubr.bf16.vlgmr.msra.gmra.mrb[0].mxu0 %v5775_v37 }
 0x1a2   : > { %991 = vmatpush1.bf16.msra.mxu0 %v919_v39  ;;  %1022 = vmatprep.mubr.bf16.mxu0 %v5167_v46  ;;  %v859_v39 = vunpack.c.l.s8.bf16 %v755_v35 }
 0x1a3   : > { %992 = vmatprep.subr.bf16.mxu0 %v928_v41  ;;  %1064 = vmatmul.mubr.bf16.vlgmr.msra.gmra.mrb[0].mxu1 %v5775_v37  ;;  %v868_v41 = vunpack.c.h.s8.bf16 %v756_v29  ;;  %v917_v29 = vunpack.c.h.s8.bf16 %v781_v19 }
 0x1a4   : > { %1073 = vmatpush1.bf16.msra.mxu1 %v921_v48  ;;  %1104 = vmatprep.mubr.bf16.mxu1 %v5167_v46  ;;  %v763_v48 = vld [vmem:[%s5683_s25 + $0x160] sm:$0xff] }
 0x1a5   : > { %1074 = vmatprep.subr.bf16.mxu1 %v930_v49  ;;  %v861_v49 = vunpack.c.l.s8.bf16 %v757_v45  ;;  %v875_v51 = vunpack.c.l.s8.bf16 %v763_v48 }
 0x1a6   : > { %993 = vmatpush1.bf16.msra.mxu0 %v927_v16  ;;  %v867_v16 = vunpack.c.h.s8.bf16 %v755_v35  ;;  %v925_v35 = vunpack.c.l.s8.bf16 %v789_v32 }
 0x1a7   : > { %1113 = vmatprep.subr.bf16.mxu0 %v796_v47  ;;  %v876_v47 = vunpack.c.l.s8.bf16 %v764_v42 }
 0x1a8   : > { %1075 = vmatpush1.bf16.msra.mxu1 %v929_v52  ;;  %v766_v52 = vld [vmem:[%s5683_s25 + $0x178] sm:$0xff] }
 0x1a9   : > { %1195 = vmatprep.subr.bf16.mxu1 %v798_v54  ;;  %v884_v54 = vunpack.c.h.s8.bf16 %v764_v42  ;;  %v878_v57 = vunpack.c.l.s8.bf16 %v766_v52 }
 0x1ad   : > { %4219 = vmatmul.mubr.msk.bf16.vlgmr.msra.gmra.mrb[0].mxu0 %vm945_vm0, %v5786_v53 }
 0x1ae   : > { %1114 = vmatpush1.bf16.msra.mxu0 %v795_v55  ;;  %1145 = vmatprep.mubr.bf16.mxu0 %v5744_v22  ;;  %v772_v55 = vld [vmem:[%s5683_s25 + $0x1a8] sm:$0xff] }
 0x1af   : > { %1115 = vmatprep.subr.bf16.mxu0 %v804_v56  ;;  %4220 = vmatmul.mubr.msk.bf16.vlgmr.msra.gmra.mrb[0].mxu1 %vm945_vm0, %v5786_v53  ;;  %v869_v56 = vunpack.c.h.s8.bf16 %v757_v45  ;;  %v1395_v45 = vld [vmem:[%s5704_s21 + $0x10] sm:$0xff] }
 0x1b0   : > { %1196 = vmatpush1.bf16.msra.mxu1 %v797_v62  ;;  %1227 = vmatprep.mubr.bf16.mxu1 %v5744_v22  ;;  %v877_v62 = vunpack.c.l.s8.bf16 %v765_v58 }
 0x1b1   : > { %1197 = vmatprep.subr.bf16.mxu1 %v806_v63  ;;  %v886_v63 = vunpack.c.h.s8.bf16 %v766_v52 }
 0x1b2   : > { %1116 = vmatpush1.bf16.msra.mxu0 %v803_v59  ;;  %v883_v59 = vunpack.c.h.s8.bf16 %v763_v48  ;;  %v1397_v48 = vld [vmem:[%s5704_s21 + $0x20] sm:$0xff] }
 0x1b3   : > { %1117 = vmatprep.subr.bf16.mxu0 %v812_v60  ;;  %v892_v60 = vunpack.c.l.s8.bf16 %v772_v55  ;;  %v1529_v52 = vunpack.c.l.s8.bf16 %v1397_v48 }
 0x1b4   : > { %1198 = vmatpush1.bf16.msra.mxu1 %v805_v4  ;;  %v885_v4 = vunpack.c.h.s8.bf16 %v765_v58  ;;  %v1399_v58 = vld [vmem:[%s5704_s21 + $0x30] sm:$0xff] }
 0x1b5   : > { %1199 = vmatprep.subr.bf16.mxu1 %v814_v5  ;;  %v894_v5 = vunpack.c.l.s8.bf16 %v774_v1 }
 0x1b6   : > { %1118 = vmatpush1.bf16.msra.mxu0 %v811_v0  ;;  %v891_v0 = vunpack.c.l.s8.bf16 %v771_v61 }
 0x1b7   : > { %1119 = vmatprep.subr.bf16.mxu0 %v820_v2  ;;  %v900_v2 = vunpack.c.h.s8.bf16 %v772_v55  ;;  %v1527_v55 = vunpack.c.h.s8.bf16 %v1395_v45 }
 0x1b8   : > { %1200 = vmatpush1.bf16.msra.mxu1 %v813_v10  ;;  %v893_v10 = vunpack.c.l.s8.bf16 %v773_v6 }
 0x1b9   : > { %1201 = vmatprep.subr.bf16.mxu1 %v822_v11  ;;  %v902_v11 = vunpack.c.h.s8.bf16 %v774_v1 }
 0x1ba   : > { %1120 = vmatpush1.bf16.msra.mxu0 %v819_v7  ;;  %v899_v7 = vunpack.c.h.s8.bf16 %v771_v61  ;;  %v1401_v61 = vld [vmem:[%s5704_s21 + $0x40] sm:$0xff] }
 0x1bb   : > { %1121 = vmatprep.subr.bf16.mxu0 %v828_v8  ;;  %v908_v8 = vunpack.c.l.s8.bf16 %v780_v3 }
 0x1bc   : > { %1202 = vmatpush1.bf16.msra.mxu1 %v821_v17  ;;  %v901_v17 = vunpack.c.h.s8.bf16 %v773_v6  ;;  %v1541_v6 = vunpack.c.h.s8.bf16 %v1401_v61 }
 0x1bd   : > { %1203 = vmatprep.subr.bf16.mxu1 %v830_v18  ;;  %v910_v18 = vunpack.c.l.s8.bf16 %v782_v13 }
 0x1be   : > { %1122 = vmatpush1.bf16.msra.mxu0 %v827_v12  ;;  %v907_v12 = vunpack.c.l.s8.bf16 %v779_v9 }
 0x1bf   : > { %1123 = vmatprep.subr.bf16.mxu0 %v836_v14  ;;  %v916_v14 = vunpack.c.h.s8.bf16 %v780_v3  ;;  %v1406_v3 = vld [vmem:[%s5704_s21 + $0x68] sm:$0xff] }
 0x1c0   : > { %1204 = vmatpush1.bf16.msra.mxu1 %v829_v24  ;;  %v909_v24 = vunpack.c.l.s8.bf16 %v781_v19 }
 0x1c1   : > { %1205 = vmatprep.subr.bf16.mxu1 %v838_v25  ;;  %v918_v25 = vunpack.c.h.s8.bf16 %v782_v13  ;;  %v1550_v13 = vunpack.c.h.s8.bf16 %v1406_v3 }
 0x1c2   : > { %1124 = vmatpush1.bf16.msra.mxu0 %v835_v20  ;;  %v915_v20 = vunpack.c.h.s8.bf16 %v779_v9 }
 0x1c3   : > { %1125 = vmatprep.subr.bf16.mxu0 %v844_v21  ;;  %v924_v21 = vunpack.c.l.s8.bf16 %v788_v15 }
 0x1c4   : > { %1206 = vmatpush1.bf16.msra.mxu1 %v837_v30  ;;  %v1394_v30 = vld [vmem:[%s5704_s21 + $0x8] sm:$0xff] }
 0x1c5   : > { %1207 = vmatprep.subr.bf16.mxu1 %v846_v31  ;;  %v926_v31 = vunpack.c.l.s8.bf16 %v790_v27 }
 0x1c6   : > { %1126 = vmatpush1.bf16.msra.mxu0 %v843_v26  ;;  %v923_v26 = vunpack.c.l.s8.bf16 %v787_v23 }
 0x1c7   : > { %1127 = vmatprep.subr.bf16.mxu0 %v852_v28  ;;  %v932_v28 = vunpack.c.h.s8.bf16 %v788_v15  ;;  %v1410_v15 = vld [vmem:[%s5704_s21 + $0x88] sm:$0xff] }
 0x1c8   : > { %1208 = vmatpush1.bf16.msra.mxu1 %v845_v36  ;;  %v934_v36 = vunpack.c.h.s8.bf16 %v790_v27  ;;  %v1558_v27 = vunpack.c.h.s8.bf16 %v1410_v15 }
 0x1c9   : > { %1209 = vmatprep.subr.bf16.mxu1 %v854_v38  ;;  %v1396_v38 = vld [vmem:[%s5704_s21 + $0x18] sm:$0xff] }
 0x1ca   : > { %1128 = vmatpush1.bf16.msra.mxu0 %v851_v33  ;;  %v931_v33 = vunpack.c.h.s8.bf16 %v787_v23 }
 0x1cb   : > { %1129 = vmatprep.subr.bf16.mxu0 %v860_v34  ;;  %v1522_v34 = vunpack.c.l.s8.bf16 %v1394_v30 }
 0x1cc   : > { %1210 = vmatpush1.bf16.msra.mxu1 %v853_v43  ;;  %v1526_v43 = vunpack.c.h.s8.bf16 %v1394_v30 }
 0x1cd   : > { %1211 = vmatprep.subr.bf16.mxu1 %v862_v44  ;;  %v1398_v44 = vld [vmem:[%s5704_s21 + $0x28] sm:$0xff] }
 0x1ce   : > { %1130 = vmatpush1.bf16.msra.mxu0 %v859_v39  ;;  %v1393_v39 = vld [vmem:[%s5704_s21] sm:$0xff] }
 0x1cf   : > { %1131 = vmatprep.subr.bf16.mxu0 %v868_v41  ;;  %v1524_v41 = vunpack.c.l.s8.bf16 %v1396_v38  ;;  %v1521_v42 = vunpack.c.l.s8.bf16 %v1393_v39 }
 0x1d0   : > { %1212 = vmatpush1.bf16.msra.mxu1 %v861_v49  ;;  %v1523_v49 = vunpack.c.l.s8.bf16 %v1395_v45 }
 0x1d1   : > { %1213 = vmatprep.subr.bf16.mxu1 %v870_v50  ;;  %v1528_v50 = vunpack.c.h.s8.bf16 %v1396_v38  ;;  %v1416_v38 = vld [vmem:[%s5704_s21 + $0xb8] sm:$0xff] }
 0x1d2   : > { %1132 = vmatpush1.bf16.msra.mxu0 %v867_v16  ;;  %v1525_v16 = vunpack.c.h.s8.bf16 %v1393_v39 }
 0x1d3   : > { %1133 = vmatprep.subr.bf16.mxu0 %v876_v47  ;;  %v1530_v47 = vunpack.c.l.s8.bf16 %v1398_v44 }
 0x1d4   : > { %1214 = vmatpush1.bf16.msra.mxu1 %v869_v56  ;;  %v1402_v56 = vld [vmem:[%s5704_s21 + $0x48] sm:$0xff] }
 0x1d5   : > { %1215 = vmatprep.subr.bf16.mxu1 %v878_v57  ;;  %v1542_v1 = vunpack.c.h.s8.bf16 %v1402_v56 }
 0x1d6   : > { %1134 = vmatpush1.bf16.msra.mxu0 %v875_v51  ;;  %v1400_v51 = vld [vmem:[%s5704_s21 + $0x38] sm:$0xff] }
 0x1d7   : > { %1135 = vmatprep.subr.bf16.mxu0 %v884_v54  ;;  %v1534_v54 = vunpack.c.h.s8.bf16 %v1398_v44  ;;  %v1532_v57 = vunpack.c.l.s8.bf16 %v1400_v51  ;;  %v1415_v44 = vld [vmem:[%s5704_s21 + $0xb0] sm:$0xff] }
 0x1d8   : > { %1216 = vmatpush1.bf16.msra.mxu1 %v877_v62  ;;  %v1531_v62 = vunpack.c.l.s8.bf16 %v1399_v58 }
 0x1d9   : > { %1217 = vmatprep.subr.bf16.mxu1 %v886_v63  ;;  %v1404_v63 = vld [vmem:[%s5704_s21 + $0x58] sm:$0xff] }
 0x1da   : > { %1136 = vmatpush1.bf16.msra.mxu0 %v883_v59  ;;  %v1533_v59 = vunpack.c.h.s8.bf16 %v1397_v48  ;;  %v1563_v48 = vunpack.c.l.s8.bf16 %v1415_v44 }
 0x1db   : > { %1137 = vmatprep.subr.bf16.mxu0 %v892_v60  ;;  %v1538_v60 = vunpack.c.l.s8.bf16 %v1402_v56 }
 0x1dc   : > { %1218 = vmatpush1.bf16.msra.mxu1 %v885_v4  ;;  %v1540_v4 = vunpack.c.l.s8.bf16 %v1404_v63 }
 0x1dd   : > { %1219 = vmatprep.subr.bf16.mxu1 %v894_v5  ;;  %v1403_v5 = vld [vmem:[%s5704_s21 + $0x50] sm:$0xff] }
 0x1de   : > { %1138 = vmatpush1.bf16.msra.mxu0 %v891_v0  ;;  %v1537_v0 = vunpack.c.l.s8.bf16 %v1401_v61  ;;  %v1539_v9 = vunpack.c.l.s8.bf16 %v1403_v5 }
 0x1df   : > { %1139 = vmatprep.subr.bf16.mxu0 %v900_v2  ;;  %v1535_v2 = vunpack.c.h.s8.bf16 %v1399_v58 }
 0x1e0   : > { %1220 = vmatpush1.bf16.msra.mxu1 %v893_v10  ;;  %v1544_v10 = vunpack.c.h.s8.bf16 %v1404_v63 }
 0x1e1   : > { %1221 = vmatprep.subr.bf16.mxu1 %v902_v11  ;;  %v1408_v11 = vld [vmem:[%s5704_s21 + $0x78] sm:$0xff] }
 0x1e2   : > { %1140 = vmatpush1.bf16.msra.mxu0 %v899_v7  ;;  %v1546_v7 = vunpack.c.l.s8.bf16 %v1406_v3 }
 0x1e3   : > { %1141 = vmatprep.subr.bf16.mxu0 %v908_v8  ;;  %v1405_v8 = vld [vmem:[%s5704_s21 + $0x60] sm:$0xff] }
 0x1e4   : > { %1222 = vmatpush1.bf16.msra.mxu1 %v901_v17  ;;  %v1548_v17 = vunpack.c.l.s8.bf16 %v1408_v11  ;;  %v1549_v19 = vunpack.c.h.s8.bf16 %v1405_v8 }
 0x1e5   : > { %1223 = vmatprep.subr.bf16.mxu1 %v910_v18  ;;  %v1407_v18 = vld [vmem:[%s5704_s21 + $0x70] sm:$0xff] }
 0x1e6   : > { %1142 = vmatpush1.bf16.msra.mxu0 %v907_v12  ;;  %v1545_v12 = vunpack.c.l.s8.bf16 %v1405_v8  ;;  %v1547_v23 = vunpack.c.l.s8.bf16 %v1407_v18 }
 0x1e7   : > { %1143 = vmatprep.subr.bf16.mxu0 %v916_v14  ;;  %v1543_v14 = vunpack.c.h.s8.bf16 %v1403_v5 }
 0x1e8   : > { %1224 = vmatpush1.bf16.msra.mxu1 %v909_v24  ;;  %v1552_v24 = vunpack.c.h.s8.bf16 %v1408_v11 }
 0x1e9   : > { %1225 = vmatprep.subr.bf16.mxu1 %v918_v25  ;;  %v1412_v25 = vld [vmem:[%s5704_s21 + $0x98] sm:$0xff] }
 0x1ea   : > { %1144 = vmatpush1.bf16.msra.mxu0 %v915_v20  ;;  %v1554_v20 = vunpack.c.l.s8.bf16 %v1410_v15  ;;  %v1556_v30 = vunpack.c.l.s8.bf16 %v1412_v25  ;;  %v5878_v15 = vld [vmem:[%s5693_s15] sm:$0xff] }
 0x1eb   : > { %1154 = vmatprep.subr.bf16.mxu0 %v924_v21  ;;  %v1409_v21 = vld [vmem:[%s5704_s21 + $0x80] sm:$0xff] }
 0x1ec   : > { %1226 = vmatpush1.bf16.msra.mxu1 %v917_v29  ;;  %v1414_v29 = vld [vmem:[%s5704_s21 + $0xa8] sm:$0xff]  ;;  %v1557_v32 = vunpack.c.h.s8.bf16 %v1409_v21 }
 0x1ed   : > { %1146 = vmatmul.mubr.bf16.vlgmr.msra.gmra.mrb[4].mxu0 %v5775_v37  ;;  %1236 = vmatprep.subr.bf16.mxu1 %v926_v31  ;;  %v1411_v31 = vld [vmem:[%s5704_s21 + $0x90] sm:$0xff] }
 0x1ee   : > { %1155 = vmatpush1.bf16.msra.mxu0 %v923_v26  ;;  %1186 = vmatprep.mubr.bf16.mxu0 %v5167_v46  ;;  %v1553_v26 = vunpack.c.l.s8.bf16 %v1409_v21 }
 0x1ef   : > { %1156 = vmatprep.subr.bf16.mxu0 %v932_v28  ;;  %1228 = vmatmul.mubr.bf16.vlgmr.msra.gmra.mrb[4].mxu1 %v5775_v37  ;;  %v1551_v28 = vunpack.c.h.s8.bf16 %v1407_v18  ;;  %v5884_v18 = vld [vmem:[%s5696_s11] sm:$0xff] }
 0x1f0   : > { %1237 = vmatpush1.bf16.msra.mxu1 %v925_v35  ;;  %1268 = vmatprep.mubr.bf16.mxu1 %v5167_v46  ;;  %v1555_v35 = vunpack.c.l.s8.bf16 %v1411_v31 }
 0x1f1   : > { %1238 = vmatprep.subr.bf16.mxu1 %v934_v36  ;;  %v1560_v36 = vunpack.c.h.s8.bf16 %v1412_v25 }
 0x1f2   : > { %1157 = vmatpush1.bf16.msra.mxu0 %v931_v33  ;;  %v1562_v33 = vunpack.c.l.s8.bf16 %v1414_v29 }
 0x1f3   : > { %1777 = vmatprep.subr.bf16.mxu0 %v1522_v34  ;;  %v1413_v34 = vld [vmem:[%s5704_s21 + $0xa0] sm:$0xff] }
 0x1f4   : > { %1239 = vmatpush1.bf16.msra.mxu1 %v933_v40  ;;  %v1561_v39 = vunpack.c.l.s8.bf16 %v1413_v34  ;;  %v1566_v40 = vunpack.c.h.s8.bf16 %v1414_v29  ;;  %v1565_v45 = vunpack.c.h.s8.bf16 %v1413_v34 }
 0x1f5   : > { %1941 = vmatprep.subr.bf16.mxu1 %v1524_v41  ;;  %v1559_v41 = vunpack.c.h.s8.bf16 %v1411_v31 }
 0x1f9   : > { %4221 = vmatmul.mubr.msk.bf16.vlgmr.msra.gmra.mrb[4].mxu0 %vm945_vm0, %v5786_v53 }
 0x1fa   : > { %1778 = vmatpush1.bf16.msra.mxu0 %v1521_v42  ;;  %v1418_v42 = vld [vmem:[%s5704_s21 + $0xc8] sm:$0xff] }
 0x1fb   : > { %1779 = vmatprep.subr.bf16.mxu0 %v1526_v43  ;;  %4222 = vmatmul.mubr.msk.bf16.vlgmr.msra.gmra.mrb[4].mxu1 %vm945_vm0, %v5786_v53  ;;  %v1536_v53 = vunpack.c.h.s8.bf16 %v1400_v51  ;;  %v1564_v43 = vunpack.c.l.s8.bf16 %v1416_v38 }
 0x1fc   : > { %1942 = vmatpush1.bf16.msra.mxu1 %v1523_v49  ;;  %v1568_v49 = vunpack.c.h.s8.bf16 %v1416_v38 }
 0x1fd   : > { %1943 = vmatprep.subr.bf16.mxu1 %v1528_v50  ;;  %v1420_v50 = vld [vmem:[%s5704_s21 + $0xd8] sm:$0xff] }
 0x1fe   : > { %1780 = vmatpush1.bf16.msra.mxu0 %v1525_v16  ;;  %v1570_v16 = vunpack.c.l.s8.bf16 %v1418_v42  ;;  %v1572_v56 = vunpack.c.l.s8.bf16 %v1420_v50 }
 0x1ff   : > { %1781 = vmatprep.subr.bf16.mxu0 %v1530_v47  ;;  %v1417_v47 = vld [vmem:[%s5704_s21 + $0xc0] sm:$0xff] }
 0x200   : > { %1944 = vmatpush1.bf16.msra.mxu1 %v1527_v55  ;;  %v1569_v51 = vunpack.c.l.s8.bf16 %v1417_v47  ;;  %v1422_v55 = vld [vmem:[%s5704_s21 + $0xe8] sm:$0xff]  ;;  %v1573_v58 = vunpack.c.h.s8.bf16 %v1417_v47 }
 0x201   : > { %1945 = vmatprep.subr.bf16.mxu1 %v1532_v57  ;;  %v1419_v57 = vld [vmem:[%s5704_s21 + $0xd0] sm:$0xff] }
 0x202   : > { %1782 = vmatpush1.bf16.msra.mxu0 %v1529_v52  ;;  %v1574_v52 = vunpack.c.h.s8.bf16 %v1418_v42  ;;  %v1571_v61 = vunpack.c.l.s8.bf16 %v1419_v57 }
 0x203   : > { %1783 = vmatprep.subr.bf16.mxu0 %v1534_v54  ;;  %v1567_v54 = vunpack.c.h.s8.bf16 %v1415_v44 }
 0x204   : > { %1946 = vmatpush1.bf16.msra.mxu1 %v1531_v62  ;;  %v1576_v62 = vunpack.c.h.s8.bf16 %v1420_v50 }
 0x205   : > { %1947 = vmatprep.subr.bf16.mxu1 %v1536_v53  ;;  %v1424_v53 = vld [vmem:[%s5704_s21 + $0xf8] sm:$0xff] }
 0x206   : > { %1784 = vmatpush1.bf16.msra.mxu0 %v1533_v59  ;;  %v1578_v59 = vunpack.c.l.s8.bf16 %v1422_v55  ;;  %v1580_v3 = vunpack.c.l.s8.bf16 %v1424_v53  ;;  %v1584_v8 = vunpack.c.h.s8.bf16 %v1424_v53 }
 0x207   : > { %1785 = vmatprep.subr.bf16.mxu0 %v1538_v60  ;;  %v1421_v60 = vld [vmem:[%s5704_s21 + $0xe0] sm:$0xff] }
 0x208   : > { %1948 = vmatpush1.bf16.msra.mxu1 %v1535_v2  ;;  %v1577_v63 = vunpack.c.l.s8.bf16 %v1421_v60  ;;  %v5867_v2 = vld [vmem:[%s5704_s21 + $0x108] sm:$0xff]  ;;  %v1581_v5 = vunpack.c.h.s8.bf16 %v1421_v60  ;;  %v1429_v60 = vld [vmem:[%s5704_s21 + $0x120] sm:$0xff] }
 0x209   : > { %1949 = vmatprep.subr.bf16.mxu1 %v1540_v4  ;;  %v1423_v4 = vld [vmem:[%s5704_s21 + $0xf0] sm:$0xff]  ;;  %v1593_v53 = vunpack.c.l.s8.bf16 %v1429_v60 }
 0x20a   : > { %1786 = vmatpush1.bf16.msra.mxu0 %v1537_v0  ;;  %v1582_v0 = vunpack.c.h.s8.bf16 %v1422_v55 }
 0x20b   : > { %1787 = vmatprep.subr.bf16.mxu0 %v1542_v1  ;;  %v1575_v1 = vunpack.c.h.s8.bf16 %v1419_v57 }
 0x20c   : > { %1950 = vmatpush1.bf16.msra.mxu1 %v1539_v9  ;;  %v1428_v9 = vld [vmem:[%s5704_s21 + $0x118] sm:$0xff] }
 0x20d   : > { %1951 = vmatprep.subr.bf16.mxu1 %v1544_v10  ;;  %v1583_v10 = vunpack.c.h.s8.bf16 %v1423_v4  ;;  %v1588_v11 = vunpack.c.l.s8.bf16 %v1428_v9 }
 0x20e   : > { %1788 = vmatpush1.bf16.msra.mxu0 %v1541_v6  ;;  %v1586_v6 = vunpack.c.l.s8.bf16 %v5867_v2 }
 0x20f   : > { %1789 = vmatprep.subr.bf16.mxu0 %v1546_v7  ;;  %v1579_v7 = vunpack.c.l.s8.bf16 %v1423_v4  ;;  %v1597_v4 = vunpack.c.h.s8.bf16 %v1429_v60 }
 0x210   : > { %1952 = vmatpush1.bf16.msra.mxu1 %v1543_v14 }
 0x211   : > { %1953 = vmatprep.subr.bf16.mxu1 %v1548_v17 }
 0x212   : > { %1790 = vmatpush1.bf16.msra.mxu0 %v1545_v12  ;;  %v1279_v12 = vlaneseq }
 0x213   : > { %1791 = vmatprep.subr.bf16.mxu0 %v1550_v13 }
 0x214   : > { %1954 = vmatpush1.bf16.msra.mxu1 %v1547_v23  ;;  %v5872_v13 = vshrl.u32 %v1279_v12, 7 }
 0x215   : > { %1955 = vmatprep.subr.bf16.mxu1 %v1552_v24 }
 0x216   : > { %1792 = vmatpush1.bf16.msra.mxu0 %v1549_v19  ;;  %v5875_v14 = vsub.s32 0, %v5872_v13  ;;  %v5881_v17 = vsub.s32 1, %v5872_v13  ;;  %v5895_v25 = vsub.s32 3, %v5872_v13 }
 0x217   : > { %1793 = vmatprep.subr.bf16.mxu0 %v1554_v20 }
 0x218   : > { %1956 = vmatpush1.bf16.msra.mxu1 %v1551_v28  ;;  %v1282_v19 = vrot.slane %v5878_v15, %v5875_v14  ;;  %v1286_v20 = vrot.slane %v5878_v15, %v5881_v17  ;;  %v1332_v21 = vrot.slane %v5884_v18, %v5875_v14  ;;  %v1336_v24 = vrot.slane %v5884_v18, %v5881_v17 }
 0x219   : > { %1957 = vmatprep.subr.bf16.mxu1 %v1556_v30 }
 0x21a   : > { %1794 = vmatpush1.bf16.msra.mxu0 %v1553_v26 }
 0x21b   : > { %1795 = vmatprep.subr.bf16.mxu0 %v1558_v27 }
 0x21c   : > { %1958 = vmatpush1.bf16.msra.mxu1 %v1555_v35  ;;  %v1425_v35 = vld [vmem:[%s5704_s21 + $0x100] sm:$0xff] }
 0x21d   : > { %1959 = vmatprep.subr.bf16.mxu1 %v1560_v36  ;;  %v1427_v36 = vld [vmem:[%s5704_s21 + $0x110] sm:$0xff]  ;;  %v1589_v55 = vunpack.c.h.s8.bf16 %v1425_v35 }
 0x21e   : > { %1796 = vmatpush1.bf16.msra.mxu0 %v1557_v32  ;;  %v1587_v44 = vunpack.c.l.s8.bf16 %v1427_v36 }
 0x21f   : > { %1797 = vmatprep.subr.bf16.mxu0 %v1562_v33  ;;  %v1294_v33 = vrot.slane %v5878_v15, %v5895_v25 }
 0x220   : > { %1960 = vmatpush1.bf16.msra.mxu1 %v1559_v41 }
 0x221   : > { %1961 = vmatprep.subr.bf16.mxu1 %v1564_v43  ;;  %v1585_v43 = vunpack.c.l.s8.bf16 %v1425_v35  ;;  %v1444_v35 = vld [vmem:[%s5704_s21 + $0x198] sm:$0xff] }
 0x222   : > { %1798 = vmatpush1.bf16.msra.mxu0 %v1561_v39 }
 0x223   : > { %1799 = vmatprep.subr.bf16.mxu0 %v1566_v40  ;;  %v1344_v40 = vrot.slane %v5884_v18, %v5895_v25 }
 0x224   : > { %1962 = vmatpush1.bf16.msra.mxu1 %v1563_v48  ;;  %v1590_v48 = vunpack.c.h.s8.bf16 %v5867_v2  ;;  %v1434_v2 = vld [vmem:[%s5704_s21 + $0x148] sm:$0xff] }
 0x225   : > { %1963 = vmatprep.subr.bf16.mxu1 %v1568_v49  ;;  %v1592_v49 = vunpack.c.h.s8.bf16 %v1428_v9  ;;  %v1435_v9 = vld [vmem:[%s5704_s21 + $0x150] sm:$0xff]  ;;  %v1606_v12 = vunpack.c.h.s8.bf16 %v1434_v2 }
 0x226   : > { %1800 = vmatpush1.bf16.msra.mxu0 %v1565_v45 }
 0x227   : > { %1801 = vmatprep.subr.bf16.mxu0 %v1570_v16 }
 0x228   : > { %1964 = vmatpush1.bf16.msra.mxu1 %v1567_v54 }
 0x229   : > { %1965 = vmatprep.subr.bf16.mxu1 %v1572_v56  ;;  %v1591_v56 = vunpack.c.h.s8.bf16 %v1427_v36 }
 0x22a   : > { %1802 = vmatpush1.bf16.msra.mxu0 %v1569_v51  ;;  %v1430_v51 = vld [vmem:[%s5704_s21 + $0x128] sm:$0xff] }
 0x22b   : > { %1803 = vmatprep.subr.bf16.mxu0 %v1574_v52  ;;  %v1432_v52 = vld [vmem:[%s5704_s21 + $0x138] sm:$0xff] }
 0x22c   : > { %1966 = vmatpush1.bf16.msra.mxu1 %v1571_v61  ;;  %v1431_v61 = vld [vmem:[%s5704_s21 + $0x130] sm:$0xff] }
 0x22d   : > { %1967 = vmatprep.subr.bf16.mxu1 %v1576_v62 }
 0x22e   : > { %1804 = vmatpush1.bf16.msra.mxu0 %v1573_v58  ;;  %v1594_v58 = vunpack.c.l.s8.bf16 %v1430_v51 }
 0x22f   : > { %1805 = vmatprep.subr.bf16.mxu0 %v1578_v59  ;;  %v1596_v59 = vunpack.c.l.s8.bf16 %v1432_v52 }
 0x230   : > { %1968 = vmatpush1.bf16.msra.mxu1 %v1575_v1  ;;  %v1600_v1 = vunpack.c.h.s8.bf16 %v1432_v52 }
 0x231   : > { %1969 = vmatprep.subr.bf16.mxu1 %v1580_v3  ;;  %v1436_v3 = vld [vmem:[%s5704_s21 + $0x158] sm:$0xff] }
 0x232   : > { %1806 = vmatpush1.bf16.msra.mxu0 %v1577_v63  ;;  %v1595_v63 = vunpack.c.l.s8.bf16 %v1431_v61 }
 0x233   : > { %1807 = vmatprep.subr.bf16.mxu0 %v1582_v0  ;;  %v1598_v0 = vunpack.c.h.s8.bf16 %v1430_v51 }
 0x234   : > { %1970 = vmatpush1.bf16.msra.mxu1 %v1579_v7  ;;  %v1604_v7 = vunpack.c.l.s8.bf16 %v1436_v3 }
 0x235   : > { %1971 = vmatprep.subr.bf16.mxu1 %v1584_v8  ;;  %v1433_v8 = vld [vmem:[%s5704_s21 + $0x140] sm:$0xff] }
 0x236   : > { %1808 = vmatpush1.bf16.msra.mxu0 %v1581_v5  ;;  %v1599_v5 = vunpack.c.h.s8.bf16 %v1431_v61  ;;  %v1450_v61 = vld [vmem:[%s5704_s21 + $0x1c8] sm:$0xff] }
 0x237   : > { %1818 = vmatprep.subr.bf16.mxu0 %v1586_v6  ;;  %v1602_v6 = vunpack.c.l.s8.bf16 %v1434_v2 }
 0x238   : > { %1972 = vmatpush1.bf16.msra.mxu1 %v1583_v10  ;;  %v1601_v10 = vunpack.c.l.s8.bf16 %v1433_v8 }
 0x239   : > { %1982 = vmatprep.subr.bf16.mxu1 %v1588_v11  ;;  %v1603_v11 = vunpack.c.l.s8.bf16 %v1435_v9 }
 0x280   : > { %v1024_v23 = vpop.f32.mrb[0].mxu0 }
 0x281   : > { %v1319_v26 = vmul.f32 %v1282_v19, %v1024_v23  ;;  %v1026_v27 = vpop.f32.mrb[1].mxu0  ;;  %v1608_v19 = vunpack.c.h.s8.bf16 %v1436_v3  ;;  %v1605_v23 = vunpack.c.h.s8.bf16 %v1433_v8  ;;  %v1449_v3 = vld [vmem:[%s5704_s21 + $0x1c0] sm:$0xff]  ;;  %v1638_v8 = vunpack.c.h.s8.bf16 %v1450_v61 }
 0x282   : > { %v1320_v28 = vmul.f32 %v1286_v20, %v1026_v27  ;;  %v1028_v29 = vpop.f32.mrb[2].mxu0  ;;  %v5901_v39 = vpop.f32.mrb[0].mxu1  ;;  %v1438_v20 = vld [vmem:[%s5704_s21 + $0x168] sm:$0xff] }
 0x283   : > { %v1369_v30 = vadd.f32 %v1332_v21, %v1319_v26  ;;  %v1029_v31 = vpop.f32.mrb[3].mxu0  ;;  %v1108_v41 = vpop.f32.mrb[1].mxu1  ;;  %v1440_v21 = vld [vmem:[%s5704_s21 + $0x178] sm:$0xff]  ;;  %v1610_v26 = vunpack.c.l.s8.bf16 %v1438_v20  ;;  %v1439_v29 = vld [vmem:[%s5704_s21 + $0x170] sm:$0xff] }
 0x284   : > { %v1370_v32 = vadd.f32 %v1336_v24, %v1320_v28  ;;  %v1322_v45 = vmul.f32 %v1294_v33, %v1108_v41  ;;  %v1110_v16 = vpop.f32.mrb[2].mxu1  ;;  %v1607_v24 = vunpack.c.h.s8.bf16 %v1435_v9  ;;  %v1612_v27 = vunpack.c.l.s8.bf16 %v1440_v21  ;;  %v1437_v28 = vld [vmem:[%s5704_s21 + $0x160] sm:$0xff] }
 0x285   : > { %v1377_v34 = vmax.f32 %v1369_v30, 0.0  ;;  %v1111_v50 = vpop.f32.mrb[3].mxu1  ;;  %v1609_v30 = vunpack.c.l.s8.bf16 %v1437_v28  ;;  %v1611_v31 = vunpack.c.l.s8.bf16 %v1439_v29  ;;  %v1616_v33 = vunpack.c.h.s8.bf16 %v1440_v21 }
 0x286   : > { %v1378_v38 = vmax.f32 %v1370_v32, 0.0  ;;  %v1372_v54 = vadd.f32 %v1344_v40, %v1322_v45  ;;  %v1614_v32 = vunpack.c.h.s8.bf16 %v1438_v20  ;;  %v1613_v36 = vunpack.c.h.s8.bf16 %v1437_v28 }
 0x287   : > { %v1385_v47 = vpack.c.bf16 %v1377_v34, %v1377_v34  ;;  %v1442_v34 = vld [vmem:[%s5704_s21 + $0x188] sm:$0xff]  ;;  %v1620_v41 = vunpack.c.l.s8.bf16 %v1444_v35 }
 0x288   : > { %v1386_v42 = vpack.c.bf16 %v1378_v38, %v1378_v38  ;;  %v1380_v57 = vmax.f32 %v1372_v54, 0.0  ;;  %v1615_v38 = vunpack.c.h.s8.bf16 %v1439_v29  ;;  %v1618_v40 = vunpack.c.l.s8.bf16 %v1442_v34 }
 0x289   : > { %v1622_v16 = vunpack.c.h.s8.bf16 %v1442_v34 }
 0x28a   : > { %1809 = vmatprep.mubr.bf16.mxu0 %v1386_v42  ;;  %1973 = vmatprep.mubr.bf16.mxu1 %v1386_v42  ;;  %v1388_v62 = vpack.c.bf16 %v1380_v57, %v1380_v57  ;;  %v1441_v42 = vld [vmem:[%s5704_s21 + $0x180] sm:$0xff] }
 0x28b   : > { %1810 = vmatmul.mubr.bf16.vlgmr.msra.gmra.mrb[8].mxu0 %v1385_v47  ;;  %1974 = vmatmul.mubr.bf16.vlgmr.msra.gmra.mrb[8].mxu1 %v1385_v47  ;;  %v1624_v47 = vunpack.c.h.s8.bf16 %v1444_v35  ;;  %v1621_v50 = vunpack.c.h.s8.bf16 %v1441_v42 }
 0x28c   : > { %1819 = vmatpush1.bf16.msra.mxu0 %v1585_v43  ;;  %1983 = vmatpush1.bf16.msra.mxu1 %v1587_v44  ;;  %v1443_v43 = vld [vmem:[%s5704_s21 + $0x190] sm:$0xff]  ;;  %v1617_v44 = vunpack.c.l.s8.bf16 %v1441_v42 }
 0x28d   : > { %1820 = vmatprep.subr.bf16.mxu0 %v1590_v48  ;;  %1984 = vmatprep.subr.bf16.mxu1 %v1592_v49  ;;  %v1619_v45 = vunpack.c.l.s8.bf16 %v1443_v43  ;;  %v1446_v48 = vld [vmem:[%s5704_s21 + $0x1a8] sm:$0xff]  ;;  %v1448_v49 = vld [vmem:[%s5704_s21 + $0x1b8] sm:$0xff]  ;;  %v1623_v51 = vunpack.c.h.s8.bf16 %v1443_v43  ;;  %v1459_v42 = vld [vmem:[%s5704_s21 + $0x210] sm:$0xff]  ;;  %v5947_v43 = vsub.s32 5, %v5872_v13 }
 0x28e   : > { %1850 = vmatprep.mubr.bf16.mxu0 %v1388_v62  ;;  %2014 = vmatprep.mubr.bf16.mxu1 %v1388_v62  ;;  %v1626_v52 = vunpack.c.l.s8.bf16 %v1446_v48  ;;  %v1628_v54 = vunpack.c.l.s8.bf16 %v1448_v49  ;;  %v1632_v60 = vunpack.c.h.s8.bf16 %v1448_v49  ;;  %v1452_v62 = vld [vmem:[%s5704_s21 + $0x1d8] sm:$0xff]  ;;  %v1462_v49 = vld [vmem:[%s5704_s21 + $0x228] sm:$0xff] }
 0x28f   : > { %v1636_v2 = vunpack.c.l.s8.bf16 %v1452_v62  ;;  %v1640_v9 = vunpack.c.h.s8.bf16 %v1452_v62 }
 0x290   : > { %1821 = vmatpush1.bf16.msra.mxu0 %v1589_v55  ;;  %1985 = vmatpush1.bf16.msra.mxu1 %v1591_v56  ;;  %v1445_v55 = vld [vmem:[%s5704_s21 + $0x1a0] sm:$0xff]  ;;  %v1447_v56 = vld [vmem:[%s5704_s21 + $0x1b0] sm:$0xff] }
 0x291   : > { %1822 = vmatprep.subr.bf16.mxu0 %v1594_v58  ;;  %1986 = vmatprep.subr.bf16.mxu1 %v1596_v59  ;;  %v1625_v57 = vunpack.c.l.s8.bf16 %v1445_v55  ;;  %v1627_v58 = vunpack.c.l.s8.bf16 %v1447_v56  ;;  %v1630_v59 = vunpack.c.h.s8.bf16 %v1446_v48 }
 0x294   : > { %1823 = vmatpush1.bf16.msra.mxu0 %v1593_v53  ;;  %1987 = vmatpush1.bf16.msra.mxu1 %v1595_v63  ;;  %v1629_v53 = vunpack.c.h.s8.bf16 %v1445_v55  ;;  %v1631_v63 = vunpack.c.h.s8.bf16 %v1447_v56  ;;  %v1352_v56 = vrot.slane %v5884_v18, %v5947_v43 }
 0x295   : > { %1824 = vmatprep.subr.bf16.mxu0 %v1598_v0  ;;  %1988 = vmatprep.subr.bf16.mxu1 %v1600_v1  ;;  %v5929_v0 = vsub.s32 2, %v5872_v13  ;;  %v1634_v1 = vunpack.c.l.s8.bf16 %v1450_v61 }
 0x297   : > { %v1340_v21 = vrot.slane %v5884_v18, %v5929_v0 }
 0x298   : > { %1825 = vmatpush1.bf16.msra.mxu0 %v1597_v4  ;;  %1989 = vmatpush1.bf16.msra.mxu1 %v1599_v5  ;;  %v1451_v4 = vld [vmem:[%s5704_s21 + $0x1d0] sm:$0xff]  ;;  %v1633_v5 = vunpack.c.l.s8.bf16 %v1449_v3 }
 0x299   : > { %1826 = vmatprep.subr.bf16.mxu0 %v1602_v6  ;;  %1990 = vmatprep.subr.bf16.mxu1 %v1604_v7  ;;  %v1635_v6 = vunpack.c.l.s8.bf16 %v1451_v4  ;;  %v1290_v7 = vrot.slane %v5878_v15, %v5929_v0 }
 0x29b   : > { %v1321_v20 = vmul.f32 %v1290_v7, %v5901_v39  ;;  %v1468_v7 = vld [vmem:[%s5704_s21 + $0x258] sm:$0xff] }
 0x29c   : > { %1827 = vmatpush1.bf16.msra.mxu0 %v1601_v10  ;;  %1991 = vmatpush1.bf16.msra.mxu1 %v1603_v11  ;;  %v1454_v10 = vld [vmem:[%s5704_s21 + $0x1e8] sm:$0xff]  ;;  %v1456_v11 = vld [vmem:[%s5704_s21 + $0x1f8] sm:$0xff] }
 0x29d   : > { %1828 = vmatprep.subr.bf16.mxu0 %v1606_v12  ;;  %1992 = vmatprep.subr.bf16.mxu1 %v1608_v19  ;;  %v1637_v12 = vunpack.c.h.s8.bf16 %v1449_v3  ;;  %v1639_v19 = vunpack.c.h.s8.bf16 %v1451_v4  ;;  %v1646_v39 = vunpack.c.h.s8.bf16 %v1454_v10  ;;  %v1662_v4 = vunpack.c.h.s8.bf16 %v1462_v49 }
 0x2a0   : > { %1829 = vmatpush1.bf16.msra.mxu0 %v1605_v23  ;;  %1993 = vmatpush1.bf16.msra.mxu1 %v1607_v24  ;;  %v1642_v23 = vunpack.c.l.s8.bf16 %v1454_v10  ;;  %v1644_v24 = vunpack.c.l.s8.bf16 %v1456_v11 }
 0x2a1   : > { %1830 = vmatprep.subr.bf16.mxu0 %v1610_v26  ;;  %1994 = vmatprep.subr.bf16.mxu1 %v1612_v27  ;;  %v1453_v26 = vld [vmem:[%s5704_s21 + $0x1e0] sm:$0xff]  ;;  %v1455_v27 = vld [vmem:[%s5704_s21 + $0x1f0] sm:$0xff] }
 0x2a2   : > { %v1641_v28 = vunpack.c.l.s8.bf16 %v1453_v26  ;;  %v1643_v29 = vunpack.c.l.s8.bf16 %v1455_v27  ;;  %v1645_v34 = vunpack.c.h.s8.bf16 %v1453_v26  ;;  %v1647_v35 = vunpack.c.h.s8.bf16 %v1455_v27  ;;  %v1467_v26 = vld [vmem:[%s5704_s21 + $0x250] sm:$0xff] }
 0x2a4   : > { %1831 = vmatpush1.bf16.msra.mxu0 %v1609_v30  ;;  %1995 = vmatpush1.bf16.msra.mxu1 %v1611_v31  ;;  %v1371_v30 = vadd.f32 %v1340_v21, %v1321_v20  ;;  %v1648_v31 = vunpack.c.h.s8.bf16 %v1456_v11 }
 0x2a5   : > { %1832 = vmatprep.subr.bf16.mxu0 %v1614_v32  ;;  %1996 = vmatprep.subr.bf16.mxu1 %v1616_v33  ;;  %v1458_v32 = vld [vmem:[%s5704_s21 + $0x208] sm:$0xff]  ;;  %v1460_v33 = vld [vmem:[%s5704_s21 + $0x218] sm:$0xff] }
 0x2a6   : > { %v1656_v48 = vunpack.c.h.s8.bf16 %v1460_v33 }
 0x2a8   : > { %1833 = vmatpush1.bf16.msra.mxu0 %v1613_v36  ;;  %1997 = vmatpush1.bf16.msra.mxu1 %v1615_v38  ;;  %v1379_v36 = vmax.f32 %v1371_v30, 0.0  ;;  %v1650_v38 = vunpack.c.l.s8.bf16 %v1458_v32 }
 0x2a9   : > { %1834 = vmatprep.subr.bf16.mxu0 %v1618_v40  ;;  %1998 = vmatprep.subr.bf16.mxu1 %v1620_v41  ;;  %v1652_v40 = vunpack.c.l.s8.bf16 %v1460_v33  ;;  %v1457_v41 = vld [vmem:[%s5704_s21 + $0x200] sm:$0xff] }
 0x2ac   : > { %1835 = vmatpush1.bf16.msra.mxu0 %v1617_v44  ;;  %1999 = vmatpush1.bf16.msra.mxu1 %v1619_v45  ;;  %v1649_v44 = vunpack.c.l.s8.bf16 %v1457_v41  ;;  %v1651_v45 = vunpack.c.l.s8.bf16 %v1459_v42 }
 0x2ad   : > { %1836 = vmatprep.subr.bf16.mxu0 %v1622_v16  ;;  %2000 = vmatprep.subr.bf16.mxu1 %v1624_v47  ;;  %v1387_v16 = vpack.c.bf16 %v1379_v36, %v1379_v36  ;;  %v1654_v47 = vunpack.c.h.s8.bf16 %v1458_v32  ;;  %v1472_v32 = vld [vmem:[%s5704_s21 + $0x278] sm:$0xff] }
 0x2ae   : > { %v1676_v36 = vunpack.c.l.s8.bf16 %v1472_v32 }
 0x2b0   : > { %1837 = vmatpush1.bf16.msra.mxu0 %v1621_v50  ;;  %2001 = vmatpush1.bf16.msra.mxu1 %v1623_v51  ;;  %v1464_v50 = vld [vmem:[%s5704_s21 + $0x238] sm:$0xff]  ;;  %v1302_v51 = vrot.slane %v5878_v15, %v5947_v43 }
 0x2b1   : > { %1838 = vmatprep.subr.bf16.mxu0 %v1626_v52  ;;  %2002 = vmatprep.subr.bf16.mxu1 %v1628_v54  ;;  %v1653_v52 = vunpack.c.h.s8.bf16 %v1457_v41  ;;  %v1655_v54 = vunpack.c.h.s8.bf16 %v1459_v42 }
 0x2b4   : > { %1839 = vmatpush1.bf16.msra.mxu0 %v1625_v57  ;;  %2003 = vmatpush1.bf16.msra.mxu1 %v1627_v58  ;;  %v1658_v57 = vunpack.c.l.s8.bf16 %v1462_v49  ;;  %v1660_v58 = vunpack.c.l.s8.bf16 %v1464_v50 }
 0x2b5   : > { %1840 = vmatprep.subr.bf16.mxu0 %v1630_v59  ;;  %2004 = vmatprep.subr.bf16.mxu1 %v1632_v60  ;;  %v1461_v59 = vld [vmem:[%s5704_s21 + $0x220] sm:$0xff]  ;;  %v1463_v60 = vld [vmem:[%s5704_s21 + $0x230] sm:$0xff] }
 0x2b6   : > { %v1661_v11 = vunpack.c.h.s8.bf16 %v1461_v59 }
 0x2b8   : > { %1841 = vmatpush1.bf16.msra.mxu0 %v1629_v53  ;;  %2005 = vmatpush1.bf16.msra.mxu1 %v1631_v63 }
 0x2b9   : > { %1842 = vmatprep.subr.bf16.mxu0 %v1634_v1  ;;  %2006 = vmatprep.subr.bf16.mxu1 %v1636_v2  ;;  %v1657_v1 = vunpack.c.l.s8.bf16 %v1461_v59  ;;  %v1659_v2 = vunpack.c.l.s8.bf16 %v1463_v60 }
 0x2bc   : > { %1843 = vmatpush1.bf16.msra.mxu0 %v1633_v5  ;;  %2007 = vmatpush1.bf16.msra.mxu1 %v1635_v6  ;;  %v1664_v5 = vunpack.c.h.s8.bf16 %v1464_v50  ;;  %v1466_v6 = vld [vmem:[%s5704_s21 + $0x248] sm:$0xff] }
 0x2bd   : > { %1844 = vmatprep.subr.bf16.mxu0 %v1638_v8  ;;  %2008 = vmatprep.subr.bf16.mxu1 %v1640_v9  ;;  %v1666_v21 = vunpack.c.l.s8.bf16 %v1466_v6  ;;  %v1670_v30 = vunpack.c.h.s8.bf16 %v1466_v6 }
 0x2c0   : > { %1845 = vmatpush1.bf16.msra.mxu0 %v1637_v12  ;;  %2009 = vmatpush1.bf16.msra.mxu1 %v1639_v19  ;;  %v1663_v12 = vunpack.c.h.s8.bf16 %v1463_v60  ;;  %v1478_v60 = vld [vmem:[%s5704_s21 + $0x2a8] sm:$0xff] }
 0x2c1   : > { %1846 = vmatprep.subr.bf16.mxu0 %v1642_v23  ;;  %2010 = vmatprep.subr.bf16.mxu1 %v1644_v24  ;;  %v1668_v23 = vunpack.c.l.s8.bf16 %v1468_v7  ;;  %v1465_v24 = vld [vmem:[%s5704_s21 + $0x240] sm:$0xff]  ;;  %v1694_v6 = vunpack.c.h.s8.bf16 %v1478_v60 }
 0x2c2   : > { %v1669_v33 = vunpack.c.h.s8.bf16 %v1465_v24 }
 0x2c4   : > { %1847 = vmatpush1.bf16.msra.mxu0 %v1641_v28  ;;  %2011 = vmatpush1.bf16.msra.mxu1 %v1643_v29  ;;  %v1665_v28 = vunpack.c.l.s8.bf16 %v1465_v24  ;;  %v1667_v29 = vunpack.c.l.s8.bf16 %v1467_v26  ;;  %v1481_v24 = vld [vmem:[%s5704_s21 + $0x2c0] sm:$0xff] }
 0x2c5   : > { %1848 = vmatprep.subr.bf16.mxu0 %v1646_v39  ;;  %2012 = vmatprep.subr.bf16.mxu1 %v1648_v31  ;;  %v1672_v39 = vunpack.c.h.s8.bf16 %v1468_v7  ;;  %v1470_v31 = vld [vmem:[%s5704_s21 + $0x268] sm:$0xff] }
 0x2c8   : > { %1849 = vmatpush1.bf16.msra.mxu0 %v1645_v34  ;;  %2013 = vmatpush1.bf16.msra.mxu1 %v1647_v35  ;;  %v1671_v34 = vunpack.c.h.s8.bf16 %v1467_v26  ;;  %v1674_v35 = vunpack.c.l.s8.bf16 %v1470_v31  ;;  %v1483_v26 = vld [vmem:[%s5704_s21 + $0x2d0] sm:$0xff] }
 0x2c9   : > { %1859 = vmatprep.subr.bf16.mxu0 %v1650_v38  ;;  %2023 = vmatprep.subr.bf16.mxu1 %v1652_v40  ;;  %v1469_v38 = vld [vmem:[%s5704_s21 + $0x260] sm:$0xff]  ;;  %v1471_v40 = vld [vmem:[%s5704_s21 + $0x270] sm:$0xff] }
 0x2ca   : > { %v1673_v41 = vunpack.c.l.s8.bf16 %v1469_v38  ;;  %v1675_v42 = vunpack.c.l.s8.bf16 %v1471_v40  ;;  %v1679_v49 = vunpack.c.h.s8.bf16 %v1471_v40 }
 0x2cb   : > { %1851 = vmatmul.mubr.bf16.vlgmr.msra.gmra.mrb[8].mxu0 %v1387_v16  ;;  %2015 = vmatmul.mubr.bf16.vlgmr.msra.gmra.mrb[8].mxu1 %v1387_v16  ;;  %v1474_v16 = vld [vmem:[%s5704_s21 + $0x288] sm:$0xff] }
 0x2cc   : > { %1860 = vmatpush1.bf16.msra.mxu0 %v1649_v44  ;;  %2024 = vmatpush1.bf16.msra.mxu1 %v1651_v45  ;;  %v5953_v55 = vpop.f32.mrb[4].mxu0  ;;  %v1678_v44 = vunpack.c.h.s8.bf16 %v1470_v31  ;;  %v1680_v45 = vunpack.c.h.s8.bf16 %v1472_v32  ;;  %v1682_v50 = vunpack.c.l.s8.bf16 %v1474_v16  ;;  %v1486_v32 = vld [vmem:[%s5704_s21 + $0x2e8] sm:$0xff] }
 0x2cd   : > { %1861 = vmatprep.subr.bf16.mxu0 %v1654_v47  ;;  %2025 = vmatprep.subr.bf16.mxu1 %v1656_v48  ;;  %v1190_v61 = vpop.f32.mrb[5].mxu0  ;;  %v1476_v47 = vld [vmem:[%s5704_s21 + $0x298] sm:$0xff]  ;;  %v1677_v48 = vunpack.c.h.s8.bf16 %v1469_v38 }
 0x2ce   : > { %v1324_v62 = vmul.f32 %v1302_v51, %v1190_v61  ;;  %v1192_v53 = vpop.f32.mrb[6].mxu0  ;;  %v5961_v9 = vpop.f32.mrb[4].mxu1  ;;  %v1684_v51 = vunpack.c.l.s8.bf16 %v1476_v47  ;;  %v1688_v59 = vunpack.c.h.s8.bf16 %v1476_v47  ;;  %v1480_v61 = vld [vmem:[%s5704_s21 + $0x2b8] sm:$0xff] }
 0x2cf   : > { %v1193_v63 = vpop.f32.mrb[7].mxu0  ;;  %v5963_v10 = vpop.f32.mrb[5].mxu1  ;;  %v1696_v7 = vunpack.c.h.s8.bf16 %v1480_v61 }
 0x2d0   : > { %1862 = vmatpush1.bf16.msra.mxu0 %v1653_v52  ;;  %2026 = vmatpush1.bf16.msra.mxu1 %v1655_v54  ;;  %v1374_v3 = vadd.f32 %v1352_v56, %v1324_v62  ;;  %v1274_v20 = vpop.f32.mrb[6].mxu1  ;;  %v1473_v52 = vld [vmem:[%s5704_s21 + $0x280] sm:$0xff]  ;;  %v1475_v54 = vld [vmem:[%s5704_s21 + $0x290] sm:$0xff]  ;;  %v1690_v63 = vunpack.c.l.s8.bf16 %v1478_v60 }
 0x2d1   : > { %1863 = vmatprep.subr.bf16.mxu0 %v1658_v57  ;;  %2027 = vmatprep.subr.bf16.mxu1 %v1660_v58  ;;  %v1275_v27 = vpop.f32.mrb[7].mxu1  ;;  %v1681_v56 = vunpack.c.l.s8.bf16 %v1473_v52  ;;  %v1683_v57 = vunpack.c.l.s8.bf16 %v1475_v54  ;;  %v1686_v58 = vunpack.c.h.s8.bf16 %v1474_v16  ;;  %v1685_v62 = vunpack.c.h.s8.bf16 %v1473_v52  ;;  %v1492_v52 = vld [vmem:[%s5704_s21 + $0x318] sm:$0xff]  ;;  %v1491_v60 = vld [vmem:[%s5704_s21 + $0x310] sm:$0xff] }
 0x2d2   : > { %v1382_v8 = vmax.f32 %v1374_v3, 0.0  ;;  %v1687_v53 = vunpack.c.h.s8.bf16 %v1475_v54  ;;  %v1479_v3 = vld [vmem:[%s5704_s21 + $0x2b0] sm:$0xff]  ;;  %v5982_v20 = vsub.s32 4, %v5872_v13  ;;  %v5987_v27 = vsub.s32 7, %v5872_v13 }
 0x2d4   : > { %1864 = vmatpush1.bf16.msra.mxu0 %v1657_v1  ;;  %2028 = vmatpush1.bf16.msra.mxu1 %v1659_v2  ;;  %v1390_v19 = vpack.c.bf16 %v1382_v8, %v1382_v8  ;;  %v1692_v1 = vunpack.c.l.s8.bf16 %v1480_v61  ;;  %v1477_v2 = vld [vmem:[%s5704_s21 + $0x2a0] sm:$0xff]  ;;  %v1482_v8 = vld [vmem:[%s5704_s21 + $0x2c8] sm:$0xff]  ;;  %v1348_v40 = vrot.slane %v5884_v18, %v5982_v20 }
 0x2d5   : > { %1865 = vmatprep.subr.bf16.mxu0 %v1662_v4  ;;  %2029 = vmatprep.subr.bf16.mxu1 %v1664_v5  ;;  %v1689_v4 = vunpack.c.l.s8.bf16 %v1477_v2  ;;  %v1691_v5 = vunpack.c.l.s8.bf16 %v1479_v3 }
 0x2d6   : > { %1891 = vmatprep.mubr.bf16.mxu0 %v1390_v19  ;;  %2055 = vmatprep.mubr.bf16.mxu1 %v1390_v19  ;;  %v1695_v19 = vunpack.c.h.s8.bf16 %v1479_v3  ;;  %v1494_v3 = vld [vmem:[%s5704_s21 + $0x328] sm:$0xff] }
 0x2d8   : > { %1866 = vmatpush1.bf16.msra.mxu0 %v1661_v11  ;;  %2030 = vmatpush1.bf16.msra.mxu1 %v1663_v12  ;;  %v1484_v11 = vld [vmem:[%s5704_s21 + $0x2d8] sm:$0xff]  ;;  %v1693_v12 = vunpack.c.h.s8.bf16 %v1477_v2  ;;  %v1720_v2 = vunpack.c.h.s8.bf16 %v1492_v52 }
 0x2d9   : > { %1867 = vmatprep.subr.bf16.mxu0 %v1666_v21  ;;  %2031 = vmatprep.subr.bf16.mxu1 %v1668_v23  ;;  %v1698_v21 = vunpack.c.l.s8.bf16 %v1482_v8  ;;  %v1700_v23 = vunpack.c.l.s8.bf16 %v1484_v11  ;;  %v1704_v31 = vunpack.c.h.s8.bf16 %v1484_v11 }
 0x2dc   : > { %1868 = vmatpush1.bf16.msra.mxu0 %v1665_v28  ;;  %2032 = vmatpush1.bf16.msra.mxu1 %v1667_v29  ;;  %v1697_v28 = vunpack.c.l.s8.bf16 %v1481_v24  ;;  %v1699_v29 = vunpack.c.l.s8.bf16 %v1483_v26 }
 0x2dd   : > { %1869 = vmatprep.subr.bf16.mxu0 %v1670_v30  ;;  %2033 = vmatprep.subr.bf16.mxu1 %v1672_v39  ;;  %v1298_v30 = vrot.slane %v5878_v15, %v5982_v20  ;;  %v1702_v39 = vunpack.c.h.s8.bf16 %v1482_v8  ;;  %v1722_v8 = vunpack.c.l.s8.bf16 %v1494_v3 }
 0x2df   : > { %v1323_v38 = vmul.f32 %v1298_v30, %v5953_v55 }
 0x2e0   : > { %1870 = vmatpush1.bf16.msra.mxu0 %v1669_v33  ;;  %2034 = vmatpush1.bf16.msra.mxu1 %v1671_v34  ;;  %v1488_v33 = vld [vmem:[%s5704_s21 + $0x2f8] sm:$0xff]  ;;  %v1310_v34 = vrot.slane %v5878_v15, %v5987_v27  ;;  %v1360_v15 = vrot.slane %v5884_v18, %v5987_v27 }
 0x2e1   : > { %1871 = vmatprep.subr.bf16.mxu0 %v1674_v35  ;;  %2035 = vmatprep.subr.bf16.mxu1 %v1676_v36  ;;  %v1701_v35 = vunpack.c.h.s8.bf16 %v1481_v24  ;;  %v1703_v36 = vunpack.c.h.s8.bf16 %v1483_v26  ;;  %v1726_v24 = vunpack.c.h.s8.bf16 %v1494_v3 }
 0x2e2   : > { %v1326_v16 = vmul.f32 %v1310_v34, %v5963_v10  ;;  %v1499_v34 = vld [vmem:[%s5704_s21 + $0x350] sm:$0xff] }
 0x2e4   : > { %1872 = vmatpush1.bf16.msra.mxu0 %v1673_v41  ;;  %2036 = vmatpush1.bf16.msra.mxu1 %v1675_v42  ;;  %v1706_v41 = vunpack.c.l.s8.bf16 %v1486_v32  ;;  %v1708_v42 = vunpack.c.l.s8.bf16 %v1488_v33  ;;  %v1376_v54 = vadd.f32 %v1360_v15, %v1326_v16 }
 0x2e5   : > { %1873 = vmatprep.subr.bf16.mxu0 %v1678_v44  ;;  %2037 = vmatprep.subr.bf16.mxu1 %v1680_v45  ;;  %v1485_v44 = vld [vmem:[%s5704_s21 + $0x2e0] sm:$0xff]  ;;  %v1487_v45 = vld [vmem:[%s5704_s21 + $0x2f0] sm:$0xff] }
 0x2e6   : > { %v1705_v47 = vunpack.c.l.s8.bf16 %v1485_v44  ;;  %v1707_v55 = vunpack.c.l.s8.bf16 %v1487_v45  ;;  %v1709_v10 = vunpack.c.h.s8.bf16 %v1485_v44  ;;  %v1384_v61 = vmax.f32 %v1376_v54, 0.0  ;;  %v1508_v54 = vld [vmem:[%s5704_s21 + $0x398] sm:$0xff] }
 0x2e8   : > { %1874 = vmatpush1.bf16.msra.mxu0 %v1677_v48  ;;  %2038 = vmatpush1.bf16.msra.mxu1 %v1679_v49  ;;  %v1373_v48 = vadd.f32 %v1348_v40, %v1323_v38  ;;  %v1710_v49 = vunpack.c.h.s8.bf16 %v1486_v32 }
 0x2e9   : > { %1875 = vmatprep.subr.bf16.mxu0 %v1682_v50  ;;  %2039 = vmatprep.subr.bf16.mxu1 %v1684_v51  ;;  %v1712_v50 = vunpack.c.h.s8.bf16 %v1488_v33  ;;  %v1490_v51 = vld [vmem:[%s5704_s21 + $0x308] sm:$0xff]  ;;  %v1497_v33 = vld [vmem:[%s5704_s21 + $0x340] sm:$0xff] }
 0x2ea   : > { %v1714_v18 = vunpack.c.l.s8.bf16 %v1490_v51  ;;  %v1733_v44 = vunpack.c.h.s8.bf16 %v1497_v33 }
 0x2ec   : > { %1876 = vmatpush1.bf16.msra.mxu0 %v1681_v56  ;;  %2040 = vmatpush1.bf16.msra.mxu1 %v1683_v57  ;;  %v1711_v56 = vunpack.c.h.s8.bf16 %v1487_v45  ;;  %v1381_v57 = vmax.f32 %v1373_v48, 0.0  ;;  %v1735_v45 = vunpack.c.h.s8.bf16 %v1499_v34 }
 0x2ed   : > { %1877 = vmatprep.subr.bf16.mxu0 %v1686_v58  ;;  %2041 = vmatprep.subr.bf16.mxu1 %v1688_v59  ;;  %v1716_v58 = vunpack.c.l.s8.bf16 %v1492_v52  ;;  %v1489_v59 = vld [vmem:[%s5704_s21 + $0x300] sm:$0xff]  ;;  %v1506_v52 = vld [vmem:[%s5704_s21 + $0x388] sm:$0xff] }
 0x2f0   : > { %1878 = vmatpush1.bf16.msra.mxu0 %v1685_v62  ;;  %2042 = vmatpush1.bf16.msra.mxu1 %v1687_v53  ;;  %v1713_v62 = vunpack.c.l.s8.bf16 %v1489_v59  ;;  %v1715_v53 = vunpack.c.l.s8.bf16 %v1491_v60 }
 0x2f1   : > { %1879 = vmatprep.subr.bf16.mxu0 %v1690_v63  ;;  %2043 = vmatprep.subr.bf16.mxu1 %v1692_v1  ;;  %v1389_v63 = vpack.c.bf16 %v1381_v57, %v1381_v57  ;;  %v1718_v1 = vunpack.c.h.s8.bf16 %v1490_v51  ;;  %v1746_v57 = vunpack.c.l.s8.bf16 %v1506_v52 }
 0x2f4   : > { %1880 = vmatpush1.bf16.msra.mxu0 %v1689_v4  ;;  %2044 = vmatpush1.bf16.msra.mxu1 %v1691_v5  ;;  %v1496_v4 = vld [vmem:[%s5704_s21 + $0x338] sm:$0xff]  ;;  %v1392_v5 = vpack.c.bf16 %v1384_v61, %v1384_v61 }
 0x2f5   : > { %1881 = vmatprep.subr.bf16.mxu0 %v1694_v6  ;;  %2045 = vmatprep.subr.bf16.mxu1 %v1696_v7  ;;  %v1717_v6 = vunpack.c.h.s8.bf16 %v1489_v59  ;;  %v1719_v7 = vunpack.c.h.s8.bf16 %v1491_v60  ;;  %v1724_v11 = vunpack.c.l.s8.bf16 %v1496_v4  ;;  %v1728_v26 = vunpack.c.h.s8.bf16 %v1496_v4  ;;  %v1507_v59 = vld [vmem:[%s5704_s21 + $0x390] sm:$0xff] }
 0x2f6   : > { %v1747_v61 = vunpack.c.l.s8.bf16 %v1507_v59  ;;  %v1751_v3 = vunpack.c.h.s8.bf16 %v1507_v59  ;;  %v2165_v59 = vld [vmem:[%s5715_s26] sm:$0xff] }
 0x2f8   : > { %1882 = vmatpush1.bf16.msra.mxu0 %v1693_v12  ;;  %2046 = vmatpush1.bf16.msra.mxu1 %v1695_v19  ;;  %v1493_v12 = vld [vmem:[%s5704_s21 + $0x320] sm:$0xff]  ;;  %v1495_v19 = vld [vmem:[%s5704_s21 + $0x330] sm:$0xff] }
 0x2f9   : > { %1883 = vmatprep.subr.bf16.mxu0 %v1698_v21  ;;  %2047 = vmatprep.subr.bf16.mxu1 %v1700_v23  ;;  %v1721_v21 = vunpack.c.l.s8.bf16 %v1493_v12  ;;  %v1723_v23 = vunpack.c.l.s8.bf16 %v1495_v19  ;;  %v1725_v30 = vunpack.c.h.s8.bf16 %v1493_v12 }
 0x2fc   : > { %1884 = vmatpush1.bf16.msra.mxu0 %v1697_v28  ;;  %2048 = vmatpush1.bf16.msra.mxu1 %v1699_v29  ;;  %v1498_v28 = vld [vmem:[%s5704_s21 + $0x348] sm:$0xff]  ;;  %v1500_v29 = vld [vmem:[%s5704_s21 + $0x358] sm:$0xff] }
 0x2fd   : > { %1885 = vmatprep.subr.bf16.mxu0 %v1702_v39  ;;  %2049 = vmatprep.subr.bf16.mxu1 %v1704_v31  ;;  %v1727_v39 = vunpack.c.h.s8.bf16 %v1495_v19  ;;  %v1730_v31 = vunpack.c.l.s8.bf16 %v1498_v28  ;;  %v1732_v32 = vunpack.c.l.s8.bf16 %v1500_v29  ;;  %v1734_v38 = vunpack.c.h.s8.bf16 %v1498_v28 }
 0x2fe   : > { %v1736_v40 = vunpack.c.h.s8.bf16 %v1500_v29  ;;  %v6030_v28 = vsub.s32 6, %v5872_v13 }
 0x300   : > { %1886 = vmatpush1.bf16.msra.mxu0 %v1701_v35  ;;  %2050 = vmatpush1.bf16.msra.mxu1 %v1703_v36  ;;  %v1729_v35 = vunpack.c.l.s8.bf16 %v1497_v33  ;;  %v1731_v36 = vunpack.c.l.s8.bf16 %v1499_v34  ;;  %v4757_v34 = vld [vmem:[%s5693_s15] sm:$0xff] }
 0x301   : > { %1887 = vmatprep.subr.bf16.mxu0 %v1706_v41  ;;  %2051 = vmatprep.subr.bf16.mxu1 %v1708_v42  ;;  %v1502_v41 = vld [vmem:[%s5704_s21 + $0x368] sm:$0xff]  ;;  %v1504_v42 = vld [vmem:[%s5704_s21 + $0x378] sm:$0xff] }
 0x302   : > { %v1738_v16 = vunpack.c.l.s8.bf16 %v1502_v41  ;;  %v1740_v15 = vunpack.c.l.s8.bf16 %v1504_v42  ;;  %v1744_v51 = vunpack.c.h.s8.bf16 %v1504_v42 }
 0x304   : > { %1888 = vmatpush1.bf16.msra.mxu0 %v1705_v47  ;;  %2052 = vmatpush1.bf16.msra.mxu1 %v1707_v55  ;;  %v1501_v47 = vld [vmem:[%s5704_s21 + $0x360] sm:$0xff]  ;;  %v1503_v55 = vld [vmem:[%s5704_s21 + $0x370] sm:$0xff] }
 0x305   : > { %1889 = vmatprep.subr.bf16.mxu0 %v1710_v49  ;;  %2053 = vmatprep.subr.bf16.mxu1 %v1712_v50  ;;  %v1737_v48 = vunpack.c.l.s8.bf16 %v1501_v47  ;;  %v1739_v49 = vunpack.c.l.s8.bf16 %v1503_v55  ;;  %v1742_v50 = vunpack.c.h.s8.bf16 %v1502_v41 }
 0x308   : > { %1890 = vmatpush1.bf16.msra.mxu0 %v1709_v10  ;;  %2054 = vmatpush1.bf16.msra.mxu1 %v1711_v56  ;;  %v1741_v10 = vunpack.c.h.s8.bf16 %v1501_v47  ;;  %v1743_v56 = vunpack.c.h.s8.bf16 %v1503_v55  ;;  %v1517_v55 = vld [vmem:[%s5704_s21 + $0x3e0] sm:$0xff] }
 0x309   : > { %1900 = vmatprep.subr.bf16.mxu0 %v1714_v18  ;;  %2064 = vmatprep.subr.bf16.mxu1 %v1716_v58  ;;  %v1748_v18 = vunpack.c.l.s8.bf16 %v1508_v54  ;;  %v1505_v58 = vld [vmem:[%s5704_s21 + $0x380] sm:$0xff] }
 0x30a   : > { %v1745_v60 = vunpack.c.l.s8.bf16 %v1505_v58 }
 0x30b   : > { %1892 = vmatmul.mubr.bf16.vlgmr.msra.gmra.mrb[8].mxu0 %v1389_v63  ;;  %2056 = vmatmul.mubr.bf16.vlgmr.msra.gmra.mrb[8].mxu1 %v1389_v63  ;;  %v1510_v63 = vld [vmem:[%s5704_s21 + $0x3a8] sm:$0xff] }
 0x30c   : > { %1901 = vmatpush1.bf16.msra.mxu0 %v1713_v62  ;;  %2065 = vmatpush1.bf16.msra.mxu1 %v1715_v53  ;;  %v1750_v62 = vunpack.c.h.s8.bf16 %v1506_v52  ;;  %v1752_v53 = vunpack.c.h.s8.bf16 %v1508_v54  ;;  %v1754_v4 = vunpack.c.l.s8.bf16 %v1510_v63  ;;  %v1758_v12 = vunpack.c.h.s8.bf16 %v1510_v63  ;;  %v2169_v54 = vld [vmem:[%s5715_s26 + $0x20] sm:$0xff] }
 0x30d   : > { %1902 = vmatprep.subr.bf16.mxu0 %v1718_v1  ;;  %2066 = vmatprep.subr.bf16.mxu1 %v1720_v2  ;;  %v1512_v1 = vld [vmem:[%s5704_s21 + $0x3b8] sm:$0xff]  ;;  %v1749_v2 = vunpack.c.h.s8.bf16 %v1505_v58  ;;  %v2189_v58 = vunpack.c.l.s8.bf16 %v2169_v54 }
 0x30e   : > { %1932 = vmatprep.mubr.bf16.mxu0 %v1392_v5  ;;  %2096 = vmatprep.mubr.bf16.mxu1 %v1392_v5  ;;  %v1756_v5 = vunpack.c.l.s8.bf16 %v1512_v1  ;;  %v1760_v19 = vunpack.c.h.s8.bf16 %v1512_v1  ;;  %v2190_v1 = vunpack.c.h.s8.bf16 %v2169_v54 }
 0x310   : > { %1903 = vmatpush1.bf16.msra.mxu0 %v1717_v6  ;;  %2067 = vmatpush1.bf16.msra.mxu1 %v1719_v7  ;;  %v1509_v6 = vld [vmem:[%s5704_s21 + $0x3a0] sm:$0xff]  ;;  %v1511_v7 = vld [vmem:[%s5704_s21 + $0x3b0] sm:$0xff] }
 0x311   : > { %1904 = vmatprep.subr.bf16.mxu0 %v1722_v8  ;;  %2068 = vmatprep.subr.bf16.mxu1 %v1724_v11  ;;  %v1753_v8 = vunpack.c.l.s8.bf16 %v1509_v6  ;;  %v1755_v11 = vunpack.c.l.s8.bf16 %v1511_v7 }
 0x314   : > { %1905 = vmatpush1.bf16.msra.mxu0 %v1721_v21  ;;  %2069 = vmatpush1.bf16.msra.mxu1 %v1723_v23  ;;  %v1514_v21 = vld [vmem:[%s5704_s21 + $0x3c8] sm:$0xff]  ;;  %v1516_v23 = vld [vmem:[%s5704_s21 + $0x3d8] sm:$0xff] }
 0x315   : > { %1906 = vmatprep.subr.bf16.mxu0 %v1726_v24  ;;  %2070 = vmatprep.subr.bf16.mxu1 %v1728_v26  ;;  %v1757_v24 = vunpack.c.h.s8.bf16 %v1509_v6  ;;  %v1759_v26 = vunpack.c.h.s8.bf16 %v1511_v7  ;;  %v1762_v29 = vunpack.c.l.s8.bf16 %v1514_v21  ;;  %v1766_v13 = vunpack.c.h.s8.bf16 %v1514_v21 }
 0x318   : > { %1907 = vmatpush1.bf16.msra.mxu0 %v1725_v30  ;;  %2071 = vmatpush1.bf16.msra.mxu1 %v1727_v39  ;;  %v1764_v30 = vunpack.c.l.s8.bf16 %v1516_v23  ;;  %v1513_v39 = vld [vmem:[%s5704_s21 + $0x3c0] sm:$0xff] }
 0x319   : > { %1908 = vmatprep.subr.bf16.mxu0 %v1730_v31  ;;  %2072 = vmatprep.subr.bf16.mxu1 %v1732_v32  ;;  %v1515_v31 = vld [vmem:[%s5704_s21 + $0x3d0] sm:$0xff]  ;;  %v1761_v32 = vunpack.c.l.s8.bf16 %v1513_v39  ;;  %v1765_v41 = vunpack.c.h.s8.bf16 %v1513_v39 }
 0x31a   : > { %v1763_v33 = vunpack.c.l.s8.bf16 %v1515_v31  ;;  %v1767_v42 = vunpack.c.h.s8.bf16 %v1515_v31 }
 0x31c   : > { %1909 = vmatpush1.bf16.msra.mxu0 %v1729_v35  ;;  %2073 = vmatpush1.bf16.msra.mxu1 %v1731_v36  ;;  %v1306_v35 = vrot.slane %v4757_v34, %v6030_v28  ;;  %v1768_v36 = vunpack.c.h.s8.bf16 %v1516_v23  ;;  %v2175_v34 = vld [vmem:[%s5715_s26 + $0x50] sm:$0xff] }
 0x31d   : > { %1910 = vmatprep.subr.bf16.mxu0 %v1734_v38  ;;  %2074 = vmatprep.subr.bf16.mxu1 %v1736_v40  ;;  %v1518_v38 = vld [vmem:[%s5704_s21 + $0x3e8] sm:$0xff]  ;;  %v1520_v40 = vld [vmem:[%s5704_s21 + $0x3f8] sm:$0xff] }
 0x31e   : > { %v1772_v47 = vunpack.c.l.s8.bf16 %v1520_v40  ;;  %v1776_v52 = vunpack.c.h.s8.bf16 %v1520_v40 }
 0x320   : > { %1911 = vmatpush1.bf16.msra.mxu0 %v1733_v44  ;;  %2075 = vmatpush1.bf16.msra.mxu1 %v1735_v45  ;;  %v1325_v44 = vmul.f32 %v1306_v35, %v5961_v9  ;;  %v4758_v45 = vld [vmem:[%s5696_s11] sm:$0xff]  ;;  %v1774_v9 = vunpack.c.h.s8.bf16 %v1518_v38 }
 0x321   : > { %1912 = vmatprep.subr.bf16.mxu0 %v1738_v16  ;;  %2076 = vmatprep.subr.bf16.mxu1 %v1740_v15  ;;  %v1356_v16 = vrot.slane %v4758_v45, %v6030_v28  ;;  %v1770_v15 = vunpack.c.l.s8.bf16 %v1518_v38  ;;  %v2168_v45 = vld [vmem:[%s5715_s26 + $0x18] sm:$0xff] }
 0x324   : > { %1913 = vmatpush1.bf16.msra.mxu0 %v1737_v48  ;;  %2077 = vmatpush1.bf16.msra.mxu1 %v1739_v49  ;;  %v1519_v48 = vld [vmem:[%s5704_s21 + $0x3f0] sm:$0xff]  ;;  %v1769_v49 = vunpack.c.l.s8.bf16 %v1517_v55 }
 0x325   : > { %1914 = vmatprep.subr.bf16.mxu0 %v1742_v50  ;;  %2078 = vmatprep.subr.bf16.mxu1 %v1744_v51  ;;  %v1771_v50 = vunpack.c.l.s8.bf16 %v1519_v48  ;;  %v1375_v51 = vadd.f32 %v1356_v16, %v1325_v44  ;;  %v2180_v16 = vld [vmem:[%s5715_s26 + $0x78] sm:$0xff] }
 0x328   : > { %1915 = vmatpush1.bf16.msra.mxu0 %v1741_v10  ;;  %2079 = vmatpush1.bf16.msra.mxu1 %v1743_v56  ;;  %v2177_v10 = vld [vmem:[%s5715_s26 + $0x60] sm:$0xff]  ;;  %v1773_v56 = vunpack.c.h.s8.bf16 %v1517_v55  ;;  %v2176_v55 = vld [vmem:[%s5715_s26 + $0x58] sm:$0xff] }
 0x329   : > { %1916 = vmatprep.subr.bf16.mxu0 %v1746_v57  ;;  %2080 = vmatprep.subr.bf16.mxu1 %v1748_v18  ;;  %v1775_v57 = vunpack.c.h.s8.bf16 %v1519_v48  ;;  %v1383_v18 = vmax.f32 %v1375_v51, 0.0  ;;  %v2203_v48 = vunpack.c.l.s8.bf16 %v2176_v55  ;;  %v2212_v51 = vunpack.c.h.s8.bf16 %v2180_v16 }
 0x32b   : > { %v1391_v63 = vpack.c.bf16 %v1383_v18, %v1383_v18  ;;  %v2131_v18 = vld [vmem:[%s5713_s19] sm:$0xf] }
 0x32c   : > { %1917 = vmatpush1.bf16.msra.mxu0 %v1745_v60  ;;  %2081 = vmatpush1.bf16.msra.mxu1 %v1747_v61  ;;  %v2205_v60 = vunpack.c.l.s8.bf16 %v2177_v10  ;;  %v2173_v61 = vld [vmem:[%s5715_s26 + $0x40] sm:$0xff] }
 0x32d   : > { %1918 = vmatprep.subr.bf16.mxu0 %v1750_v62  ;;  %2082 = vmatprep.subr.bf16.mxu1 %v1752_v53  ;;  %v2181_v62 = vunpack.c.l.s8.bf16 %v2165_v59  ;;  %v2197_v53 = vunpack.c.l.s8.bf16 %v2173_v61  ;;  %v2198_v6 = vunpack.c.h.s8.bf16 %v2173_v61 }
 0x330   : > { %1919 = vmatpush1.bf16.msra.mxu0 %v1749_v2  ;;  %2083 = vmatpush1.bf16.msra.mxu1 %v1751_v3  ;;  %v2206_v2 = vunpack.c.h.s8.bf16 %v2177_v10  ;;  %v2170_v3 = vld [vmem:[%s5715_s26 + $0x28] sm:$0xff]  ;;  %v4228_v10 = vld [vmem:[%s5683_s25 + $0x258] sm:$0xff] }
 0x331   : > { %1920 = vmatprep.subr.bf16.mxu0 %v1754_v4  ;;  %2084 = vmatprep.subr.bf16.mxu1 %v1756_v5  ;;  %v2178_v4 = vld [vmem:[%s5715_s26 + $0x68] sm:$0xff]  ;;  %v2182_v5 = vunpack.c.h.s8.bf16 %v2165_v59  ;;  %v2191_v7 = vunpack.c.l.s8.bf16 %v2170_v3  ;;  %v2192_v23 = vunpack.c.h.s8.bf16 %v2170_v3  ;;  %v2148_v3 = vrot.slane %v2131_v18, %v5895_v25 }
 0x334   : > { %1921 = vmatpush1.bf16.msra.mxu0 %v1753_v8  ;;  %2085 = vmatpush1.bf16.msra.mxu1 %v1755_v11  ;;  %v2166_v8 = vld [vmem:[%s5715_s26 + $0x8] sm:$0xff]  ;;  %v2207_v11 = vunpack.c.l.s8.bf16 %v2178_v4 }
 0x335   : > { %1922 = vmatprep.subr.bf16.mxu0 %v1758_v12  ;;  %2086 = vmatprep.subr.bf16.mxu1 %v1760_v19  ;;  %v2174_v12 = vld [vmem:[%s5715_s26 + $0x48] sm:$0xff]  ;;  %v2183_v19 = vunpack.c.l.s8.bf16 %v2166_v8 }
 0x336   : > { %v2199_v21 = vunpack.c.l.s8.bf16 %v2174_v12  ;;  %v2200_v39 = vunpack.c.h.s8.bf16 %v2174_v12 }
 0x338   : > { %1923 = vmatpush1.bf16.msra.mxu0 %v1757_v24  ;;  %2087 = vmatpush1.bf16.msra.mxu1 %v1759_v26  ;;  %v2208_v24 = vunpack.c.h.s8.bf16 %v2178_v4  ;;  %v2171_v26 = vld [vmem:[%s5715_s26 + $0x30] sm:$0xff] }
 0x339   : > { %1924 = vmatprep.subr.bf16.mxu0 %v1762_v29  ;;  %2088 = vmatprep.subr.bf16.mxu1 %v1764_v30  ;;  %v2179_v29 = vld [vmem:[%s5715_s26 + $0x70] sm:$0xff]  ;;  %v2184_v30 = vunpack.c.h.s8.bf16 %v2166_v8  ;;  %v2193_v31 = vunpack.c.l.s8.bf16 %v2171_v26 }
 0x33a   : > { %v2210_v38 = vunpack.c.h.s8.bf16 %v2179_v29 }
 0x33c   : > { %1925 = vmatpush1.bf16.msra.mxu0 %v1761_v32  ;;  %2089 = vmatpush1.bf16.msra.mxu1 %v1763_v33  ;;  %v2167_v32 = vld [vmem:[%s5715_s26 + $0x10] sm:$0xff]  ;;  %v2209_v33 = vunpack.c.l.s8.bf16 %v2179_v29 }
 0x33d   : > { %1926 = vmatprep.subr.bf16.mxu0 %v1766_v13  ;;  %2090 = vmatprep.subr.bf16.mxu1 %v1768_v36  ;;  %v2185_v35 = vunpack.c.l.s8.bf16 %v2167_v32  ;;  %v2201_v13 = vunpack.c.l.s8.bf16 %v2175_v34  ;;  %v2194_v36 = vunpack.c.h.s8.bf16 %v2171_v26  ;;  %v2186_v40 = vunpack.c.h.s8.bf16 %v2167_v32  ;;  %v4225_v32 = vld [vmem:[%s5683_s25 + $0x240] sm:$0xff] }
 0x340   : > { %1927 = vmatpush1.bf16.msra.mxu0 %v1765_v41  ;;  %2091 = vmatpush1.bf16.msra.mxu1 %v1767_v42  ;;  %v2202_v41 = vunpack.c.h.s8.bf16 %v2175_v34  ;;  %v2172_v42 = vld [vmem:[%s5715_s26 + $0x38] sm:$0xff] }
 0x341   : > { %1928 = vmatprep.subr.bf16.mxu0 %v1770_v15  ;;  %2092 = vmatprep.subr.bf16.mxu1 %v1772_v47  ;;  %v2195_v44 = vunpack.c.l.s8.bf16 %v2172_v42  ;;  %v2187_v15 = vunpack.c.l.s8.bf16 %v2168_v45  ;;  %v2211_v47 = vunpack.c.l.s8.bf16 %v2180_v16  ;;  %v4234_v16 = vld [vmem:[%s5683_s25 + $0x288] sm:$0xff] }
 0x344   : > { %1929 = vmatpush1.bf16.msra.mxu0 %v1769_v49  ;;  %2093 = vmatpush1.bf16.msra.mxu1 %v1771_v50  ;;  %v2196_v49 = vunpack.c.h.s8.bf16 %v2172_v42  ;;  %v2188_v50 = vunpack.c.h.s8.bf16 %v2168_v45  ;;  %v2394_v45 = vunpack.c.h.s8.bf16 %v4228_v10 }
 0x345   : > { %1930 = vmatprep.subr.bf16.mxu0 %v1774_v9  ;;  %2094 = vmatprep.subr.bf16.mxu1 %v1776_v52  ;;  %v2204_v9 = vunpack.c.h.s8.bf16 %v2176_v55  ;;  %v4226_v52 = vld [vmem:[%s5683_s25 + $0x248] sm:$0xff] }
 0x346   : > { %v2384_v54 = vunpack.c.l.s8.bf16 %v4226_v52 }
 0x348   : > { %1931 = vmatpush1.bf16.msra.mxu0 %v1773_v56  ;;  %2095 = vmatpush1.bf16.msra.mxu1 %v1775_v57  ;;  %v2386_v56 = vunpack.c.l.s8.bf16 %v4228_v10  ;;  %v2105_v57 = vld [vmem:[%s5706_s23] sm:$0xf] }
 0x349   : > { %4474 = vmatprep.subr.bf16.mxu0 %v2189_v58  ;;  %4496 = vmatprep.subr.bf16.mxu1 %v2205_v60  ;;  %v2110_v58 = vrot.slane %v2105_v57, %v5875_v14  ;;  %v2118_v59 = vrot.slane %v2105_v57, %v5929_v0  ;;  %v2114_v60 = vrot.slane %v2105_v57, %v5881_v17 }
 0x34a   : > { %v2122_v61 = vrot.slane %v2105_v57, %v5895_v25  ;;  %v4244_v57 = vld [vmem:[%s5683_s25 + $0x2d8] sm:$0xff] }
 0x34b   : > { %1933 = vmatmul.mubr.bf16.vlgmr.msra.gmra.mrb[8].mxu0 %v1391_v63  ;;  %2097 = vmatmul.mubr.bf16.vlgmr.msra.gmra.mrb[8].mxu1 %v1391_v63 }
 0x34c   : > { %4475 = vmatpush3.bf16.msra.mxu0 %v2181_v62  ;;  %4497 = vmatpush3.bf16.msra.mxu1 %v2197_v53  ;;  %v2136_v62 = vrot.slane %v2131_v18, %v5875_v14  ;;  %v2144_v53 = vrot.slane %v2131_v18, %v5929_v0 }
 0x34d   : > { %4476 = vmatprep.subr.bf16.mxu0 %v2190_v1  ;;  %4498 = vmatprep.subr.bf16.mxu1 %v2206_v2  ;;  %v2140_v2 = vrot.slane %v2131_v18, %v5881_v17 }
 0x350   : > { %4477 = vmatpush3.bf16.msra.mxu0 %v2182_v5  ;;  %4499 = vmatpush3.bf16.msra.mxu1 %v2198_v6 }
 0x351   : > { %4478 = vmatprep.subr.bf16.mxu0 %v2191_v7  ;;  %4500 = vmatprep.subr.bf16.mxu1 %v2207_v11 }
 0x354   : > { %4479 = vmatpush3.bf16.msra.mxu0 %v2183_v19  ;;  %4501 = vmatpush3.bf16.msra.mxu1 %v2199_v21 }
 0x355   : > { %4480 = vmatprep.subr.bf16.mxu0 %v2192_v23  ;;  %4502 = vmatprep.subr.bf16.mxu1 %v2208_v24 }
 0x358   : > { %4481 = vmatpush3.bf16.msra.mxu0 %v2184_v30  ;;  %4503 = vmatpush3.bf16.msra.mxu1 %v2200_v39 }
 0x359   : > { %4482 = vmatprep.subr.bf16.mxu0 %v2193_v31  ;;  %4504 = vmatprep.subr.bf16.mxu1 %v2209_v33  ;;  %v4227_v33 = vld [vmem:[%s5683_s25 + $0x250] sm:$0xff] }
 0x35a   : > { %v2393_v55 = vunpack.c.h.s8.bf16 %v4227_v33 }
 0x35c   : > { %4483 = vmatpush3.bf16.msra.mxu0 %v2185_v35  ;;  %4505 = vmatpush3.bf16.msra.mxu1 %v2201_v13 }
 0x35d   : > { %4484 = vmatprep.subr.bf16.mxu0 %v2194_v36  ;;  %4506 = vmatprep.subr.bf16.mxu1 %v2210_v38  ;;  %v2383_v38 = vunpack.c.l.s8.bf16 %v4225_v32 }
 0x360   : > { %4485 = vmatpush3.bf16.msra.mxu0 %v2186_v40  ;;  %4507 = vmatpush3.bf16.msra.mxu1 %v2202_v41  ;;  %v2385_v40 = vunpack.c.l.s8.bf16 %v4227_v33 }
 0x361   : > { %4486 = vmatprep.subr.bf16.mxu0 %v2195_v44  ;;  %4508 = vmatprep.subr.bf16.mxu1 %v2211_v47  ;;  %v2392_v44 = vunpack.c.h.s8.bf16 %v4226_v52  ;;  %v2391_v47 = vunpack.c.h.s8.bf16 %v4225_v32  ;;  %v4257_v32 = vld [vmem:[%s5683_s25 + $0x340] sm:$0xff] }
 0x364   : > { %4487 = vmatpush3.bf16.msra.mxu0 %v2187_v15  ;;  %4509 = vmatpush3.bf16.msra.mxu1 %v2203_v48  ;;  %v4236_v15 = vld [vmem:[%s5683_s25 + $0x298] sm:$0xff]  ;;  %v2400_v48 = vunpack.c.l.s8.bf16 %v4234_v16 }
 0x365   : > { %4488 = vmatprep.subr.bf16.mxu0 %v2196_v49  ;;  %4510 = vmatprep.subr.bf16.mxu1 %v2212_v51  ;;  %v4233_v49 = vld [vmem:[%s5683_s25 + $0x280] sm:$0xff]  ;;  %v4235_v51 = vld [vmem:[%s5683_s25 + $0x290] sm:$0xff]  ;;  %v2410_v10 = vunpack.c.h.s8.bf16 %v4236_v15 }
 0x366   : > { %v2401_v52 = vunpack.c.l.s8.bf16 %v4235_v51  ;;  %v2407_v18 = vunpack.c.h.s8.bf16 %v4233_v49 }
 0x368   : > { %4489 = vmatpush3.bf16.msra.mxu0 %v2188_v50  ;;  %4511 = vmatpush3.bf16.msra.mxu1 %v2204_v9  ;;  %v2402_v50 = vunpack.c.l.s8.bf16 %v4236_v15  ;;  %v2399_v9 = vunpack.c.l.s8.bf16 %v4233_v49 }
 0x369   : > { %2527 = vmatprep.subr.bf16.mxu0 %v2384_v54  ;;  %2609 = vmatprep.subr.bf16.mxu1 %v2386_v56  ;;  %v2408_v54 = vunpack.c.h.s8.bf16 %v4234_v16  ;;  %v4242_v56 = vld [vmem:[%s5683_s25 + $0x2c8] sm:$0xff]  ;;  %v4265_v16 = vld [vmem:[%s5683_s25 + $0x380] sm:$0xff] }
 0x41e   : > { %v1934_v63 = vpop.f32.mrb[8].mxu0  ;;  %v2098_v1 = vpop.f32.mrb[8].mxu1 }
 0x41f   : > { %v2127_v4 = vmul.f32 %v2110_v58, %v1934_v63  ;;  %v2129_v5 = vmul.f32 %v2118_v59, %v2098_v1  ;;  %v1936_v6 = vpop.f32.mrb[9].mxu0  ;;  %v2100_v7 = vpop.f32.mrb[9].mxu1  ;;  %v2409_v58 = vunpack.c.h.s8.bf16 %v4235_v51  ;;  %v2416_v59 = vunpack.c.l.s8.bf16 %v4242_v56  ;;  %v4274_v51 = vld [vmem:[%s5683_s25 + $0x3c8] sm:$0xff] }
 0x420   : > { %v2128_v8 = vmul.f32 %v2114_v60, %v1936_v6  ;;  %v2130_v11 = vmul.f32 %v2122_v61, %v2100_v7  ;;  %v1938_v12 = vpop.f32.mrb[10].mxu0  ;;  %v2102_v19 = vpop.f32.mrb[10].mxu1  ;;  %v4241_v60 = vld [vmem:[%s5683_s25 + $0x2c0] sm:$0xff]  ;;  %v2418_v61 = vunpack.c.l.s8.bf16 %v4244_v57  ;;  %v2424_v1 = vunpack.c.h.s8.bf16 %v4242_v56 }
 0x421   : > { %v2153_v21 = vadd.f32 %v2136_v62, %v2127_v4  ;;  %v2155_v23 = vadd.f32 %v2144_v53, %v2129_v5  ;;  %v1939_v24 = vpop.f32.mrb[11].mxu0  ;;  %v2103_v26 = vpop.f32.mrb[11].mxu1  ;;  %v4243_v62 = vld [vmem:[%s5683_s25 + $0x2d0] sm:$0xff]  ;;  %v2415_v53 = vunpack.c.l.s8.bf16 %v4241_v60  ;;  %v4252_v4 = vld [vmem:[%s5683_s25 + $0x318] sm:$0xff]  ;;  %v2423_v5 = vunpack.c.h.s8.bf16 %v4241_v60  ;;  %v4273_v56 = vld [vmem:[%s5683_s25 + $0x3c0] sm:$0xff] }
 0x422   : > { %v2154_v29 = vadd.f32 %v2140_v2, %v2128_v8  ;;  %v2156_v30 = vadd.f32 %v2148_v3, %v2130_v11  ;;  %v2417_v63 = vunpack.c.l.s8.bf16 %v4243_v62  ;;  %v2426_v2 = vunpack.c.h.s8.bf16 %v4244_v57  ;;  %v4250_v3 = vld [vmem:[%s5683_s25 + $0x308] sm:$0xff]  ;;  %v4249_v8 = vld [vmem:[%s5683_s25 + $0x300] sm:$0xff]  ;;  %v4251_v12 = vld [vmem:[%s5683_s25 + $0x310] sm:$0xff] }
 0x423   : > { %v2157_v39 = vmax.f32 %v2153_v21, 0.0  ;;  %v2159_v31 = vmax.f32 %v2155_v23, 0.0  ;;  %v2425_v6 = vunpack.c.h.s8.bf16 %v4243_v62  ;;  %v2432_v7 = vunpack.c.l.s8.bf16 %v4250_v3  ;;  %v4258_v26 = vld [vmem:[%s5683_s25 + $0x348] sm:$0xff] }
 0x424   : > { %v2158_v34 = vmax.f32 %v2154_v29, 0.0  ;;  %v2160_v35 = vmax.f32 %v2156_v30, 0.0  ;;  %v2434_v11 = vunpack.c.l.s8.bf16 %v4252_v4  ;;  %v2431_v19 = vunpack.c.l.s8.bf16 %v4249_v8  ;;  %v4260_v29 = vld [vmem:[%s5683_s25 + $0x358] sm:$0xff]  ;;  %v4282_v62 = vld [vmem:[%s5683_s25 + $0x408] sm:$0xff] }
 0x425   : > { %v2161_v41 = vpack.c.bf16 %v2157_v39, %v2157_v39  ;;  %v2163_v42 = vpack.c.bf16 %v2159_v31, %v2159_v31  ;;  %v2433_v21 = vunpack.c.l.s8.bf16 %v4251_v12  ;;  %v2440_v23 = vunpack.c.h.s8.bf16 %v4250_v3  ;;  %v4281_v3 = vld [vmem:[%s5683_s25 + $0x400] sm:$0xff] }
 0x426   : > { %v2162_v13 = vpack.c.bf16 %v2158_v34, %v2158_v34  ;;  %v2164_v36 = vpack.c.bf16 %v2160_v35, %v2160_v35  ;;  %v2442_v24 = vunpack.c.h.s8.bf16 %v4252_v4  ;;  %v2439_v30 = vunpack.c.h.s8.bf16 %v4249_v8  ;;  %v4259_v34 = vld [vmem:[%s5683_s25 + $0x350] sm:$0xff] }
 0x427   : > { %v2441_v39 = vunpack.c.h.s8.bf16 %v4251_v12  ;;  %v2448_v31 = vunpack.c.l.s8.bf16 %v4258_v26  ;;  %v2450_v33 = vunpack.c.l.s8.bf16 %v4260_v29  ;;  %v2447_v35 = vunpack.c.l.s8.bf16 %v4257_v32  ;;  %v4290_v12 = vld [vmem:[%s5683_s25 + $0x448] sm:$0xff] }
 0x428   : > { %2245 = vmatprep.mubr.bf16.mxu0 %v2162_v13  ;;  %2285 = vmatprep.mubr.bf16.mxu1 %v2164_v36  ;;  %v2449_v13 = vunpack.c.l.s8.bf16 %v4259_v34  ;;  %v2456_v36 = vunpack.c.h.s8.bf16 %v4258_v26  ;;  %v2488_v60 = vunpack.c.h.s8.bf16 %v4274_v51  ;;  %v2504_v8 = vunpack.c.h.s8.bf16 %v4282_v62  ;;  %v4289_v26 = vld [vmem:[%s5683_s25 + $0x440] sm:$0xff] }
 0x429   : > { %2246 = vmatmul.mubr.bf16.vlgmr.msra.gmra.mrb[12].mxu0 %v2161_v41  ;;  %2286 = vmatmul.mubr.bf16.vlgmr.msra.gmra.mrb[12].mxu1 %v2163_v42  ;;  %v4268_v41 = vld [vmem:[%s5683_s25 + $0x398] sm:$0xff]  ;;  %v2455_v42 = vunpack.c.h.s8.bf16 %v4257_v32 }
 0x42a   : > { %2528 = vmatpush1.bf16.msra.mxu0 %v2383_v38  ;;  %2610 = vmatpush1.bf16.msra.mxu1 %v2385_v40  ;;  %v2458_v38 = vunpack.c.h.s8.bf16 %v4260_v29  ;;  %v4266_v40 = vld [vmem:[%s5683_s25 + $0x388] sm:$0xff]  ;;  %v2466_v15 = vunpack.c.l.s8.bf16 %v4268_v41 }
 0x42b   : > { %2529 = vmatprep.subr.bf16.mxu0 %v2392_v44  ;;  %2611 = vmatprep.subr.bf16.mxu1 %v2394_v45  ;;  %v2457_v44 = vunpack.c.h.s8.bf16 %v4259_v34  ;;  %v2464_v45 = vunpack.c.l.s8.bf16 %v4266_v40  ;;  %v2472_v49 = vunpack.c.h.s8.bf16 %v4266_v40 }
 0x42c   : > { %2559 = vmatprep.mubr.bf16.mxu0 %v5744_v22  ;;  %2641 = vmatprep.mubr.bf16.mxu1 %v5744_v22 }
 0x42e   : > { %2530 = vmatpush1.bf16.msra.mxu0 %v2391_v47  ;;  %2612 = vmatpush1.bf16.msra.mxu1 %v2393_v55  ;;  %v4267_v47 = vld [vmem:[%s5683_s25 + $0x390] sm:$0xff]  ;;  %v2463_v55 = vunpack.c.l.s8.bf16 %v4265_v16 }
 0x42f   : > { %2531 = vmatprep.subr.bf16.mxu0 %v2400_v48  ;;  %2613 = vmatprep.subr.bf16.mxu1 %v2402_v50  ;;  %v2465_v48 = vunpack.c.l.s8.bf16 %v4267_v47  ;;  %v2474_v50 = vunpack.c.h.s8.bf16 %v4268_v41  ;;  %v4229_v41 = vld [vmem:[%s5683_s25 + $0x260] sm:$0xff] }
 0x432   : > { %2532 = vmatpush1.bf16.msra.mxu0 %v2399_v9  ;;  %2614 = vmatpush1.bf16.msra.mxu1 %v2401_v52  ;;  %v4276_v9 = vld [vmem:[%s5683_s25 + $0x3d8] sm:$0xff]  ;;  %v2471_v52 = vunpack.c.h.s8.bf16 %v4265_v16 }
 0x433   : > { %2533 = vmatprep.subr.bf16.mxu0 %v2408_v54  ;;  %2615 = vmatprep.subr.bf16.mxu1 %v2410_v10  ;;  %v2473_v54 = vunpack.c.h.s8.bf16 %v4267_v47  ;;  %v2480_v10 = vunpack.c.l.s8.bf16 %v4274_v51  ;;  %v2482_v57 = vunpack.c.l.s8.bf16 %v4276_v9  ;;  %v4238_v47 = vld [vmem:[%s5683_s25 + $0x2a8] sm:$0xff] }
 0x434   : > { %v2404_v51 = vunpack.c.l.s8.bf16 %v4238_v47 }
 0x436   : > { %2534 = vmatpush1.bf16.msra.mxu0 %v2407_v18  ;;  %2616 = vmatpush1.bf16.msra.mxu1 %v2409_v58  ;;  %v4275_v18 = vld [vmem:[%s5683_s25 + $0x3d0] sm:$0xff]  ;;  %v2479_v58 = vunpack.c.l.s8.bf16 %v4273_v56 }
 0x437   : > { %2535 = vmatprep.subr.bf16.mxu0 %v2416_v59  ;;  %2617 = vmatprep.subr.bf16.mxu1 %v2418_v61  ;;  %v2481_v59 = vunpack.c.l.s8.bf16 %v4275_v18  ;;  %v2490_v61 = vunpack.c.h.s8.bf16 %v4276_v9  ;;  %v4237_v9 = vld [vmem:[%s5683_s25 + $0x2a0] sm:$0xff] }
 0x43a   : > { %2536 = vmatpush1.bf16.msra.mxu0 %v2415_v53  ;;  %2618 = vmatpush1.bf16.msra.mxu1 %v2417_v63  ;;  %v4284_v53 = vld [vmem:[%s5683_s25 + $0x418] sm:$0xff]  ;;  %v2487_v63 = vunpack.c.h.s8.bf16 %v4273_v56 }
 0x43b   : > { %2537 = vmatprep.subr.bf16.mxu0 %v2424_v1  ;;  %2619 = vmatprep.subr.bf16.mxu1 %v2426_v2  ;;  %v2489_v1 = vunpack.c.h.s8.bf16 %v4275_v18  ;;  %v2496_v2 = vunpack.c.l.s8.bf16 %v4282_v62  ;;  %v2498_v4 = vunpack.c.l.s8.bf16 %v4284_v53  ;;  %v4245_v62 = vld [vmem:[%s5683_s25 + $0x2e0] sm:$0xff] }
 0x43e   : > { %2538 = vmatpush1.bf16.msra.mxu0 %v2423_v5  ;;  %2620 = vmatpush1.bf16.msra.mxu1 %v2425_v6  ;;  %v4283_v5 = vld [vmem:[%s5683_s25 + $0x410] sm:$0xff]  ;;  %v2495_v6 = vunpack.c.l.s8.bf16 %v4281_v3 }
 0x43f   : > { %2539 = vmatprep.subr.bf16.mxu0 %v2432_v7  ;;  %2621 = vmatprep.subr.bf16.mxu1 %v2434_v11  ;;  %v2497_v7 = vunpack.c.l.s8.bf16 %v4283_v5  ;;  %v2506_v11 = vunpack.c.h.s8.bf16 %v4284_v53 }
 0x442   : > { %2540 = vmatpush1.bf16.msra.mxu0 %v2431_v19  ;;  %2622 = vmatpush1.bf16.msra.mxu1 %v2433_v21  ;;  %v4292_v19 = vld [vmem:[%s5683_s25 + $0x458] sm:$0xff]  ;;  %v2503_v21 = vunpack.c.h.s8.bf16 %v4281_v3 }
 0x443   : > { %2541 = vmatprep.subr.bf16.mxu0 %v2440_v23  ;;  %2623 = vmatprep.subr.bf16.mxu1 %v2442_v24  ;;  %v2505_v23 = vunpack.c.h.s8.bf16 %v4283_v5  ;;  %v2512_v24 = vunpack.c.l.s8.bf16 %v4290_v12  ;;  %v2514_v29 = vunpack.c.l.s8.bf16 %v4292_v19  ;;  %v2522_v34 = vunpack.c.h.s8.bf16 %v4292_v19  ;;  %v4254_v5 = vld [vmem:[%s5683_s25 + $0x328] sm:$0xff] }
 0x446   : > { %2542 = vmatpush1.bf16.msra.mxu0 %v2439_v30  ;;  %2624 = vmatpush1.bf16.msra.mxu1 %v2441_v39  ;;  %v4291_v30 = vld [vmem:[%s5683_s25 + $0x450] sm:$0xff]  ;;  %v2511_v39 = vunpack.c.l.s8.bf16 %v4289_v26 }
 0x447   : > { %2543 = vmatprep.subr.bf16.mxu0 %v2448_v31  ;;  %2625 = vmatprep.subr.bf16.mxu1 %v2450_v33  ;;  %v2520_v31 = vunpack.c.h.s8.bf16 %v4290_v12  ;;  %v2513_v32 = vunpack.c.l.s8.bf16 %v4291_v30  ;;  %v4230_v33 = vld [vmem:[%s5683_s25 + $0x268] sm:$0xff]  ;;  %v4253_v12 = vld [vmem:[%s5683_s25 + $0x320] sm:$0xff] }
 0x448   : > { %v2396_v16 = vunpack.c.h.s8.bf16 %v4230_v33 }
 0x44a   : > { %2544 = vmatpush1.bf16.msra.mxu0 %v2447_v35  ;;  %2626 = vmatpush1.bf16.msra.mxu1 %v2449_v13  ;;  %v4232_v35 = vld [vmem:[%s5683_s25 + $0x278] sm:$0xff]  ;;  %v2519_v13 = vunpack.c.h.s8.bf16 %v4289_v26  ;;  %v2444_v26 = vunpack.c.h.s8.bf16 %v4254_v5 }
 0x44b   : > { %2545 = vmatprep.subr.bf16.mxu0 %v2456_v36  ;;  %2627 = vmatprep.subr.bf16.mxu1 %v2458_v38  ;;  %v2388_v36 = vunpack.c.l.s8.bf16 %v4230_v33  ;;  %v2521_v38 = vunpack.c.h.s8.bf16 %v4291_v30  ;;  %v2390_v40 = vunpack.c.l.s8.bf16 %v4232_v35  ;;  %v4262_v30 = vld [vmem:[%s5683_s25 + $0x368] sm:$0xff] }
 0x44c   : > { %v2452_v33 = vunpack.c.l.s8.bf16 %v4262_v30 }
 0x44e   : > { %2546 = vmatpush1.bf16.msra.mxu0 %v2455_v42  ;;  %2628 = vmatpush1.bf16.msra.mxu1 %v2457_v44  ;;  %v4231_v42 = vld [vmem:[%s5683_s25 + $0x270] sm:$0xff]  ;;  %v2387_v44 = vunpack.c.l.s8.bf16 %v4229_v41 }
 0x44f   : > { %2547 = vmatprep.subr.bf16.mxu0 %v2464_v45  ;;  %2629 = vmatprep.subr.bf16.mxu1 %v2466_v15  ;;  %v2389_v45 = vunpack.c.l.s8.bf16 %v4231_v42  ;;  %v2398_v15 = vunpack.c.h.s8.bf16 %v4232_v35 }
 0x452   : > { %2548 = vmatpush1.bf16.msra.mxu0 %v2463_v55  ;;  %2630 = vmatpush1.bf16.msra.mxu1 %v2465_v48  ;;  %v4240_v55 = vld [vmem:[%s5683_s25 + $0x2b8] sm:$0xff] }
 0x453   : > { %2549 = vmatprep.subr.bf16.mxu0 %v2472_v49  ;;  %2631 = vmatprep.subr.bf16.mxu1 %v2474_v50  ;;  %v6117_v48 = vld [vmem:[#allocation2 + $0x8] ss:$0 sps:$4 sm:$0xff]   ;;  %v2395_v49 = vunpack.c.h.s8.bf16 %v4229_v41  ;;  %v2397_v50 = vunpack.c.h.s8.bf16 %v4231_v42  ;;  %v2414_v18 = vunpack.c.h.s8.bf16 %v4240_v55  ;;  %v4270_v42 = vld [vmem:[%s5683_s25 + $0x3a8] sm:$0xff] }
 0x456   : > { %2550 = vmatpush1.bf16.msra.mxu0 %v2471_v52  ;;  %2632 = vmatpush1.bf16.msra.mxu1 %v2473_v54  ;;  %v2406_v52 = vunpack.c.l.s8.bf16 %v4240_v55  ;;  %v4239_v54 = vld [vmem:[%s5683_s25 + $0x2b0] sm:$0xff] }
 0x457   : > { %2551 = vmatprep.subr.bf16.mxu0 %v2480_v10  ;;  %2633 = vmatprep.subr.bf16.mxu1 %v2482_v57  ;;  %v2403_v10 = vunpack.c.l.s8.bf16 %v4237_v9  ;;  %v2405_v56 = vunpack.c.l.s8.bf16 %v4239_v54  ;;  %v2412_v57 = vunpack.c.h.s8.bf16 %v4238_v47  ;;  %v4269_v47 = vld [vmem:[%s5683_s25 + $0x3a0] sm:$0xff] }
 0x45a   : > { %2552 = vmatpush1.bf16.msra.mxu0 %v2479_v58  ;;  %2634 = vmatpush1.bf16.msra.mxu1 %v2481_v59  ;;  %v4246_v58 = vld [vmem:[%s5683_s25 + $0x2e8] sm:$0xff]  ;;  %v4248_v59 = vld [vmem:[%s5683_s25 + $0x2f8] sm:$0xff] }
 0x45b   : > { %2553 = vmatprep.subr.bf16.mxu0 %v2488_v60  ;;  %2635 = vmatprep.subr.bf16.mxu1 %v2490_v61  ;;  %v2411_v60 = vunpack.c.h.s8.bf16 %v4237_v9  ;;  %v2413_v61 = vunpack.c.h.s8.bf16 %v4239_v54  ;;  %v2422_v53 = vunpack.c.l.s8.bf16 %v4248_v59  ;;  %v2428_v3 = vunpack.c.h.s8.bf16 %v4246_v58  ;;  %v4278_v54 = vld [vmem:[%s5683_s25 + $0x3e8] sm:$0xff] }
 0x45c   : > { %v2476_v9 = vunpack.c.h.s8.bf16 %v4270_v42 }
 0x45e   : > { %2554 = vmatpush1.bf16.msra.mxu0 %v2487_v63  ;;  %2636 = vmatpush1.bf16.msra.mxu1 %v2489_v1  ;;  %v4247_v63 = vld [vmem:[%s5683_s25 + $0x2f0] sm:$0xff]  ;;  %v2419_v1 = vunpack.c.l.s8.bf16 %v4245_v62 }
 0x45f   : > { %2555 = vmatprep.subr.bf16.mxu0 %v2496_v2  ;;  %2637 = vmatprep.subr.bf16.mxu1 %v2498_v4  ;;  %v2421_v2 = vunpack.c.l.s8.bf16 %v4247_v63  ;;  %v2430_v4 = vunpack.c.h.s8.bf16 %v4248_v59 }
 0x462   : > { %2556 = vmatpush1.bf16.msra.mxu0 %v2495_v6  ;;  %2638 = vmatpush1.bf16.msra.mxu1 %v2497_v7  ;;  %v4256_v6 = vld [vmem:[%s5683_s25 + $0x338] sm:$0xff]  ;;  %v2427_v7 = vunpack.c.h.s8.bf16 %v4245_v62  ;;  %v2492_v62 = vunpack.c.h.s8.bf16 %v4278_v54 }
 0x463   : > { %2557 = vmatprep.subr.bf16.mxu0 %v2504_v8  ;;  %2639 = vmatprep.subr.bf16.mxu1 %v2506_v11  ;;  %v2429_v8 = vunpack.c.h.s8.bf16 %v4247_v63  ;;  %v2436_v11 = vunpack.c.l.s8.bf16 %v4254_v5  ;;  %v2438_v19 = vunpack.c.l.s8.bf16 %v4256_v6  ;;  %v4286_v63 = vld [vmem:[%s5683_s25 + $0x428] sm:$0xff]  ;;  %v4285_v5 = vld [vmem:[%s5683_s25 + $0x420] sm:$0xff] }
 0x466   : > { %2558 = vmatpush1.bf16.msra.mxu0 %v2503_v21  ;;  %2640 = vmatpush1.bf16.msra.mxu1 %v2505_v23  ;;  %v4255_v21 = vld [vmem:[%s5683_s25 + $0x330] sm:$0xff]  ;;  %v2435_v23 = vunpack.c.l.s8.bf16 %v4253_v12 }
 0x467   : > { %2568 = vmatprep.subr.bf16.mxu0 %v2512_v24  ;;  %2650 = vmatprep.subr.bf16.mxu1 %v2514_v29  ;;  %v2437_v24 = vunpack.c.l.s8.bf16 %v4255_v21  ;;  %v2446_v29 = vunpack.c.h.s8.bf16 %v4256_v6 }
 0x469   : > { %2560 = vmatmul.mubr.bf16.vlgmr.msra.gmra.mrb[16].mxu0 %v5775_v37  ;;  %2642 = vmatmul.mubr.bf16.vlgmr.msra.gmra.mrb[16].mxu1 %v5775_v37 }
 0x46a   : > { %2569 = vmatpush1.bf16.msra.mxu0 %v2511_v39  ;;  %2600 = vmatprep.mubr.bf16.mxu0 %v5167_v46  ;;  %v4264_v39 = vld [vmem:[%s5683_s25 + $0x378] sm:$0xff] }
 0x46b   : > { %2570 = vmatprep.subr.bf16.mxu0 %v2520_v31  ;;  %2651 = vmatpush1.bf16.msra.mxu1 %v2513_v32  ;;  %v2443_v31 = vunpack.c.h.s8.bf16 %v4253_v12  ;;  %v2445_v32 = vunpack.c.h.s8.bf16 %v4255_v21  ;;  %v2454_v35 = vunpack.c.l.s8.bf16 %v4264_v39  ;;  %v2462_v41 = vunpack.c.h.s8.bf16 %v4264_v39  ;;  %v4294_v21 = vld [vmem:[%s5683_s25 + $0x468] sm:$0xff] }
 0x46c   : > { %2652 = vmatprep.subr.bf16.mxu1 %v2522_v34  ;;  %2682 = vmatprep.mubr.bf16.mxu1 %v5167_v46  ;;  %v4261_v34 = vld [vmem:[%s5683_s25 + $0x360] sm:$0xff]  ;;  %v2508_v12 = vunpack.c.h.s8.bf16 %v4286_v63 }
 0x46e   : > { %2571 = vmatpush1.bf16.msra.mxu0 %v2519_v13  ;;  %v4263_v13 = vld [vmem:[%s5683_s25 + $0x370] sm:$0xff] }
 0x46f   : > { %2691 = vmatprep.subr.bf16.mxu0 %v2388_v36  ;;  %2653 = vmatpush1.bf16.msra.mxu1 %v2521_v38  ;;  %v2451_v36 = vunpack.c.l.s8.bf16 %v4261_v34  ;;  %v2453_v38 = vunpack.c.l.s8.bf16 %v4263_v13 }
 0x470   : > { %2773 = vmatprep.subr.bf16.mxu1 %v2390_v40  ;;  %v2460_v40 = vunpack.c.h.s8.bf16 %v4262_v30  ;;  %v4293_v30 = vld [vmem:[%s5683_s25 + $0x460] sm:$0xff] }
 0x475   : > { %4297 = vmatmul.mubr.msk.bf16.vlgmr.msra.gmra.mrb[16].mxu0 %vm945_vm0, %v6117_v48  ;;  %4298 = vmatmul.mubr.msk.bf16.vlgmr.msra.gmra.mrb[16].mxu1 %vm945_vm0, %v6117_v48 }
 0x476   : > { %2692 = vmatpush1.bf16.msra.mxu0 %v2387_v44  ;;  %2774 = vmatpush1.bf16.msra.mxu1 %v2389_v45  ;;  %v4272_v44 = vld [vmem:[%s5683_s25 + $0x3b8] sm:$0xff]  ;;  %v2459_v45 = vunpack.c.h.s8.bf16 %v4261_v34 }
 0x477   : > { %2693 = vmatprep.subr.bf16.mxu0 %v2396_v16  ;;  %2775 = vmatprep.subr.bf16.mxu1 %v2398_v15  ;;  %v2461_v16 = vunpack.c.h.s8.bf16 %v4263_v13  ;;  %v2468_v15 = vunpack.c.l.s8.bf16 %v4270_v42  ;;  %v2470_v55 = vunpack.c.l.s8.bf16 %v4272_v44  ;;  %v4304_v13 = vld [vmem:[%s5704_s21 + $0x408] sm:$0xff] }
 0x478   : > { %2723 = vmatprep.mubr.bf16.mxu0 %v5744_v22  ;;  %2805 = vmatprep.mubr.bf16.mxu1 %v5744_v22  ;;  %v2420_v22 = vunpack.c.l.s8.bf16 %v4246_v58  ;;  %v4277_v58 = vld [vmem:[%s5683_s25 + $0x3e0] sm:$0xff] }
 0x47a   : > { %2694 = vmatpush1.bf16.msra.mxu0 %v2395_v49  ;;  %2776 = vmatpush1.bf16.msra.mxu1 %v2397_v50  ;;  %v4271_v49 = vld [vmem:[%s5683_s25 + $0x3b0] sm:$0xff]  ;;  %v2467_v50 = vunpack.c.l.s8.bf16 %v4269_v47 }
 0x47b   : > { %2695 = vmatprep.subr.bf16.mxu0 %v2404_v51  ;;  %2777 = vmatprep.subr.bf16.mxu1 %v2406_v52  ;;  %v2469_v51 = vunpack.c.l.s8.bf16 %v4271_v49  ;;  %v2478_v52 = vunpack.c.h.s8.bf16 %v4272_v44  ;;  %v4305_v44 = vld [vmem:[%s5704_s21 + $0x410] sm:$0xff] }
 0x47e   : > { %2696 = vmatpush1.bf16.msra.mxu0 %v2403_v10  ;;  %2778 = vmatpush1.bf16.msra.mxu1 %v2405_v56  ;;  %v4280_v10 = vld [vmem:[%s5683_s25 + $0x3f8] sm:$0xff]  ;;  %v2475_v56 = vunpack.c.h.s8.bf16 %v4269_v47 }
 0x47f   : > { %2697 = vmatprep.subr.bf16.mxu0 %v2412_v57  ;;  %2779 = vmatprep.subr.bf16.mxu1 %v2414_v18  ;;  %v2477_v57 = vunpack.c.h.s8.bf16 %v4271_v49  ;;  %v2484_v18 = vunpack.c.l.s8.bf16 %v4278_v54  ;;  %v2486_v59 = vunpack.c.l.s8.bf16 %v4280_v10  ;;  %v4310_v49 = vld [vmem:[%s5704_s21 + $0x438] sm:$0xff]  ;;  %v4309_v54 = vld [vmem:[%s5704_s21 + $0x430] sm:$0xff] }
 0x482   : > { %2698 = vmatpush1.bf16.msra.mxu0 %v2411_v60  ;;  %2780 = vmatpush1.bf16.msra.mxu1 %v2413_v61  ;;  %v4279_v60 = vld [vmem:[%s5683_s25 + $0x3f0] sm:$0xff]  ;;  %v2483_v61 = vunpack.c.l.s8.bf16 %v4277_v58 }
 0x483   : > { %2699 = vmatprep.subr.bf16.mxu0 %v2420_v22  ;;  %2781 = vmatprep.subr.bf16.mxu1 %v2422_v53  ;;  %v2485_v22 = vunpack.c.l.s8.bf16 %v4279_v60  ;;  %v2494_v53 = vunpack.c.h.s8.bf16 %v4280_v10 }
 0x486   : > { %2700 = vmatpush1.bf16.msra.mxu0 %v2419_v1  ;;  %2782 = vmatpush1.bf16.msra.mxu1 %v2421_v2  ;;  %v4288_v1 = vld [vmem:[%s5683_s25 + $0x438] sm:$0xff]  ;;  %v2491_v2 = vunpack.c.h.s8.bf16 %v4277_v58 }
 0x487   : > { %2701 = vmatprep.subr.bf16.mxu0 %v2428_v3  ;;  %2783 = vmatprep.subr.bf16.mxu1 %v2430_v4  ;;  %v2493_v3 = vunpack.c.h.s8.bf16 %v4279_v60  ;;  %v2500_v4 = vunpack.c.l.s8.bf16 %v4286_v63  ;;  %v2502_v6 = vunpack.c.l.s8.bf16 %v4288_v1  ;;  %v4314_v58 = vld [vmem:[%s5704_s21 + $0x458] sm:$0xff]  ;;  %v3116_v60 = vunpack.c.h.s8.bf16 %v4309_v54 }
 0x48a   : > { %2702 = vmatpush1.bf16.msra.mxu0 %v2427_v7  ;;  %2784 = vmatpush1.bf16.msra.mxu1 %v2429_v8  ;;  %v4287_v7 = vld [vmem:[%s5683_s25 + $0x430] sm:$0xff]  ;;  %v2499_v8 = vunpack.c.l.s8.bf16 %v4285_v5 }
 0x48b   : > { %2703 = vmatprep.subr.bf16.mxu0 %v2436_v11  ;;  %2785 = vmatprep.subr.bf16.mxu1 %v2438_v19  ;;  %v2501_v11 = vunpack.c.l.s8.bf16 %v4287_v7  ;;  %v2510_v19 = vunpack.c.h.s8.bf16 %v4288_v1 }
 0x48e   : > { %2704 = vmatpush1.bf16.msra.mxu0 %v2435_v23  ;;  %2786 = vmatpush1.bf16.msra.mxu1 %v2437_v24  ;;  %v4296_v23 = vld [vmem:[%s5683_s25 + $0x478] sm:$0xff]  ;;  %v2507_v24 = vunpack.c.h.s8.bf16 %v4285_v5 }
 0x48f   : > { %2705 = vmatprep.subr.bf16.mxu0 %v2444_v26  ;;  %2787 = vmatprep.subr.bf16.mxu1 %v2446_v29  ;;  %v2509_v26 = vunpack.c.h.s8.bf16 %v4287_v7  ;;  %v2516_v29 = vunpack.c.l.s8.bf16 %v4294_v21  ;;  %v2518_v39 = vunpack.c.l.s8.bf16 %v4296_v23  ;;  %v4318_v5 = vld [vmem:[%s5704_s21 + $0x478] sm:$0xff] }
 0x492   : > { %2706 = vmatpush1.bf16.msra.mxu0 %v2443_v31  ;;  %2788 = vmatpush1.bf16.msra.mxu1 %v2445_v32  ;;  %v4295_v31 = vld [vmem:[%s5683_s25 + $0x470] sm:$0xff]  ;;  %v2515_v32 = vunpack.c.l.s8.bf16 %v4293_v30  ;;  %s4473_s25 = sshll.u32 %s5443_s5, 8  ;;  %s5168_s5 = smov [#allocation19]  }
 0x493   : > { %2707 = vmatprep.subr.bf16.mxu0 %v2452_v33  ;;  %2789 = vmatprep.subr.bf16.mxu1 %v2454_v35  ;;  %v2524_v33 = vunpack.c.h.s8.bf16 %v4294_v21  ;;  %v2517_v34 = vunpack.c.l.s8.bf16 %v4295_v31  ;;  %v2526_v35 = vunpack.c.h.s8.bf16 %v4296_v23 }
 0x496   : > { %2708 = vmatpush1.bf16.msra.mxu0 %v2451_v36  ;;  %2790 = vmatpush1.bf16.msra.mxu1 %v2453_v38  ;;  %v4306_v36 = vld [vmem:[%s5704_s21 + $0x418] sm:$0xff]  ;;  %v2523_v38 = vunpack.c.h.s8.bf16 %v4293_v30 }
 0x497   : > { %2709 = vmatprep.subr.bf16.mxu0 %v2460_v40  ;;  %2791 = vmatprep.subr.bf16.mxu1 %v2462_v41  ;;  %v2525_v40 = vunpack.c.h.s8.bf16 %v4295_v31  ;;  %v3103_v41 = vunpack.c.l.s8.bf16 %v4304_v13  ;;  %v3105_v42 = vunpack.c.l.s8.bf16 %v4306_v36  ;;  %v3109_v47 = vunpack.c.h.s8.bf16 %v4306_v36  ;;  %v4322_v30 = vld [vmem:[%s5704_s21 + $0x498] sm:$0xff] }
 0x49a   : > { %2710 = vmatpush1.bf16.msra.mxu0 %v2459_v45  ;;  %2792 = vmatpush1.bf16.msra.mxu1 %v2461_v16  ;;  %v3104_v16 = vunpack.c.l.s8.bf16 %v4305_v44 }
 0x49b   : > { %2711 = vmatprep.subr.bf16.mxu0 %v2468_v15  ;;  %2793 = vmatprep.subr.bf16.mxu1 %v2470_v55  ;;  %v3107_v15 = vunpack.c.h.s8.bf16 %v4304_v13  ;;  %v4308_v55 = vld [vmem:[%s5704_s21 + $0x428] sm:$0xff] }
 0x49e   : > { %2712 = vmatpush1.bf16.msra.mxu0 %v2467_v50  ;;  %2794 = vmatpush1.bf16.msra.mxu1 %v2469_v51  ;;  %v3108_v50 = vunpack.c.h.s8.bf16 %v4305_v44  ;;  %v3111_v51 = vunpack.c.l.s8.bf16 %v4308_v55 }
 0x49f   : > { %2713 = vmatprep.subr.bf16.mxu0 %v2476_v9  ;;  %2795 = vmatprep.subr.bf16.mxu1 %v2478_v52  ;;  %v3113_v9 = vunpack.c.l.s8.bf16 %v4310_v49  ;;  %v4307_v52 = vld [vmem:[%s5704_s21 + $0x420] sm:$0xff] }
 0x4a0   : > { %v3110_v10 = vunpack.c.l.s8.bf16 %v4307_v52 }
 0x4a2   : > { %2714 = vmatpush1.bf16.msra.mxu0 %v2475_v56  ;;  %2796 = vmatpush1.bf16.msra.mxu1 %v2477_v57  ;;  %v3112_v56 = vunpack.c.l.s8.bf16 %v4309_v54  ;;  %v3117_v57 = vunpack.c.h.s8.bf16 %v4310_v49 }
 0x4a3   : > { %2715 = vmatprep.subr.bf16.mxu0 %v2484_v18  ;;  %2797 = vmatprep.subr.bf16.mxu1 %v2486_v59  ;;  %v4312_v18 = vld [vmem:[%s5704_s21 + $0x448] sm:$0xff]  ;;  %v3114_v59 = vunpack.c.h.s8.bf16 %v4307_v52 }
 0x4a6   : > { %2716 = vmatpush1.bf16.msra.mxu0 %v2483_v61  ;;  %2798 = vmatpush1.bf16.msra.mxu1 %v2485_v22  ;;  %v3119_v61 = vunpack.c.l.s8.bf16 %v4312_v18  ;;  %v3121_v22 = vunpack.c.l.s8.bf16 %v4314_v58 }
 0x4a7   : > { %2717 = vmatprep.subr.bf16.mxu0 %v2492_v62  ;;  %2799 = vmatprep.subr.bf16.mxu1 %v2494_v53  ;;  %v4311_v62 = vld [vmem:[%s5704_s21 + $0x440] sm:$0xff]  ;;  %v4313_v53 = vld [vmem:[%s5704_s21 + $0x450] sm:$0xff] }
 0x4a8   : > { %v3118_v63 = vunpack.c.l.s8.bf16 %v4311_v62  ;;  %v3120_v1 = vunpack.c.l.s8.bf16 %v4313_v53  ;;  %v3124_v7 = vunpack.c.h.s8.bf16 %v4313_v53 }
 0x4aa   : > { %2718 = vmatpush1.bf16.msra.mxu0 %v2491_v2  ;;  %2800 = vmatpush1.bf16.msra.mxu1 %v2493_v3  ;;  %v3123_v2 = vunpack.c.h.s8.bf16 %v4312_v18  ;;  %v3125_v3 = vunpack.c.h.s8.bf16 %v4314_v58 }
 0x4ab   : > { %2719 = vmatprep.subr.bf16.mxu0 %v2500_v4  ;;  %2801 = vmatprep.subr.bf16.mxu1 %v2502_v6  ;;  %v4316_v4 = vld [vmem:[%s5704_s21 + $0x468] sm:$0xff]  ;;  %v3122_v6 = vunpack.c.h.s8.bf16 %v4311_v62 }
 0x4ae   : > { %2720 = vmatpush1.bf16.msra.mxu0 %v2499_v8  ;;  %2802 = vmatpush1.bf16.msra.mxu1 %v2501_v11  ;;  %v3127_v8 = vunpack.c.l.s8.bf16 %v4316_v4  ;;  %v3129_v11 = vunpack.c.l.s8.bf16 %v4318_v5 }
 0x4af   : > { %2721 = vmatprep.subr.bf16.mxu0 %v2508_v12  ;;  %2803 = vmatprep.subr.bf16.mxu1 %v2510_v19  ;;  %v4315_v12 = vld [vmem:[%s5704_s21 + $0x460] sm:$0xff]  ;;  %v4317_v19 = vld [vmem:[%s5704_s21 + $0x470] sm:$0xff] }
 0x4b0   : > { %v3126_v21 = vunpack.c.l.s8.bf16 %v4315_v12  ;;  %v3128_v23 = vunpack.c.l.s8.bf16 %v4317_v19  ;;  %v3132_v31 = vunpack.c.h.s8.bf16 %v4317_v19 }
 0x4b2   : > { %2722 = vmatpush1.bf16.msra.mxu0 %v2507_v24  ;;  %2804 = vmatpush1.bf16.msra.mxu1 %v2509_v26  ;;  %v3131_v24 = vunpack.c.h.s8.bf16 %v4316_v4  ;;  %v3133_v26 = vunpack.c.h.s8.bf16 %v4318_v5 }
 0x4b3   : > { %2732 = vmatprep.subr.bf16.mxu0 %v2516_v29  ;;  %2814 = vmatprep.subr.bf16.mxu1 %v2518_v39  ;;  %v4320_v29 = vld [vmem:[%s5704_s21 + $0x488] sm:$0xff]  ;;  %v3130_v39 = vunpack.c.h.s8.bf16 %v4315_v12 }
 0x4b5   : > { %2724 = vmatmul.mubr.bf16.vlgmr.msra.gmra.mrb[20].mxu0 %v5775_v37  ;;  %2806 = vmatmul.mubr.bf16.vlgmr.msra.gmra.mrb[20].mxu1 %v5775_v37  ;;  %v4303_v37 = vld [vmem:[%s5704_s21 + $0x400] sm:$0xff] }
 0x4b6   : > { %2733 = vmatpush1.bf16.msra.mxu0 %v2515_v32  ;;  %2764 = vmatprep.mubr.bf16.mxu0 %v5167_v46  ;;  %v3102_v45 = vunpack.c.l.s8.bf16 %v4303_v37  ;;  %v3135_v32 = vunpack.c.l.s8.bf16 %v4320_v29 }
 0x4b7   : > { %2734 = vmatprep.subr.bf16.mxu0 %v2524_v33  ;;  %2815 = vmatpush1.bf16.msra.mxu1 %v2517_v34  ;;  %v3137_v33 = vunpack.c.l.s8.bf16 %v4322_v30  ;;  %v4319_v34 = vld [vmem:[%s5704_s21 + $0x480] sm:$0xff] }
 0x4b8   : > { %2816 = vmatprep.subr.bf16.mxu1 %v2526_v35  ;;  %2846 = vmatprep.mubr.bf16.mxu1 %v5167_v46  ;;  %v3106_v46 = vunpack.c.h.s8.bf16 %v4303_v37  ;;  %v4321_v35 = vld [vmem:[%s5704_s21 + $0x490] sm:$0xff]  ;;  %v3134_v13 = vunpack.c.l.s8.bf16 %v4319_v34  ;;  %v3138_v37 = vunpack.c.h.s8.bf16 %v4319_v34  ;;  %v4223_v34 = vld [vmem:[%s5722_s9] ss:$0 sm:$0xff] }
 0x4b9   : > { %v3136_v36 = vunpack.c.l.s8.bf16 %v4321_v35  ;;  %v3140_v44 = vunpack.c.h.s8.bf16 %v4321_v35 }
 0x4ba   : > { %2735 = vmatpush1.bf16.msra.mxu0 %v2523_v38  ;;  %v3139_v38 = vunpack.c.h.s8.bf16 %v4320_v29 }
 0x4bb   : > { %2817 = vmatpush1.bf16.msra.mxu1 %v2525_v40  ;;  %3358 = vmatprep.subr.bf16.mxu0 %v3103_v41  ;;  %v3141_v40 = vunpack.c.h.s8.bf16 %v4322_v30  ;;  %v4324_v41 = vld [vmem:[%s5704_s21 + $0x4a8] sm:$0xff] }
 0x4bc   : > { %3522 = vmatprep.subr.bf16.mxu1 %v3105_v42  ;;  %v4326_v42 = vld [vmem:[%s5704_s21 + $0x4b8] sm:$0xff] }
 0x4c1   : > { %4299 = vmatmul.mubr.msk.bf16.vlgmr.msra.gmra.mrb[20].mxu0 %vm945_vm0, %v6117_v48  ;;  %4300 = vmatmul.mubr.msk.bf16.vlgmr.msra.gmra.mrb[20].mxu1 %vm945_vm0, %v6117_v48  ;;  %v3115_v48 = vunpack.c.h.s8.bf16 %v4308_v55 }
 0x4c2   : > { %3359 = vmatpush1.bf16.msra.mxu0 %v3102_v45  ;;  %3523 = vmatpush1.bf16.msra.mxu1 %v3104_v16  ;;  %v3143_v45 = vunpack.c.l.s8.bf16 %v4324_v41  ;;  %v3145_v16 = vunpack.c.l.s8.bf16 %v4326_v42 }
 0x4c3   : > { %3360 = vmatprep.subr.bf16.mxu0 %v3107_v15  ;;  %3524 = vmatprep.subr.bf16.mxu1 %v3109_v47  ;;  %v4323_v15 = vld [vmem:[%s5704_s21 + $0x4a0] sm:$0xff]  ;;  %v4325_v47 = vld [vmem:[%s5704_s21 + $0x4b0] sm:$0xff] }
 0x4c4   : > { %v3142_v55 = vunpack.c.l.s8.bf16 %v4323_v15  ;;  %v3144_v49 = vunpack.c.l.s8.bf16 %v4325_v47  ;;  %v3146_v52 = vunpack.c.h.s8.bf16 %v4323_v15  ;;  %v3148_v54 = vunpack.c.h.s8.bf16 %v4325_v47 }
 0x4c6   : > { %3361 = vmatpush1.bf16.msra.mxu0 %v3106_v46  ;;  %3525 = vmatpush1.bf16.msra.mxu1 %v3108_v50  ;;  %v3147_v46 = vunpack.c.h.s8.bf16 %v4324_v41  ;;  %v3149_v50 = vunpack.c.h.s8.bf16 %v4326_v42  ;;  %v6210_v42 = vld [vmem:[%s5693_s15 + $0x8] sm:$0xff] }
 0x4c7   : > { %3362 = vmatprep.subr.bf16.mxu0 %v3111_v51  ;;  %3526 = vmatprep.subr.bf16.mxu1 %v3113_v9  ;;  %v4328_v51 = vld [vmem:[%s5704_s21 + $0x4c8] sm:$0xff]  ;;  %v4330_v9 = vld [vmem:[%s5704_s21 + $0x4d8] sm:$0xff] }
 0x4ca   : > { %3363 = vmatpush1.bf16.msra.mxu0 %v3110_v10  ;;  %3527 = vmatpush1.bf16.msra.mxu1 %v3112_v56  ;;  %v3151_v10 = vunpack.c.l.s8.bf16 %v4328_v51  ;;  %v3153_v56 = vunpack.c.l.s8.bf16 %v4330_v9 }
 0x4cb   : > { %3364 = vmatprep.subr.bf16.mxu0 %v3115_v48  ;;  %3528 = vmatprep.subr.bf16.mxu1 %v3117_v57  ;;  %v4327_v48 = vld [vmem:[%s5704_s21 + $0x4c0] sm:$0xff]  ;;  %v4329_v57 = vld [vmem:[%s5704_s21 + $0x4d0] sm:$0xff] }
 0x4cc   : > { %v3150_v18 = vunpack.c.l.s8.bf16 %v4327_v48  ;;  %v3152_v58 = vunpack.c.l.s8.bf16 %v4329_v57  ;;  %v3154_v62 = vunpack.c.h.s8.bf16 %v4327_v48  ;;  %v3156_v53 = vunpack.c.h.s8.bf16 %v4329_v57 }
 0x4ce   : > { %3365 = vmatpush1.bf16.msra.mxu0 %v3114_v59  ;;  %3529 = vmatpush1.bf16.msra.mxu1 %v3116_v60  ;;  %v3155_v59 = vunpack.c.h.s8.bf16 %v4328_v51  ;;  %v3157_v60 = vunpack.c.h.s8.bf16 %v4330_v9 }
 0x4cf   : > { %3366 = vmatprep.subr.bf16.mxu0 %v3119_v61  ;;  %3530 = vmatprep.subr.bf16.mxu1 %v3121_v22  ;;  %v4332_v61 = vld [vmem:[%s5704_s21 + $0x4e8] sm:$0xff]  ;;  %v4334_v22 = vld [vmem:[%s5704_s21 + $0x4f8] sm:$0xff] }
 0x4d2   : > { %3367 = vmatpush1.bf16.msra.mxu0 %v3118_v63  ;;  %3531 = vmatpush1.bf16.msra.mxu1 %v3120_v1  ;;  %v3159_v63 = vunpack.c.l.s8.bf16 %v4332_v61  ;;  %v3161_v1 = vunpack.c.l.s8.bf16 %v4334_v22 }
 0x4d3   : > { %3368 = vmatprep.subr.bf16.mxu0 %v3123_v2  ;;  %3532 = vmatprep.subr.bf16.mxu1 %v3125_v3  ;;  %v4331_v2 = vld [vmem:[%s5704_s21 + $0x4e0] sm:$0xff]  ;;  %v4333_v3 = vld [vmem:[%s5704_s21 + $0x4f0] sm:$0xff] }
 0x4d4   : > { %v3158_v4 = vunpack.c.l.s8.bf16 %v4331_v2  ;;  %v3160_v5 = vunpack.c.l.s8.bf16 %v4333_v3  ;;  %v3162_v12 = vunpack.c.h.s8.bf16 %v4331_v2  ;;  %v3164_v19 = vunpack.c.h.s8.bf16 %v4333_v3 }
 0x4d6   : > { %3369 = vmatpush1.bf16.msra.mxu0 %v3122_v6  ;;  %3533 = vmatpush1.bf16.msra.mxu1 %v3124_v7  ;;  %v3163_v6 = vunpack.c.h.s8.bf16 %v4332_v61  ;;  %v3165_v7 = vunpack.c.h.s8.bf16 %v4334_v22  ;;  %v4335_v61 = vld [vmem:[%s5704_s21 + $0x500] sm:$0xff]  ;;  %v4337_v22 = vld [vmem:[%s5704_s21 + $0x510] sm:$0xff] }
 0x4d7   : > { %3370 = vmatprep.subr.bf16.mxu0 %v3127_v8  ;;  %3534 = vmatprep.subr.bf16.mxu1 %v3129_v11  ;;  %v6196_v8 = vld [vmem:[%s5704_s21 + $0x508] sm:$0xff]  ;;  %v6199_v11 = vld [vmem:[%s5704_s21 + $0x518] sm:$0xff]  ;;  %v3168_v2 = vunpack.c.l.s8.bf16 %v4337_v22 }
 0x4da   : > { %3371 = vmatpush1.bf16.msra.mxu0 %v3126_v21  ;;  %3535 = vmatpush1.bf16.msra.mxu1 %v3128_v23  ;;  %v3167_v21 = vunpack.c.l.s8.bf16 %v6196_v8  ;;  %v3169_v23 = vunpack.c.l.s8.bf16 %v6199_v11 }
 0x4db   : > { %3372 = vmatprep.subr.bf16.mxu0 %v3131_v24  ;;  %3536 = vmatprep.subr.bf16.mxu1 %v3133_v26 }
 0x4de   : > { %3373 = vmatpush1.bf16.msra.mxu0 %v3130_v39  ;;  %3537 = vmatpush1.bf16.msra.mxu1 %v3132_v31 }
 0x4df   : > { %3374 = vmatprep.subr.bf16.mxu0 %v3135_v32  ;;  %3538 = vmatprep.subr.bf16.mxu1 %v3137_v33 }
 0x4e2   : > { %3375 = vmatpush1.bf16.msra.mxu0 %v3134_v13  ;;  %3539 = vmatpush1.bf16.msra.mxu1 %v3136_v36 }
 0x4e3   : > { %3376 = vmatprep.subr.bf16.mxu0 %v3139_v38  ;;  %3540 = vmatprep.subr.bf16.mxu1 %v3141_v40  ;;  %v4224_v38 = vld [vmem:[%s5725_s1] ss:$0 sm:$0xff] }
 0x4e6   : > { %3377 = vmatpush1.bf16.msra.mxu0 %v3138_v37  ;;  %3541 = vmatpush1.bf16.msra.mxu1 %v3140_v44  ;;  %v6213_v37 = vld [vmem:[%s5696_s11 + $0x8] sm:$0xff]  ;;  %v2861_v44 = vrot.slane %v6210_v42, %v5875_v14 }
 0x4e7   : > { %3378 = vmatprep.subr.bf16.mxu0 %v3143_v45  ;;  %3542 = vmatprep.subr.bf16.mxu1 %v3145_v16  ;;  %v2865_v45 = vrot.slane %v6210_v42, %v5881_v17  ;;  %v2873_v16 = vrot.slane %v6210_v42, %v5895_v25  ;;  %v2912_v15 = vrot.slane %v6213_v37, %v5875_v14 }
 0x4ea   : > { %3379 = vmatpush1.bf16.msra.mxu0 %v3142_v55  ;;  %3543 = vmatpush1.bf16.msra.mxu1 %v3144_v49  ;;  %v2916_v55 = vrot.slane %v6213_v37, %v5881_v17 }
 0x4eb   : > { %3380 = vmatprep.subr.bf16.mxu0 %v3147_v46  ;;  %3544 = vmatprep.subr.bf16.mxu1 %v3149_v50  ;;  %v2924_v46 = vrot.slane %v6213_v37, %v5895_v25 }
 0x4ee   : > { %3381 = vmatpush1.bf16.msra.mxu0 %v3146_v52  ;;  %3545 = vmatpush1.bf16.msra.mxu1 %v3148_v54 }
 0x4ef   : > { %3382 = vmatprep.subr.bf16.mxu0 %v3151_v10  ;;  %3546 = vmatprep.subr.bf16.mxu1 %v3153_v56 }
 0x4f2   : > { %3383 = vmatpush1.bf16.msra.mxu0 %v3150_v18  ;;  %3547 = vmatpush1.bf16.msra.mxu1 %v3152_v58 }
 0x4f3   : > { %3384 = vmatprep.subr.bf16.mxu0 %v3155_v59  ;;  %3548 = vmatprep.subr.bf16.mxu1 %v3157_v60 }
 0x4f6   : > { %3385 = vmatpush1.bf16.msra.mxu0 %v3154_v62  ;;  %3549 = vmatpush1.bf16.msra.mxu1 %v3156_v53 }
 0x4f7   : > { %3386 = vmatprep.subr.bf16.mxu0 %v3159_v63  ;;  %3550 = vmatprep.subr.bf16.mxu1 %v3161_v1  ;;  %v3166_v1 = vunpack.c.l.s8.bf16 %v4335_v61 }
 0x4fa   : > { %3387 = vmatpush1.bf16.msra.mxu0 %v3158_v4  ;;  %3551 = vmatpush1.bf16.msra.mxu1 %v3160_v5  ;;  %v3171_v4 = vunpack.c.h.s8.bf16 %v6196_v8  ;;  %v3173_v5 = vunpack.c.h.s8.bf16 %v6199_v11  ;;  %v4339_v11 = vld [vmem:[%s5704_s21 + $0x520] sm:$0xff] }
 0x4fb   : > { %3388 = vmatprep.subr.bf16.mxu0 %v3163_v6  ;;  %3552 = vmatprep.subr.bf16.mxu1 %v3165_v7  ;;  %v4340_v6 = vld [vmem:[%s5704_s21 + $0x528] sm:$0xff]  ;;  %v4342_v7 = vld [vmem:[%s5704_s21 + $0x538] sm:$0xff] }
 0x4fc   : > { %v4490_v24 = vpop.f32.mrb[12].mxu0  ;;  %v4512_v26 = vpop.f32.mrb[12].mxu1  ;;  %v3175_v8 = vunpack.c.l.s8.bf16 %v4340_v6 }
 0x4fd   : > { %v4491_v29 = vpop.f32.mrb[13].mxu0  ;;  %v4513_v30 = vpop.f32.mrb[13].mxu1 }
 0x4fe   : > { %v4492_v39 = vadd.f32 %v4491_v29, %v4490_v24  ;;  %v4514_v31 = vadd.f32 %v4513_v30, %v4512_v26  ;;  %v4493_v32 = vpop.f32.mrb[14].mxu0  ;;  %v4515_v33 = vpop.f32.mrb[14].mxu1  ;;  %3389 = vmatpush1.bf16.msra.mxu0 %v3162_v12  ;;  %3553 = vmatpush1.bf16.msra.mxu1 %v3164_v19  ;;  %v3170_v19 = vunpack.c.h.s8.bf16 %v4335_v61  ;;  %v4341_v24 = vld [vmem:[%s5704_s21 + $0x530] sm:$0xff]  ;;  %v3174_v26 = vunpack.c.l.s8.bf16 %v4339_v11  ;;  %v4351_v61 = vld [vmem:[%s5704_s21 + $0x580] sm:$0xff] }
 0x4ff   : > { %v4494_v35 = vpop.f32.mrb[15].mxu0  ;;  %v4516_v13 = vpop.f32.mrb[15].mxu1  ;;  %3399 = vmatprep.subr.bf16.mxu0 %v3167_v21  ;;  %3563 = vmatprep.subr.bf16.mxu1 %v3169_v23  ;;  %v3172_v21 = vunpack.c.h.s8.bf16 %v4337_v22  ;;  %v3177_v23 = vunpack.c.l.s8.bf16 %v4342_v7  ;;  %v3176_v29 = vunpack.c.l.s8.bf16 %v4341_v24  ;;  %v3179_v30 = vunpack.c.h.s8.bf16 %v4340_v6  ;;  %v4346_v32 = vld [vmem:[%s5704_s21 + $0x558] sm:$0xff]  ;;  %v4353_v22 = vld [vmem:[%s5704_s21 + $0x590] sm:$0xff] }
 0x500   : > { %v2288_v36 = vadd.f32 %v4514_v31, %v4492_v39  ;;  %v3181_v39 = vunpack.c.h.s8.bf16 %v4342_v7  ;;  %v4344_v31 = vld [vmem:[%s5704_s21 + $0x548] sm:$0xff]  ;;  %v3178_v33 = vunpack.c.h.s8.bf16 %v4339_v11  ;;  %v3185_v13 = vunpack.c.l.s8.bf16 %v4346_v32 }
 0x501   : > { %v3183_v35 = vunpack.c.l.s8.bf16 %v4344_v31 }
 0x502   : > { %v2300_v40 = vmul.f32 %v4223_v34, %v2288_v36  ;;  %v3180_v34 = vunpack.c.h.s8.bf16 %v4341_v24  ;;  %v4343_v36 = vld [vmem:[%s5704_s21 + $0x540] sm:$0xff]  ;;  %v4360_v24 = vld [vmem:[%s5704_s21 + $0x5c8] sm:$0xff] }
 0x504   : > { %v2308_v41 = vadd.f32 %v4224_v38, %v2300_v40  ;;  %v4345_v38 = vld [vmem:[%s5704_s21 + $0x550] sm:$0xff]  ;;  %v3182_v40 = vunpack.c.l.s8.bf16 %v4343_v36 }
 0x506   : > { %2309 = vst [vmem:[%s6206_s10] sm:$0xff] %v2308_v41  ;;  %v3184_v41 = vunpack.c.l.s8.bf16 %v4345_v38 }
 0x548   : > { %v2602_v47 = vpop.f32.mrb[16].mxu0  ;;  %v6225_v49 = vpop.f32.mrb[16].mxu1 }
 0x549   : > { %v2898_v50 = vmul.f32 %v2861_v44, %v2602_v47  ;;  %v2604_v51 = vpop.f32.mrb[17].mxu0  ;;  %v2686_v9 = vpop.f32.mrb[17].mxu1  ;;  %v3187_v44 = vunpack.c.h.s8.bf16 %v4344_v31  ;;  %v3186_v47 = vunpack.c.h.s8.bf16 %v4343_v36  ;;  %v3219_v36 = vunpack.c.h.s8.bf16 %v4360_v24 }
 0x54a   : > { %v2899_v52 = vmul.f32 %v2865_v45, %v2604_v51  ;;  %v2606_v54 = vpop.f32.mrb[18].mxu0  ;;  %v2901_v10 = vmul.f32 %v2873_v16, %v2686_v9  ;;  %v2688_v56 = vpop.f32.mrb[18].mxu1  ;;  %v3189_v45 = vunpack.c.h.s8.bf16 %v4346_v32  ;;  %v4348_v16 = vld [vmem:[%s5704_s21 + $0x568] sm:$0xff]  ;;  %v4347_v51 = vld [vmem:[%s5704_s21 + $0x560] sm:$0xff]  ;;  %v4349_v9 = vld [vmem:[%s5704_s21 + $0x570] sm:$0xff] }
 0x54b   : > { %v2949_v48 = vadd.f32 %v2912_v15, %v2898_v50  ;;  %v2607_v57 = vpop.f32.mrb[19].mxu0  ;;  %v2689_v18 = vpop.f32.mrb[19].mxu1  ;;  %v4350_v15 = vld [vmem:[%s5704_s21 + $0x578] sm:$0xff]  ;;  %v3192_v54 = vunpack.c.l.s8.bf16 %v4349_v9  ;;  %v4359_v32 = vld [vmem:[%s5704_s21 + $0x5c0] sm:$0xff] }
 0x54c   : > { %v2950_v58 = vadd.f32 %v2916_v55, %v2899_v52  ;;  %v2952_v59 = vadd.f32 %v2924_v46, %v2901_v10  ;;  %v3188_v55 = vunpack.c.h.s8.bf16 %v4345_v38  ;;  %v3191_v46 = vunpack.c.l.s8.bf16 %v4348_v16  ;;  %v4354_v57 = vld [vmem:[%s5704_s21 + $0x598] sm:$0xff] }
 0x54d   : > { %v2957_v60 = vmax.f32 %v2949_v48, 0.0  ;;  %v3193_v50 = vunpack.c.l.s8.bf16 %v4350_v15  ;;  %v3190_v52 = vunpack.c.l.s8.bf16 %v4347_v51  ;;  %v3195_v10 = vunpack.c.h.s8.bf16 %v4348_v16  ;;  %v4352_v48 = vld [vmem:[%s5704_s21 + $0x588] sm:$0xff] }
 0x54e   : > { %v2958_v62 = vmax.f32 %v2950_v58, 0.0  ;;  %v2960_v53 = vmax.f32 %v2952_v59, 0.0  ;;  %v3197_v56 = vunpack.c.h.s8.bf16 %v4350_v15  ;;  %v3194_v18 = vunpack.c.h.s8.bf16 %v4347_v51 }
 0x54f   : > { %v2965_v3 = vpack.c.bf16 %v2957_v60, %v2957_v60  ;;  %v3196_v58 = vunpack.c.h.s8.bf16 %v4349_v9  ;;  %v3199_v59 = vunpack.c.l.s8.bf16 %v4352_v48  ;;  %v3201_v60 = vunpack.c.l.s8.bf16 %v4354_v57 }
 0x550   : > { %v2966_v63 = vpack.c.bf16 %v2958_v62, %v2958_v62  ;;  %v2968_v12 = vpack.c.bf16 %v2960_v53, %v2960_v53  ;;  %v3198_v62 = vunpack.c.l.s8.bf16 %v4351_v61  ;;  %v3200_v53 = vunpack.c.l.s8.bf16 %v4353_v22 }
 0x551   : > { %v2920_v15 = vrot.slane %v6213_v37, %v5929_v0 }
 0x552   : > { %3390 = vmatprep.mubr.bf16.mxu0 %v2966_v63  ;;  %3554 = vmatprep.mubr.bf16.mxu1 %v2966_v63  ;;  %v3203_v63 = vunpack.c.h.s8.bf16 %v4352_v48 }
 0x553   : > { %3391 = vmatmul.mubr.bf16.vlgmr.msra.gmra.mrb[24].mxu0 %v2965_v3  ;;  %3555 = vmatmul.mubr.bf16.vlgmr.msra.gmra.mrb[24].mxu1 %v2965_v3  ;;  %v4358_v3 = vld [vmem:[%s5704_s21 + $0x5b8] sm:$0xff] }
 0x554   : > { %3400 = vmatpush1.bf16.msra.mxu0 %v3166_v1  ;;  %3564 = vmatpush1.bf16.msra.mxu1 %v3168_v2  ;;  %v3205_v1 = vunpack.c.h.s8.bf16 %v4354_v57  ;;  %v4356_v2 = vld [vmem:[%s5704_s21 + $0x5a8] sm:$0xff]  ;;  %v3209_v7 = vunpack.c.l.s8.bf16 %v4358_v3  ;;  %v3213_v11 = vunpack.c.h.s8.bf16 %v4358_v3  ;;  %v4374_v3 = vld [vmem:[%s5704_s21 + $0x638] sm:$0xff] }
 0x555   : > { %3401 = vmatprep.subr.bf16.mxu0 %v3171_v4  ;;  %3565 = vmatprep.subr.bf16.mxu1 %v3173_v5  ;;  %v3202_v4 = vunpack.c.h.s8.bf16 %v4351_v61  ;;  %v3204_v5 = vunpack.c.h.s8.bf16 %v4353_v22  ;;  %v3207_v6 = vunpack.c.l.s8.bf16 %v4356_v2  ;;  %v4369_v61 = vld [vmem:[%s5704_s21 + $0x610] sm:$0xff] }
 0x556   : > { %3431 = vmatprep.mubr.bf16.mxu0 %v2968_v12  ;;  %3595 = vmatprep.mubr.bf16.mxu1 %v2968_v12  ;;  %v4355_v12 = vld [vmem:[%s5704_s21 + $0x5a0] sm:$0xff] }
 0x558   : > { %3402 = vmatpush1.bf16.msra.mxu0 %v3170_v19  ;;  %3566 = vmatpush1.bf16.msra.mxu1 %v3172_v21  ;;  %v4357_v19 = vld [vmem:[%s5704_s21 + $0x5b0] sm:$0xff]  ;;  %v3206_v21 = vunpack.c.l.s8.bf16 %v4355_v12 }
 0x559   : > { %3403 = vmatprep.subr.bf16.mxu0 %v3175_v8  ;;  %3567 = vmatprep.subr.bf16.mxu1 %v3177_v23  ;;  %v3208_v8 = vunpack.c.l.s8.bf16 %v4357_v19  ;;  %v3211_v23 = vunpack.c.h.s8.bf16 %v4356_v2  ;;  %v4372_v2 = vld [vmem:[%s5704_s21 + $0x628] sm:$0xff] }
 0x55c   : > { %3404 = vmatpush1.bf16.msra.mxu0 %v3174_v26  ;;  %3568 = vmatpush1.bf16.msra.mxu1 %v3176_v29  ;;  %v4362_v26 = vld [vmem:[%s5704_s21 + $0x5d8] sm:$0xff]  ;;  %v3210_v29 = vunpack.c.h.s8.bf16 %v4355_v12  ;;  %v2932_v12 = vrot.slane %v6213_v37, %v5947_v43 }
 0x55d   : > { %3405 = vmatprep.subr.bf16.mxu0 %v3179_v30  ;;  %3569 = vmatprep.subr.bf16.mxu1 %v3181_v39  ;;  %v3212_v30 = vunpack.c.h.s8.bf16 %v4357_v19  ;;  %v3215_v39 = vunpack.c.l.s8.bf16 %v4360_v24  ;;  %v3217_v31 = vunpack.c.l.s8.bf16 %v4362_v26  ;;  %v3221_v38 = vunpack.c.h.s8.bf16 %v4362_v26 }
 0x560   : > { %3406 = vmatpush1.bf16.msra.mxu0 %v3178_v33  ;;  %3570 = vmatpush1.bf16.msra.mxu1 %v3180_v34  ;;  %v4361_v33 = vld [vmem:[%s5704_s21 + $0x5d0] sm:$0xff]  ;;  %v3214_v34 = vunpack.c.l.s8.bf16 %v4359_v32 }
 0x561   : > { %3407 = vmatprep.subr.bf16.mxu0 %v3183_v35  ;;  %3571 = vmatprep.subr.bf16.mxu1 %v3185_v13  ;;  %v3216_v35 = vunpack.c.l.s8.bf16 %v4361_v33  ;;  %v2869_v13 = vrot.slane %v6210_v42, %v5929_v0 }
 0x563   : > { %v2900_v16 = vmul.f32 %v2869_v13, %v6225_v49  ;;  %v3245_v13 = vunpack.c.h.s8.bf16 %v4374_v3 }
 0x564   : > { %3408 = vmatpush1.bf16.msra.mxu0 %v3182_v40  ;;  %3572 = vmatpush1.bf16.msra.mxu1 %v3184_v41  ;;  %v4364_v40 = vld [vmem:[%s5704_s21 + $0x5e8] sm:$0xff]  ;;  %v4366_v41 = vld [vmem:[%s5704_s21 + $0x5f8] sm:$0xff] }
 0x565   : > { %3409 = vmatprep.subr.bf16.mxu0 %v3187_v44  ;;  %3573 = vmatprep.subr.bf16.mxu1 %v3189_v45  ;;  %v3218_v44 = vunpack.c.h.s8.bf16 %v4359_v32  ;;  %v3220_v45 = vunpack.c.h.s8.bf16 %v4361_v33  ;;  %v3227_v49 = vunpack.c.h.s8.bf16 %v4364_v40 }
 0x568   : > { %3410 = vmatpush1.bf16.msra.mxu0 %v3186_v47  ;;  %3574 = vmatpush1.bf16.msra.mxu1 %v3188_v55  ;;  %v3223_v47 = vunpack.c.l.s8.bf16 %v4364_v40  ;;  %v3225_v55 = vunpack.c.l.s8.bf16 %v4366_v41 }
 0x569   : > { %3411 = vmatprep.subr.bf16.mxu0 %v3191_v46  ;;  %3575 = vmatprep.subr.bf16.mxu1 %v3193_v50  ;;  %v4363_v46 = vld [vmem:[%s5704_s21 + $0x5e0] sm:$0xff]  ;;  %v4365_v50 = vld [vmem:[%s5704_s21 + $0x5f0] sm:$0xff] }
 0x56a   : > { %v3222_v51 = vunpack.c.l.s8.bf16 %v4363_v46  ;;  %v3224_v9 = vunpack.c.l.s8.bf16 %v4365_v50  ;;  %v3226_v48 = vunpack.c.h.s8.bf16 %v4363_v46  ;;  %v3228_v57 = vunpack.c.h.s8.bf16 %v4365_v50 }
 0x56c   : > { %3412 = vmatpush1.bf16.msra.mxu0 %v3190_v52  ;;  %3576 = vmatpush1.bf16.msra.mxu1 %v3192_v54  ;;  %v2951_v52 = vadd.f32 %v2920_v15, %v2900_v16  ;;  %v3229_v54 = vunpack.c.h.s8.bf16 %v4366_v41 }
 0x56d   : > { %3413 = vmatprep.subr.bf16.mxu0 %v3195_v10  ;;  %3577 = vmatprep.subr.bf16.mxu1 %v3197_v56  ;;  %v4368_v10 = vld [vmem:[%s5704_s21 + $0x608] sm:$0xff]  ;;  %v4370_v56 = vld [vmem:[%s5704_s21 + $0x618] sm:$0xff] }
 0x570   : > { %3414 = vmatpush1.bf16.msra.mxu0 %v3194_v18  ;;  %3578 = vmatpush1.bf16.msra.mxu1 %v3196_v58  ;;  %v2959_v18 = vmax.f32 %v2951_v52, 0.0  ;;  %v3231_v58 = vunpack.c.l.s8.bf16 %v4368_v10  ;;  %v4380_v52 = vld [vmem:[%s5704_s21 + $0x668] sm:$0xff] }
 0x571   : > { %3415 = vmatprep.subr.bf16.mxu0 %v3199_v59  ;;  %3579 = vmatprep.subr.bf16.mxu1 %v3201_v60  ;;  %v3233_v59 = vunpack.c.l.s8.bf16 %v4370_v56  ;;  %v4367_v60 = vld [vmem:[%s5704_s21 + $0x600] sm:$0xff] }
 0x572   : > { %v3230_v22 = vunpack.c.l.s8.bf16 %v4367_v60 }
 0x574   : > { %3416 = vmatpush1.bf16.msra.mxu0 %v3198_v62  ;;  %3580 = vmatpush1.bf16.msra.mxu1 %v3200_v53  ;;  %v3232_v62 = vunpack.c.l.s8.bf16 %v4369_v61  ;;  %v2967_v53 = vpack.c.bf16 %v2959_v18, %v2959_v18  ;;  %v4381_v18 = vld [vmem:[%s5704_s21 + $0x670] sm:$0xff] }
 0x575   : > { %3417 = vmatprep.subr.bf16.mxu0 %v3203_v63  ;;  %3581 = vmatprep.subr.bf16.mxu1 %v3205_v1  ;;  %v3235_v63 = vunpack.c.h.s8.bf16 %v4368_v10  ;;  %v3237_v1 = vunpack.c.h.s8.bf16 %v4370_v56  ;;  %v3255_v56 = vunpack.c.l.s8.bf16 %v4380_v52 }
 0x578   : > { %3418 = vmatpush1.bf16.msra.mxu0 %v3202_v4  ;;  %3582 = vmatpush1.bf16.msra.mxu1 %v3204_v5  ;;  %v2881_v4 = vrot.slane %v6210_v42, %v5947_v43  ;;  %v3234_v5 = vunpack.c.h.s8.bf16 %v4367_v60  ;;  %v3259_v60 = vunpack.c.h.s8.bf16 %v4380_v52 }
 0x579   : > { %3419 = vmatprep.subr.bf16.mxu0 %v3207_v6  ;;  %3583 = vmatprep.subr.bf16.mxu1 %v3209_v7  ;;  %v3236_v6 = vunpack.c.h.s8.bf16 %v4369_v61 }
 0x57c   : > { %3420 = vmatpush1.bf16.msra.mxu0 %v3206_v21  ;;  %3584 = vmatpush1.bf16.msra.mxu1 %v3208_v8  ;;  %v3239_v21 = vunpack.c.l.s8.bf16 %v4372_v2  ;;  %v3241_v8 = vunpack.c.l.s8.bf16 %v4374_v3  ;;  %v4383_v3 = vld [vmem:[%s5704_s21 + $0x680] sm:$0xff] }
 0x57d   : > { %3421 = vmatprep.subr.bf16.mxu0 %v3211_v23  ;;  %3585 = vmatprep.subr.bf16.mxu1 %v3213_v11  ;;  %v4371_v23 = vld [vmem:[%s5704_s21 + $0x620] sm:$0xff]  ;;  %v4373_v11 = vld [vmem:[%s5704_s21 + $0x630] sm:$0xff] }
 0x57e   : > { %v3238_v43 = vunpack.c.l.s8.bf16 %v4371_v23  ;;  %v3240_v33 = vunpack.c.l.s8.bf16 %v4373_v11  ;;  %v3242_v41 = vunpack.c.h.s8.bf16 %v4371_v23  ;;  %v4390_v23 = vld [vmem:[%s5704_s21 + $0x6b8] sm:$0xff] }
 0x580   : > { %3422 = vmatpush1.bf16.msra.mxu0 %v3210_v29  ;;  %3586 = vmatpush1.bf16.msra.mxu1 %v3212_v30 }
 0x581   : > { %3423 = vmatprep.subr.bf16.mxu0 %v3215_v39  ;;  %3587 = vmatprep.subr.bf16.mxu1 %v3217_v31 }
 0x584   : > { %3424 = vmatpush1.bf16.msra.mxu0 %v3214_v34  ;;  %3588 = vmatpush1.bf16.msra.mxu1 %v3216_v35  ;;  %v3243_v35 = vunpack.c.h.s8.bf16 %v4372_v2 }
 0x585   : > { %3425 = vmatprep.subr.bf16.mxu0 %v3219_v36  ;;  %3589 = vmatprep.subr.bf16.mxu1 %v3221_v38  ;;  %v4376_v36 = vld [vmem:[%s5704_s21 + $0x648] sm:$0xff]  ;;  %v4378_v38 = vld [vmem:[%s5704_s21 + $0x658] sm:$0xff] }
 0x586   : > { %v3247_v16 = vunpack.c.l.s8.bf16 %v4376_v36  ;;  %v3249_v15 = vunpack.c.l.s8.bf16 %v4378_v38 }
 0x588   : > { %3426 = vmatpush1.bf16.msra.mxu0 %v3218_v44  ;;  %3590 = vmatpush1.bf16.msra.mxu1 %v3220_v45  ;;  %v3244_v44 = vunpack.c.h.s8.bf16 %v4373_v11  ;;  %v3266_v11 = vunpack.c.h.s8.bf16 %v4383_v3 }
 0x589   : > { %3427 = vmatprep.subr.bf16.mxu0 %v3223_v47  ;;  %3591 = vmatprep.subr.bf16.mxu1 %v3225_v55  ;;  %v4375_v47 = vld [vmem:[%s5704_s21 + $0x640] sm:$0xff]  ;;  %v4377_v55 = vld [vmem:[%s5704_s21 + $0x650] sm:$0xff] }
 0x58a   : > { %v3246_v46 = vunpack.c.l.s8.bf16 %v4375_v47  ;;  %v3248_v50 = vunpack.c.l.s8.bf16 %v4377_v55  ;;  %v3252_v10 = vunpack.c.h.s8.bf16 %v4377_v55 }
 0x58c   : > { %3428 = vmatpush1.bf16.msra.mxu0 %v3222_v51  ;;  %3592 = vmatpush1.bf16.msra.mxu1 %v3224_v9  ;;  %v3251_v51 = vunpack.c.h.s8.bf16 %v4376_v36  ;;  %v3253_v9 = vunpack.c.h.s8.bf16 %v4378_v38 }
 0x58d   : > { %3429 = vmatprep.subr.bf16.mxu0 %v3227_v49  ;;  %3593 = vmatprep.subr.bf16.mxu1 %v3229_v54  ;;  %v4382_v49 = vld [vmem:[%s5704_s21 + $0x678] sm:$0xff]  ;;  %v3250_v54 = vunpack.c.h.s8.bf16 %v4375_v47  ;;  %v2877_v47 = vrot.slane %v6210_v42, %v5982_v20 }
 0x58e   : > { %v3261_v61 = vunpack.c.h.s8.bf16 %v4382_v49 }
 0x590   : > { %3430 = vmatpush1.bf16.msra.mxu0 %v3226_v48  ;;  %3594 = vmatpush1.bf16.msra.mxu1 %v3228_v57  ;;  %v3257_v48 = vunpack.c.l.s8.bf16 %v4382_v49  ;;  %v4379_v57 = vld [vmem:[%s5704_s21 + $0x660] sm:$0xff] }
 0x591   : > { %3440 = vmatprep.subr.bf16.mxu0 %v3231_v58  ;;  %3604 = vmatprep.subr.bf16.mxu1 %v3233_v59  ;;  %v3254_v58 = vunpack.c.l.s8.bf16 %v4379_v57  ;;  %v3256_v59 = vunpack.c.l.s8.bf16 %v4381_v18 }
 0x593   : > { %3432 = vmatmul.mubr.bf16.vlgmr.msra.gmra.mrb[24].mxu0 %v2967_v53  ;;  %3596 = vmatmul.mubr.bf16.vlgmr.msra.gmra.mrb[24].mxu1 %v2967_v53  ;;  %v3258_v53 = vunpack.c.h.s8.bf16 %v4379_v57  ;;  %v4395_v57 = vld [vmem:[%s5704_s21 + $0x6e0] sm:$0xff] }
 0x594   : > { %3441 = vmatpush1.bf16.msra.mxu0 %v3230_v22  ;;  %3605 = vmatpush1.bf16.msra.mxu1 %v3232_v62  ;;  %v6274_v7 = vpop.f32.mrb[20].mxu0  ;;  %v6278_v19 = vpop.f32.mrb[20].mxu1  ;;  %v4384_v22 = vld [vmem:[%s5704_s21 + $0x688] sm:$0xff]  ;;  %v4386_v62 = vld [vmem:[%s5704_s21 + $0x698] sm:$0xff] }
 0x595   : > { %3442 = vmatprep.subr.bf16.mxu0 %v3235_v63  ;;  %3606 = vmatprep.subr.bf16.mxu1 %v3237_v1  ;;  %v2768_v24 = vpop.f32.mrb[21].mxu0  ;;  %v6282_v26 = vpop.f32.mrb[21].mxu1  ;;  %v3260_v63 = vunpack.c.h.s8.bf16 %v4381_v18  ;;  %v3263_v1 = vunpack.c.l.s8.bf16 %v4384_v22  ;;  %v3265_v2 = vunpack.c.l.s8.bf16 %v4386_v62  ;;  %v4397_v18 = vld [vmem:[%s5704_s21 + $0x6f0] sm:$0xff] }
 0x596   : > { %v2903_v29 = vmul.f32 %v2881_v4, %v2768_v24  ;;  %v2770_v30 = vpop.f32.mrb[22].mxu0  ;;  %v2852_v39 = vpop.f32.mrb[22].mxu1  ;;  %v4385_v4 = vld [vmem:[%s5704_s21 + $0x690] sm:$0xff] }
 0x597   : > { %v2771_v31 = vpop.f32.mrb[23].mxu0  ;;  %v2853_v32 = vpop.f32.mrb[23].mxu1  ;;  %v3268_v24 = vunpack.c.h.s8.bf16 %v4385_v4  ;;  %v3273_v30 = vunpack.c.l.s8.bf16 %v4390_v23  ;;  %v4387_v39 = vld [vmem:[%s5704_s21 + $0x6a0] sm:$0xff] }
 0x598   : > { %3443 = vmatpush1.bf16.msra.mxu0 %v3234_v5  ;;  %3607 = vmatpush1.bf16.msra.mxu1 %v3236_v6  ;;  %v2954_v34 = vadd.f32 %v2932_v12, %v2903_v29  ;;  %v3262_v5 = vunpack.c.l.s8.bf16 %v4383_v3  ;;  %v3264_v6 = vunpack.c.l.s8.bf16 %v4385_v4  ;;  %v3267_v12 = vunpack.c.h.s8.bf16 %v4384_v22  ;;  %v4389_v31 = vld [vmem:[%s5704_s21 + $0x6b0] sm:$0xff]  ;;  %v4400_v22 = vld [vmem:[%s5704_s21 + $0x708] sm:$0xff] }
 0x599   : > { %3444 = vmatprep.subr.bf16.mxu0 %v3239_v21  ;;  %3608 = vmatprep.subr.bf16.mxu1 %v3241_v8  ;;  %v3269_v21 = vunpack.c.h.s8.bf16 %v4386_v62  ;;  %v4388_v8 = vld [vmem:[%s5704_s21 + $0x6a8] sm:$0xff]  ;;  %v3270_v32 = vunpack.c.l.s8.bf16 %v4387_v39  ;;  %v3274_v36 = vunpack.c.h.s8.bf16 %v4387_v39  ;;  %v3276_v38 = vunpack.c.h.s8.bf16 %v4389_v31  ;;  %v4402_v62 = vld [vmem:[%s5704_s21 + $0x718] sm:$0xff]  ;;  %v4401_v3 = vld [vmem:[%s5704_s21 + $0x710] sm:$0xff] }
 0x59a   : > { %v2962_v40 = vmax.f32 %v2954_v34, 0.0  ;;  %v3271_v29 = vunpack.c.l.s8.bf16 %v4388_v8  ;;  %v3277_v34 = vunpack.c.h.s8.bf16 %v4390_v23 }
 0x59c   : > { %3445 = vmatpush1.bf16.msra.mxu0 %v3238_v43  ;;  %3609 = vmatpush1.bf16.msra.mxu1 %v3240_v33  ;;  %v2970_v45 = vpack.c.bf16 %v2962_v40, %v2962_v40  ;;  %v3272_v43 = vunpack.c.l.s8.bf16 %v4389_v31  ;;  %v3275_v33 = vunpack.c.h.s8.bf16 %v4388_v8  ;;  %v3301_v8 = vunpack.c.h.s8.bf16 %v4402_v62 }
 0x59d   : > { %3446 = vmatprep.subr.bf16.mxu0 %v3243_v35  ;;  %3610 = vmatprep.subr.bf16.mxu1 %v3245_v13  ;;  %v4392_v35 = vld [vmem:[%s5704_s21 + $0x6c8] sm:$0xff]  ;;  %v4394_v13 = vld [vmem:[%s5704_s21 + $0x6d8] sm:$0xff] }
 0x59e   : > { %3472 = vmatprep.mubr.bf16.mxu0 %v2970_v45  ;;  %3636 = vmatprep.mubr.bf16.mxu1 %v2970_v45  ;;  %v3279_v40 = vunpack.c.l.s8.bf16 %v4392_v35  ;;  %v4393_v45 = vld [vmem:[%s5704_s21 + $0x6d0] sm:$0xff]  ;;  %v3283_v55 = vunpack.c.h.s8.bf16 %v4392_v35 }
 0x59f   : > { %v3284_v49 = vunpack.c.h.s8.bf16 %v4393_v45 }
 0x5a0   : > { %3447 = vmatpush1.bf16.msra.mxu0 %v3242_v41  ;;  %3611 = vmatpush1.bf16.msra.mxu1 %v3244_v44  ;;  %v3281_v41 = vunpack.c.l.s8.bf16 %v4394_v13  ;;  %v4391_v44 = vld [vmem:[%s5704_s21 + $0x6c0] sm:$0xff] }
 0x5a1   : > { %3448 = vmatprep.subr.bf16.mxu0 %v3247_v16  ;;  %3612 = vmatprep.subr.bf16.mxu1 %v3249_v15  ;;  %v3278_v16 = vunpack.c.l.s8.bf16 %v4391_v44  ;;  %v3280_v15 = vunpack.c.l.s8.bf16 %v4393_v45  ;;  %v3282_v52 = vunpack.c.h.s8.bf16 %v4391_v44 }
 0x5a4   : > { %3449 = vmatpush1.bf16.msra.mxu0 %v3246_v46  ;;  %3613 = vmatpush1.bf16.msra.mxu1 %v3248_v50  ;;  %v3285_v46 = vunpack.c.h.s8.bf16 %v4394_v13  ;;  %v4396_v50 = vld [vmem:[%s5704_s21 + $0x6e8] sm:$0xff] }
 0x5a5   : > { %3450 = vmatprep.subr.bf16.mxu0 %v3251_v51  ;;  %3614 = vmatprep.subr.bf16.mxu1 %v3253_v9  ;;  %v4398_v51 = vld [vmem:[%s5704_s21 + $0x6f8] sm:$0xff]  ;;  %v2889_v9 = vrot.slane %v6210_v42, %v5987_v27  ;;  %v2940_v42 = vrot.slane %v6213_v37, %v5987_v27  ;;  %v3295_v27 = vunpack.c.l.s8.bf16 %v4400_v22 }
 0x5a8   : > { %3451 = vmatpush1.bf16.msra.mxu0 %v3250_v54  ;;  %3615 = vmatpush1.bf16.msra.mxu1 %v3252_v10  ;;  %v2902_v54 = vmul.f32 %v2877_v47, %v6274_v7  ;;  %v2928_v10 = vrot.slane %v6213_v37, %v5982_v20  ;;  %v3288_v7 = vunpack.c.l.s8.bf16 %v4397_v18  ;;  %v3291_v20 = vunpack.c.h.s8.bf16 %v4396_v50 }
 0x5a9   : > { %3452 = vmatprep.subr.bf16.mxu0 %v3255_v56  ;;  %3616 = vmatprep.subr.bf16.mxu1 %v3257_v48  ;;  %v3287_v56 = vunpack.c.l.s8.bf16 %v4396_v50  ;;  %v3289_v48 = vunpack.c.l.s8.bf16 %v4398_v51  ;;  %v3297_v37 = vunpack.c.l.s8.bf16 %v4402_v62  ;;  %v4415_v62 = vld [vmem:[%s5704_s21 + $0x780] sm:$0xff] }
 0x5ac   : > { %3453 = vmatpush1.bf16.msra.mxu0 %v3254_v58  ;;  %3617 = vmatpush1.bf16.msra.mxu1 %v3256_v59  ;;  %v2905_v58 = vmul.f32 %v2889_v9, %v6282_v26  ;;  %v3286_v59 = vunpack.c.l.s8.bf16 %v4395_v57  ;;  %v3290_v26 = vunpack.c.h.s8.bf16 %v4395_v57  ;;  %v4414_v9 = vld [vmem:[%s5704_s21 + $0x778] sm:$0xff] }
 0x5ad   : > { %3454 = vmatprep.subr.bf16.mxu0 %v3259_v60  ;;  %3618 = vmatprep.subr.bf16.mxu1 %v3261_v61  ;;  %v2953_v60 = vadd.f32 %v2928_v10, %v2902_v54  ;;  %v3293_v61 = vunpack.c.h.s8.bf16 %v4398_v51  ;;  %v4412_v51 = vld [vmem:[%s5704_s21 + $0x768] sm:$0xff]  ;;  %v3321_v10 = vunpack.c.l.s8.bf16 %v4414_v9 }
 0x5ae   : > { %v3319_v54 = vunpack.c.l.s8.bf16 %v4412_v51 }
 0x5b0   : > { %3455 = vmatpush1.bf16.msra.mxu0 %v3258_v53  ;;  %3619 = vmatpush1.bf16.msra.mxu1 %v3260_v63  ;;  %v2956_v53 = vadd.f32 %v2940_v42, %v2905_v58  ;;  %v3292_v63 = vunpack.c.h.s8.bf16 %v4397_v18  ;;  %v3323_v58 = vunpack.c.h.s8.bf16 %v4412_v51  ;;  %v3325_v42 = vunpack.c.h.s8.bf16 %v4414_v9  ;;  %v4427_v9 = vld [vmem:[%s5704_s21 + $0x7e0] sm:$0xff] }
 0x5b1   : > { %3456 = vmatprep.subr.bf16.mxu0 %v3263_v1  ;;  %3620 = vmatprep.subr.bf16.mxu1 %v3265_v2  ;;  %v2961_v1 = vmax.f32 %v2953_v60, 0.0  ;;  %v4399_v2 = vld [vmem:[%s5704_s21 + $0x700] sm:$0xff] }
 0x5b2   : > { %v2964_v4 = vmax.f32 %v2956_v53, 0.0  ;;  %v4417_v53 = vld [vmem:[%s5704_s21 + $0x790] sm:$0xff] }
 0x5b4   : > { %3457 = vmatpush1.bf16.msra.mxu0 %v3262_v5  ;;  %3621 = vmatpush1.bf16.msra.mxu1 %v3264_v6  ;;  %v3294_v5 = vunpack.c.l.s8.bf16 %v4399_v2  ;;  %v3296_v6 = vunpack.c.l.s8.bf16 %v4401_v3  ;;  %v2972_v23 = vpack.c.bf16 %v2964_v4, %v2964_v4  ;;  %v3332_v4 = vunpack.c.h.s8.bf16 %v4417_v53 }
 0x5b5   : > { %3458 = vmatprep.subr.bf16.mxu0 %v3267_v12  ;;  %3622 = vmatprep.subr.bf16.mxu1 %v3269_v21  ;;  %v2969_v12 = vpack.c.bf16 %v2961_v1, %v2961_v1  ;;  %v3299_v21 = vunpack.c.h.s8.bf16 %v4400_v22 }
 0x5b8   : > { %3459 = vmatpush1.bf16.msra.mxu0 %v3266_v11  ;;  %3623 = vmatpush1.bf16.msra.mxu1 %v3268_v24  ;;  %v4404_v11 = vld [vmem:[%s5704_s21 + $0x728] sm:$0xff]  ;;  %v4406_v24 = vld [vmem:[%s5704_s21 + $0x738] sm:$0xff] }
 0x5b9   : > { %3460 = vmatprep.subr.bf16.mxu0 %v3271_v29  ;;  %3624 = vmatprep.subr.bf16.mxu1 %v3273_v30  ;;  %v3298_v29 = vunpack.c.h.s8.bf16 %v4399_v2  ;;  %v3300_v30 = vunpack.c.h.s8.bf16 %v4401_v3  ;;  %v3303_v39 = vunpack.c.l.s8.bf16 %v4404_v11  ;;  %v3305_v31 = vunpack.c.l.s8.bf16 %v4406_v24  ;;  %v4422_v2 = vld [vmem:[%s5704_s21 + $0x7b8] sm:$0xff] }
 0x5ba   : > { %v3307_v35 = vunpack.c.h.s8.bf16 %v4404_v11  ;;  %v3309_v13 = vunpack.c.h.s8.bf16 %v4406_v24  ;;  %v3330_v3 = vunpack.c.h.s8.bf16 %v4415_v62  ;;  %v3341_v24 = vunpack.c.h.s8.bf16 %v4422_v2 }
 0x5bc   : > { %3461 = vmatpush1.bf16.msra.mxu0 %v3270_v32  ;;  %3625 = vmatpush1.bf16.msra.mxu1 %v3272_v43  ;;  %v4403_v32 = vld [vmem:[%s5704_s21 + $0x720] sm:$0xff]  ;;  %v4405_v43 = vld [vmem:[%s5704_s21 + $0x730] sm:$0xff] }
 0x5bd   : > { %3462 = vmatprep.subr.bf16.mxu0 %v3275_v33  ;;  %3626 = vmatprep.subr.bf16.mxu1 %v3277_v34  ;;  %v3302_v33 = vunpack.c.l.s8.bf16 %v4403_v32  ;;  %v3304_v34 = vunpack.c.l.s8.bf16 %v4405_v43 }
 0x5c0   : > { %3463 = vmatpush1.bf16.msra.mxu0 %v3274_v36  ;;  %3627 = vmatpush1.bf16.msra.mxu1 %v3276_v38  ;;  %v4408_v36 = vld [vmem:[%s5704_s21 + $0x748] sm:$0xff]  ;;  %v4410_v38 = vld [vmem:[%s5704_s21 + $0x758] sm:$0xff] }
 0x5c1   : > { %3464 = vmatprep.subr.bf16.mxu0 %v3279_v40  ;;  %3628 = vmatprep.subr.bf16.mxu1 %v3281_v41  ;;  %v3306_v40 = vunpack.c.h.s8.bf16 %v4403_v32  ;;  %v3308_v41 = vunpack.c.h.s8.bf16 %v4405_v43  ;;  %v3311_v44 = vunpack.c.l.s8.bf16 %v4408_v36  ;;  %v3313_v45 = vunpack.c.l.s8.bf16 %v4410_v38 }
 0x5c2   : > { %v3317_v50 = vunpack.c.h.s8.bf16 %v4410_v38 }
 0x5c4   : > { %3465 = vmatpush1.bf16.msra.mxu0 %v3278_v16  ;;  %3629 = vmatpush1.bf16.msra.mxu1 %v3280_v15  ;;  %v4407_v16 = vld [vmem:[%s5704_s21 + $0x740] sm:$0xff]  ;;  %v4409_v15 = vld [vmem:[%s5704_s21 + $0x750] sm:$0xff] }
 0x5c5   : > { %3466 = vmatprep.subr.bf16.mxu0 %v3283_v55  ;;  %3630 = vmatprep.subr.bf16.mxu1 %v3285_v46  ;;  %v3310_v47 = vunpack.c.l.s8.bf16 %v4407_v16  ;;  %v3312_v55 = vunpack.c.l.s8.bf16 %v4409_v15  ;;  %v3315_v46 = vunpack.c.h.s8.bf16 %v4408_v36  ;;  %v4760_v36 = vld [vmem:[%s5693_s15 + $0x8] sm:$0xff] }
 0x5c6   : > { %v2885_v38 = vrot.slane %v4760_v36, %v6030_v28  ;;  %v4440_v36 = vld [vmem:[%s5715_s26 + $0xb8] sm:$0xff] }
 0x5c8   : > { %3467 = vmatpush1.bf16.msra.mxu0 %v3282_v52  ;;  %3631 = vmatpush1.bf16.msra.mxu1 %v3284_v49  ;;  %v3314_v52 = vunpack.c.h.s8.bf16 %v4407_v16  ;;  %v3316_v49 = vunpack.c.h.s8.bf16 %v4409_v15 }
 0x5c9   : > { %3468 = vmatprep.subr.bf16.mxu0 %v3287_v56  ;;  %3632 = vmatprep.subr.bf16.mxu1 %v3289_v48  ;;  %v4411_v56 = vld [vmem:[%s5704_s21 + $0x760] sm:$0xff]  ;;  %v4413_v48 = vld [vmem:[%s5704_s21 + $0x770] sm:$0xff] }
 0x5ca   : > { %v3318_v57 = vunpack.c.l.s8.bf16 %v4411_v56  ;;  %v3320_v18 = vunpack.c.l.s8.bf16 %v4413_v48  ;;  %v3322_v60 = vunpack.c.h.s8.bf16 %v4411_v56 }
 0x5cc   : > { %3469 = vmatpush1.bf16.msra.mxu0 %v3286_v59  ;;  %3633 = vmatpush1.bf16.msra.mxu1 %v3288_v7  ;;  %v4416_v59 = vld [vmem:[%s5704_s21 + $0x788] sm:$0xff]  ;;  %v4418_v7 = vld [vmem:[%s5704_s21 + $0x798] sm:$0xff] }
 0x5cd   : > { %3470 = vmatprep.subr.bf16.mxu0 %v3291_v20  ;;  %3634 = vmatprep.subr.bf16.mxu1 %v3293_v61  ;;  %v3324_v20 = vunpack.c.h.s8.bf16 %v4413_v48  ;;  %v3327_v61 = vunpack.c.l.s8.bf16 %v4416_v59  ;;  %v3329_v22 = vunpack.c.l.s8.bf16 %v4418_v7  ;;  %v3331_v1 = vunpack.c.h.s8.bf16 %v4416_v59  ;;  %v4445_v48 = vld [vmem:[%s5715_s26 + $0xe0] sm:$0xff] }
 0x5ce   : > { %v3789_v59 = vunpack.c.l.s8.bf16 %v4445_v48 }
 0x5d0   : > { %3471 = vmatpush1.bf16.msra.mxu0 %v3290_v26  ;;  %3635 = vmatpush1.bf16.msra.mxu1 %v3292_v63  ;;  %v3326_v26 = vunpack.c.l.s8.bf16 %v4415_v62  ;;  %v3328_v63 = vunpack.c.l.s8.bf16 %v4417_v53  ;;  %v3790_v53 = vunpack.c.h.s8.bf16 %v4445_v48 }
 0x5d1   : > { %3481 = vmatprep.subr.bf16.mxu0 %v3295_v27  ;;  %3645 = vmatprep.subr.bf16.mxu1 %v3297_v37  ;;  %v3333_v27 = vunpack.c.h.s8.bf16 %v4418_v7  ;;  %v4420_v37 = vld [vmem:[%s5704_s21 + $0x7a8] sm:$0xff]  ;;  %v4433_v7 = vld [vmem:[%s5715_s26 + $0x80] sm:$0xff] }
 0x5d2   : > { %v3339_v11 = vunpack.c.h.s8.bf16 %v4420_v37 }
 0x5d3   : > { %3473 = vmatmul.mubr.bf16.vlgmr.msra.gmra.mrb[24].mxu0 %v2969_v12  ;;  %3637 = vmatmul.mubr.bf16.vlgmr.msra.gmra.mrb[24].mxu1 %v2969_v12  ;;  %v4419_v12 = vld [vmem:[%s5704_s21 + $0x7a0] sm:$0xff] }
 0x5d4   : > { %3482 = vmatpush1.bf16.msra.mxu0 %v3294_v5  ;;  %3646 = vmatpush1.bf16.msra.mxu1 %v3296_v6  ;;  %v3335_v5 = vunpack.c.l.s8.bf16 %v4420_v37  ;;  %v3337_v6 = vunpack.c.l.s8.bf16 %v4422_v2 }
 0x5d5   : > { %3483 = vmatprep.subr.bf16.mxu0 %v3299_v21  ;;  %3647 = vmatprep.subr.bf16.mxu1 %v3301_v8  ;;  %v4421_v21 = vld [vmem:[%s5704_s21 + $0x7b0] sm:$0xff]  ;;  %v3334_v8 = vunpack.c.l.s8.bf16 %v4419_v12 }
 0x5d6   : > { %3513 = vmatprep.mubr.bf16.mxu0 %v2972_v23  ;;  %3677 = vmatprep.mubr.bf16.mxu1 %v2972_v23  ;;  %v3336_v23 = vunpack.c.l.s8.bf16 %v4421_v21 }
 0x5d8   : > { %3484 = vmatpush1.bf16.msra.mxu0 %v3298_v29  ;;  %3648 = vmatpush1.bf16.msra.mxu1 %v3300_v30  ;;  %v4424_v29 = vld [vmem:[%s5704_s21 + $0x7c8] sm:$0xff]  ;;  %v4426_v30 = vld [vmem:[%s5704_s21 + $0x7d8] sm:$0xff] }
 0x5d9   : > { %3485 = vmatprep.subr.bf16.mxu0 %v3303_v39  ;;  %3649 = vmatprep.subr.bf16.mxu1 %v3305_v31  ;;  %v3338_v39 = vunpack.c.h.s8.bf16 %v4419_v12  ;;  %v3340_v31 = vunpack.c.h.s8.bf16 %v4421_v21  ;;  %v3343_v32 = vunpack.c.l.s8.bf16 %v4424_v29  ;;  %v3345_v43 = vunpack.c.l.s8.bf16 %v4426_v30 }
 0x5dc   : > { %3486 = vmatpush1.bf16.msra.mxu0 %v3302_v33  ;;  %3650 = vmatpush1.bf16.msra.mxu1 %v3304_v34  ;;  %v4423_v33 = vld [vmem:[%s5704_s21 + $0x7c0] sm:$0xff]  ;;  %v4425_v34 = vld [vmem:[%s5704_s21 + $0x7d0] sm:$0xff] }
 0x5dd   : > { %3487 = vmatprep.subr.bf16.mxu0 %v3307_v35  ;;  %3651 = vmatprep.subr.bf16.mxu1 %v3309_v13  ;;  %v3342_v35 = vunpack.c.l.s8.bf16 %v4423_v33  ;;  %v3344_v13 = vunpack.c.l.s8.bf16 %v4425_v34  ;;  %v3346_v16 = vunpack.c.h.s8.bf16 %v4423_v33  ;;  %v3348_v15 = vunpack.c.h.s8.bf16 %v4425_v34 }
 0x5e0   : > { %3488 = vmatpush1.bf16.msra.mxu0 %v3306_v40  ;;  %3652 = vmatpush1.bf16.msra.mxu1 %v3308_v41  ;;  %v3347_v40 = vunpack.c.h.s8.bf16 %v4424_v29  ;;  %v3349_v41 = vunpack.c.h.s8.bf16 %v4426_v30 }
 0x5e1   : > { %3489 = vmatprep.subr.bf16.mxu0 %v3311_v44  ;;  %3653 = vmatprep.subr.bf16.mxu1 %v3313_v45  ;;  %v4428_v44 = vld [vmem:[%s5704_s21 + $0x7e8] sm:$0xff]  ;;  %v4430_v45 = vld [vmem:[%s5704_s21 + $0x7f8] sm:$0xff] }
 0x5e2   : > { %v3353_v51 = vunpack.c.l.s8.bf16 %v4430_v45  ;;  %v3357_v56 = vunpack.c.h.s8.bf16 %v4430_v45  ;;  %v4444_v45 = vld [vmem:[%s5715_s26 + $0xd8] sm:$0xff] }
 0x5e4   : > { %3490 = vmatpush1.bf16.msra.mxu0 %v3310_v47  ;;  %3654 = vmatpush1.bf16.msra.mxu1 %v3312_v55  ;;  %v2904_v47 = vmul.f32 %v2885_v38, %v6278_v19  ;;  %v4761_v55 = vld [vmem:[%s5696_s11 + $0x8] sm:$0xff]  ;;  %v3355_v19 = vunpack.c.h.s8.bf16 %v4428_v44  ;;  %s6388_s11 = scalar_lea.hbm %s6522_s8, %s4473_s25 }
 0x5e5   : > { %3491 = vmatprep.subr.bf16.mxu0 %v3315_v46  ;;  %3655 = vmatprep.subr.bf16.mxu1 %v3317_v50  ;;  %v2936_v46 = vrot.slane %v4761_v55, %v6030_v28  ;;  %v3351_v50 = vunpack.c.l.s8.bf16 %v4428_v44  ;;  %v4437_v28 = vld [vmem:[%s5715_s26 + $0xa0] sm:$0xff]  ;;  %v4448_v38 = vld [vmem:[%s5715_s26 + $0xf8] sm:$0xff] }
 0x5e6   : > { %v3774_v62 = vunpack.c.h.s8.bf16 %v4437_v28  ;;  %v4436_v44 = vld [vmem:[%s5715_s26 + $0x98] sm:$0xff]  ;;  %v3796_v55 = vunpack.c.h.s8.bf16 %v4448_v38 }
 0x5e8   : > { %3492 = vmatpush1.bf16.msra.mxu0 %v3314_v52  ;;  %3656 = vmatpush1.bf16.msra.mxu1 %v3316_v49  ;;  %v4429_v52 = vld [vmem:[%s5704_s21 + $0x7f0] sm:$0xff]  ;;  %v3350_v49 = vunpack.c.l.s8.bf16 %v4427_v9  ;;  %s5064_s21 = sshll.u32 %s5168_s5, 4  ;;  %s5065_s21 = int_to_ptr.vmem [resolvable:$false] %s5064_s21 }
 0x5e9   : > { %3493 = vmatprep.subr.bf16.mxu0 %v3319_v54  ;;  %3657 = vmatprep.subr.bf16.mxu1 %v3321_v10  ;;  %v3352_v54 = vunpack.c.l.s8.bf16 %v4429_v52  ;;  %v2955_v10 = vadd.f32 %v2936_v46, %v2904_v47  ;;  %v3780_v47 = vunpack.c.h.s8.bf16 %v4440_v36  ;;  %v3772_v46 = vunpack.c.h.s8.bf16 %v4436_v44  ;;  %s5066_s28 = scalar_lea.vmem %s5065_s21, 512  ;;  %p5067_p9 = scmp.lt.s32.totalorder %s6390_s24, %s5065_s21 }
 0x5ea   : > { %p5068_p3 = scmp.lt.s32.totalorder %s5066_s28, %s5060_s20 }
 0x5ec   : > { %3494 = vmatpush1.bf16.msra.mxu0 %v3318_v57  ;;  %3658 = vmatpush1.bf16.msra.mxu1 %v3320_v18  ;;  %v3354_v57 = vunpack.c.h.s8.bf16 %v4427_v9  ;;  %v3356_v18 = vunpack.c.h.s8.bf16 %v4429_v52  ;;  %v4432_v9 = vld [vmem:[%s5713_s19 + $0x4] sm:$0xf]  ;;  %p5069_p4 = por %p5068_p3, %p5067_p9 }
 0x5ed   : > { %3495 = vmatprep.subr.bf16.mxu0 %v3323_v58  ;;  %3659 = vmatprep.subr.bf16.mxu1 %v3325_v42  ;;  %v2963_v58 = vmax.f32 %v2955_v10, 0.0  ;;  %v3773_v42 = vunpack.c.l.s8.bf16 %v4437_v28 }
 0x5ee   : > { %p5070_p11 = pnand %p5069_p4, %p5063_p12 }
 0x5f0   : > { %3496 = vmatpush1.bf16.msra.mxu0 %v3322_v60  ;;  %3660 = vmatpush1.bf16.msra.mxu1 %v3324_v20  ;;  %v4441_v60 = vld [vmem:[%s5715_s26 + $0xc0] sm:$0xff]  ;;  %v3765_v20 = vunpack.c.l.s8.bf16 %v4433_v7 }
 0x5f1   : > { %3497 = vmatprep.subr.bf16.mxu0 %v3327_v61  ;;  %3661 = vmatprep.subr.bf16.mxu1 %v3329_v22  ;;  %v3781_v61 = vunpack.c.l.s8.bf16 %v4441_v60  ;;  %v2971_v22 = vpack.c.bf16 %v2963_v58, %v2963_v58 }
 0x5f4   : > { %3498 = vmatpush1.bf16.msra.mxu0 %v3326_v26  ;;  %3662 = vmatpush1.bf16.msra.mxu1 %v3328_v63  ;;  %v4438_v26 = vld [vmem:[%s5715_s26 + $0xa8] sm:$0xff] }
 0x5f5   : > { %3499 = vmatprep.subr.bf16.mxu0 %v3331_v1  ;;  %3663 = vmatprep.subr.bf16.mxu1 %v3333_v27  ;;  %v4446_v63 = vld [vmem:[%s5715_s26 + $0xe8] sm:$0xff]  ;;  %v3766_v1 = vunpack.c.h.s8.bf16 %v4433_v7  ;;  %v3782_v27 = vunpack.c.h.s8.bf16 %v4441_v60  ;;  %v3775_v37 = vunpack.c.l.s8.bf16 %v4438_v26  ;;  %v3776_v12 = vunpack.c.h.s8.bf16 %v4438_v26 }
 0x5f6   : > { %v3791_v2 = vunpack.c.l.s8.bf16 %v4446_v63  ;;  %v3792_v21 = vunpack.c.h.s8.bf16 %v4446_v63 }
 0x5f8   : > { %3500 = vmatpush1.bf16.msra.mxu0 %v3330_v3  ;;  %3664 = vmatpush1.bf16.msra.mxu1 %v3332_v4  ;;  %v4434_v3 = vld [vmem:[%s5715_s26 + $0x88] sm:$0xff] }
 0x5f9   : > { %3501 = vmatprep.subr.bf16.mxu0 %v3335_v5  ;;  %3665 = vmatprep.subr.bf16.mxu1 %v3337_v6  ;;  %v4442_v4 = vld [vmem:[%s5715_s26 + $0xc8] sm:$0xff]  ;;  %v3767_v5 = vunpack.c.l.s8.bf16 %v4434_v3 }
 0x5fa   : > { %v3783_v6 = vunpack.c.l.s8.bf16 %v4442_v4 }
 0x5fc   : > { %3502 = vmatpush1.bf16.msra.mxu0 %v3334_v8  ;;  %3666 = vmatpush1.bf16.msra.mxu1 %v3336_v23  ;;  %v4439_v8 = vld [vmem:[%s5715_s26 + $0xb0] sm:$0xff] }
 0x5fd   : > { %3503 = vmatprep.subr.bf16.mxu0 %v3339_v11  ;;  %3667 = vmatprep.subr.bf16.mxu1 %v3341_v24  ;;  %v4447_v23 = vld [vmem:[%s5715_s26 + $0xf0] sm:$0xff]  ;;  %v3768_v11 = vunpack.c.h.s8.bf16 %v4434_v3  ;;  %v3784_v24 = vunpack.c.h.s8.bf16 %v4442_v4  ;;  %v3777_v29 = vunpack.c.l.s8.bf16 %v4439_v8  ;;  %v3778_v33 = vunpack.c.h.s8.bf16 %v4439_v8 }
 0x5fe   : > { %v3793_v30 = vunpack.c.l.s8.bf16 %v4447_v23  ;;  %v3794_v34 = vunpack.c.h.s8.bf16 %v4447_v23 }
 0x600   : > { %3504 = vmatpush1.bf16.msra.mxu0 %v3338_v39  ;;  %3668 = vmatpush1.bf16.msra.mxu1 %v3340_v31  ;;  %v4435_v39 = vld [vmem:[%s5715_s26 + $0x90] sm:$0xff] }
 0x601   : > { %3505 = vmatprep.subr.bf16.mxu0 %v3343_v32  ;;  %3669 = vmatprep.subr.bf16.mxu1 %v3345_v43  ;;  %v4443_v31 = vld [vmem:[%s5715_s26 + $0xd0] sm:$0xff]  ;;  %v3769_v32 = vunpack.c.l.s8.bf16 %v4435_v39 }
 0x602   : > { %v3785_v43 = vunpack.c.l.s8.bf16 %v4443_v31 }
 0x604   : > { %3506 = vmatpush1.bf16.msra.mxu0 %v3342_v35  ;;  %3670 = vmatpush1.bf16.msra.mxu1 %v3344_v13  ;;  %v3770_v35 = vunpack.c.h.s8.bf16 %v4435_v39  ;;  %v3786_v13 = vunpack.c.h.s8.bf16 %v4443_v31 }
 0x605   : > { %3507 = vmatprep.subr.bf16.mxu0 %v3347_v40  ;;  %3671 = vmatprep.subr.bf16.mxu1 %v3349_v41  ;;  %v3779_v40 = vunpack.c.l.s8.bf16 %v4440_v36  ;;  %v3795_v41 = vunpack.c.l.s8.bf16 %v4448_v38 }
 0x608   : > { %3508 = vmatpush1.bf16.msra.mxu0 %v3346_v16  ;;  %3672 = vmatpush1.bf16.msra.mxu1 %v3348_v15  ;;  %v3771_v16 = vunpack.c.l.s8.bf16 %v4436_v44  ;;  %v3787_v15 = vunpack.c.l.s8.bf16 %v4444_v45 }
 0x609   : > { %3509 = vmatprep.subr.bf16.mxu0 %v3351_v50  ;;  %3673 = vmatprep.subr.bf16.mxu1 %v3353_v51  ;;  %v3788_v50 = vunpack.c.h.s8.bf16 %v4444_v45  ;;  %v4431_v51 = vld [vmem:[%s5706_s23 + $0x4] sm:$0xf] }
 0x60a   : > { %v3692_v52 = vrot.slane %v4431_v51, %v5875_v14  ;;  %v3704_v10 = vrot.slane %v4431_v51, %v5895_v25 }
 0x60c   : > { %3510 = vmatpush1.bf16.msra.mxu0 %v3350_v49  ;;  %3674 = vmatpush1.bf16.msra.mxu1 %v3352_v54  ;;  %v3700_v49 = vrot.slane %v4431_v51, %v5929_v0  ;;  %v3696_v54 = vrot.slane %v4431_v51, %v5881_v17 }
 0x60d   : > { %3511 = vmatprep.subr.bf16.mxu0 %v3355_v19  ;;  %3675 = vmatprep.subr.bf16.mxu1 %v3357_v56  ;;  %v3719_v19 = vrot.slane %v4432_v9, %v5875_v14  ;;  %v3727_v56 = vrot.slane %v4432_v9, %v5929_v0 }
 0x610   : > { %3512 = vmatpush1.bf16.msra.mxu0 %v3354_v57  ;;  %3676 = vmatpush1.bf16.msra.mxu1 %v3356_v18  ;;  %v3723_v57 = vrot.slane %v4432_v9, %v5881_v17  ;;  %v3731_v18 = vrot.slane %v4432_v9, %v5895_v25 }
 0x611   : > { %4518 = vmatprep.subr.bf16.mxu0 %v3773_v42  ;;  %4540 = vmatprep.subr.bf16.mxu1 %v3789_v59 }
 0x613   : > { %3514 = vmatmul.mubr.bf16.vlgmr.msra.gmra.mrb[24].mxu0 %v2971_v22  ;;  %3678 = vmatmul.mubr.bf16.vlgmr.msra.gmra.mrb[24].mxu1 %v2971_v22 }
 0x614   : > { %4519 = vmatpush3.bf16.msra.mxu0 %v3765_v20  ;;  %4541 = vmatpush3.bf16.msra.mxu1 %v3781_v61 }
 0x615   : > { %4520 = vmatprep.subr.bf16.mxu0 %v3774_v62  ;;  %4542 = vmatprep.subr.bf16.mxu1 %v3790_v53 }
 0x618   : > { %4521 = vmatpush3.bf16.msra.mxu0 %v3766_v1  ;;  %4543 = vmatpush3.bf16.msra.mxu1 %v3782_v27 }
 0x619   : > { %4522 = vmatprep.subr.bf16.mxu0 %v3775_v37  ;;  %4544 = vmatprep.subr.bf16.mxu1 %v3791_v2 }
 0x61c   : > { %4523 = vmatpush3.bf16.msra.mxu0 %v3767_v5  ;;  %4545 = vmatpush3.bf16.msra.mxu1 %v3783_v6 }
 0x61d   : > { %4524 = vmatprep.subr.bf16.mxu0 %v3776_v12  ;;  %4546 = vmatprep.subr.bf16.mxu1 %v3792_v21 }
 0x620   : > { %4525 = vmatpush3.bf16.msra.mxu0 %v3768_v11  ;;  %4547 = vmatpush3.bf16.msra.mxu1 %v3784_v24 }
 0x621   : > { %4526 = vmatprep.subr.bf16.mxu0 %v3777_v29  ;;  %4548 = vmatprep.subr.bf16.mxu1 %v3793_v30  ;;  %v4450_v29 = vld [vmem:[%s5722_s9 + $0x1] ss:$0 sm:$0xff] }
 0x624   : > { %4527 = vmatpush3.bf16.msra.mxu0 %v3769_v32  ;;  %4549 = vmatpush3.bf16.msra.mxu1 %v3785_v43  ;;  %v4452_v32 = vld [vmem:[%s5725_s1 + $0x1] ss:$0 sm:$0xff] }
 0x625   : > { %4528 = vmatprep.subr.bf16.mxu0 %v3778_v33  ;;  %4550 = vmatprep.subr.bf16.mxu1 %v3794_v34 }
 0x628   : > { %4529 = vmatpush3.bf16.msra.mxu0 %v3770_v35  ;;  %4551 = vmatpush3.bf16.msra.mxu1 %v3786_v13 }
 0x629   : > { %4530 = vmatprep.subr.bf16.mxu0 %v3779_v40  ;;  %4552 = vmatprep.subr.bf16.mxu1 %v3795_v41 }
 0x62c   : > { %4531 = vmatpush3.bf16.msra.mxu0 %v3771_v16  ;;  %4553 = vmatpush3.bf16.msra.mxu1 %v3787_v15 }
 0x62d   : > { %4532 = vmatprep.subr.bf16.mxu0 %v3780_v47  ;;  %4554 = vmatprep.subr.bf16.mxu1 %v3796_v55 }
 0x630   : > { %4533 = vmatpush3.bf16.msra.mxu0 %v3772_v46  ;;  %4555 = vmatpush3.bf16.msra.mxu1 %v3788_v50 }
 0x6e6   : > { %v3515_v28 = vpop.f32.mrb[24].mxu0  ;;  %v3679_v48 = vpop.f32.mrb[24].mxu1 }
 0x6e7   : > { %v3709_v58 = vmul.f32 %v3692_v52, %v3515_v28  ;;  %v3711_v42 = vmul.f32 %v3700_v49, %v3679_v48  ;;  %v3517_v59 = vpop.f32.mrb[25].mxu0  ;;  %v3681_v7 = vpop.f32.mrb[25].mxu1 }
 0x6e8   : > { %v3710_v60 = vmul.f32 %v3696_v54, %v3517_v59  ;;  %v3712_v20 = vmul.f32 %v3704_v10, %v3681_v7  ;;  %v3519_v61 = vpop.f32.mrb[26].mxu0  ;;  %v3683_v22 = vpop.f32.mrb[26].mxu1 }
 0x6e9   : > { %v3736_v62 = vadd.f32 %v3719_v19, %v3709_v58  ;;  %v3738_v53 = vadd.f32 %v3727_v56, %v3711_v42  ;;  %v3520_v26 = vpop.f32.mrb[27].mxu0  ;;  %v3684_v14 = vpop.f32.mrb[27].mxu1 }
 0x6ea   : > { %v3737_v63 = vadd.f32 %v3723_v57, %v3710_v60  ;;  %v3739_v0 = vadd.f32 %v3731_v18, %v3712_v20 }
 0x6eb   : > { %v3740_v1 = vmax.f32 %v3736_v62, 0.0  ;;  %v3742_v27 = vmax.f32 %v3738_v53, 0.0 }
 0x6ec   : > { %v3741_v37 = vmax.f32 %v3737_v63, 0.0  ;;  %v3743_v17 = vmax.f32 %v3739_v0, 0.0 }
 0x6ed   : > { %v3744_v3 = vpack.c.bf16 %v3740_v1, %v3740_v1  ;;  %v3746_v4 = vpack.c.bf16 %v3742_v27, %v3742_v27 }
 0x6ee   : > { %v3745_v2 = vpack.c.bf16 %v3741_v37, %v3741_v37  ;;  %v3747_v25 = vpack.c.bf16 %v3743_v17, %v3743_v17 }
 0x6f0   : > { %3829 = vmatprep.mubr.bf16.mxu0 %v3745_v2  ;;  %3869 = vmatprep.mubr.bf16.mxu1 %v3747_v25 }
 0x6f1   : > { %3830 = vmatmul.mubr.bf16.vlgmr.msra.gmra.mrb[28].mxu0 %v3744_v3  ;;  %3870 = vmatmul.mubr.bf16.vlgmr.msra.gmra.mrb[28].mxu1 %v3746_v4 }
 0x7c4   : > { %v4534_v5 = vpop.f32.mrb[28].mxu0  ;;  %v4556_v6 = vpop.f32.mrb[28].mxu1 }
 0x7c5   : > { %v4535_v12 = vpop.f32.mrb[29].mxu0  ;;  %v4557_v21 = vpop.f32.mrb[29].mxu1 }
 0x7c6   : > { %v4536_v8 = vadd.f32 %v4535_v12, %v4534_v5  ;;  %v4558_v23 = vadd.f32 %v4557_v21, %v4556_v6  ;;  %v4537_v11 = vpop.f32.mrb[30].mxu0  ;;  %v4559_v24 = vpop.f32.mrb[30].mxu1 }
 0x7c7   : > { %v4538_v30 = vpop.f32.mrb[31].mxu0  ;;  %v4560_v39 = vpop.f32.mrb[31].mxu1 }
 0x7c8   : > { %v3872_v31 = vadd.f32 %v4558_v23, %v4536_v8 }
 0x7ca   : > { %v3885_v43 = vmul.f32 %v4450_v29, %v3872_v31 }
 0x7cc   : > { %v3894_v33 = vadd.f32 %v4452_v32, %v3885_v43 }
 0x7ce   : > { %4453 = vst [vmem:[%s6206_s10 + $0x8] sm:$0xff] %v3894_v33 }
 0x7cf   : > { %5073 = shalt.err (!%p5070_p11)
}
 0x7d0   : > { %s5074_s23 = scalar_lea.hbm %s6388_s11, 256  ;;  %s5078_s7 = scalar_lea.hbm %s6522_s8, 1024 }
 0x7d1   : > { %p5075_p7 = scmp.ne.s32.totalorder %s6388_s11, %s5074_s23  ;;  %p5079_p6 = scmp.lt.u32.totalorder %s6388_s11, %s6522_s8 }
 0x7d2   : > { %p5080_p8 = scmp.lt.u32.totalorder %s5078_s7, %s5074_s23  ;;  %p5082_p13 = scmp.lt.u32.totalorder %s5074_s23, %s6388_s11 }
 0x7d3   : > { %p5076_p1 = pnand %p5075_p7, %p6523_p2 }
 0x7d4   : > { %p5081_p5 = por %p5080_p8, %p5079_p6 }
 0x7d5   : > { %p5077_p0 = pneg %p5076_p1 }
 0x7d6   : > { %p5083_p10 = por %p5082_p13, %p5081_p5 }
 0x7d8   : > { %p5084_p12 = pnand %p5083_p10, %p5077_p0 }
 0x7da   : > { %5087 = shalt.err (!%p5084_p12)
}
 0x7db   : > { %s5169_s9 = smov 128   ;;  %s5170_s22 = smov 8  }
 0x7dc   : > { %4667 = dma.vmem_to_hbm [thread:$0]  (%p6523_p2), %s6390_s24, 256, %s6388_s11, %s3898_s3, %s5169_s9, %s5169_s9, %s5170_s22  }
 0x7dd PF: > { %s6524_s1 = sld [smem:[#allocation30_spill]]  ;;  %p4708_p9 = scmp.ge.s32.totalorder %s5146_s16, 2 }
 0x7de   : > { %s3926_s10 = sand.u32 1, %s5134_s13  }
 0x7df   : > { %s3927_s25 = scalar_lea.sflag [#allocation4], %s3926_s10 }
 0x7e3   : > { %p6525_p3 = scmp.ne.s32.totalorder %s6524_s1, 0 }
 0x7e5   : > { %p4702_p4 = pnand %p4708_p9, %p6525_p3 }
 0x7e7   : > { %5129 = dma.done.wait (!%p4702_p4), %s3927_s25, 256  }
 0x7e8   : > { %5131 = vsyncadd (!%p4702_p4), %s3927_s25, 4294967040  ;;  %s6526_s16 = sld [smem:[#allocation28_spill]]  ;;  %s6527_s30 = sld [smem:[#allocation27_spill]] }
 0x7e9   : > { %s6528_s15 = sld [smem:[#allocation29_spill]]  ;;  %s6529_s13 = smov %s5138_s14 }
 0x7ee   : > { %p36_p11 = scmp.ge.s32.totalorder %s6526_s16, 6   ;;  %s6530_s14 = smov %s6527_s30 }
 0x7f0   :  { %38 = sbr.rel (!%p36_p11) target bundleno = 24 (0x18), region = 216 }
 0x7f7   :  { %3932 = vsyncpa [#allocation3], 1 }
 0x7f8   :  { %3934 = vsyncpa [#allocation3 + $0x1], 1 }
 0x7f9   :  { %3935 = vsyncpa [#allocation6], 1 }
 0x7fa   :  { %3937 = vsyncpa [#allocation6 + $0x1], 1 }
 0x7fb   :  { %3938 = vsyncpa [#allocation9], 1 }
 0x7fc   :  { %3940 = vsyncpa [#allocation9 + $0x1], 1 }
 0x7fd   :  { %3941 = vsyncpa [#allocation12], 1 }
 0x7fe   :  { %3943 = vsyncpa [#allocation12 + $0x1], 1 }
 0x7ff   :  { %3944 = vsyncpa [#allocation15], 1 }
 0x800   :  { %3946 = vsyncpa [#allocation15 + $0x1], 1 }
 0x801   :  { %3947 = vsyncpa [#allocation18], 1 }
 0x802   :  { %3949 = vsyncpa [#allocation18 + $0x1], 1 }
 0x803   :  { %3950 = vsyncpa [#allocation4], 1 }
 0x804   :  { %3952 = vsyncpa [#allocation4 + $0x1], 1 }

</bundles_post_ra>
